<compile_context>
chip_gen: v7x
topology: tpu7x:2x2x1
jax: 0.10.0
libtpu: 0.0.40
codegen_flags: <defaults>
</compile_context>

<pallas_src>
import functools

import jax
import jax.numpy as jnp
from jax.experimental import pallas as pl
from jax.experimental.pallas import tpu as pltpu


# -----------------------------------------------------------------------------
# Fused CBAM kernel: channel attention + spatial attention in one pass.
# -----------------------------------------------------------------------------
def _cbam_kernel(x_ref, w1t_ref, w2t_ref, wsp_ref, rc_ref, o_ref, *, H, W, ksize):
    # x_ref  : (bN, C, HW) f32   (HW on lanes, C on sublanes, bN planes)
    # w1t_ref: (C, hid) f32 ; w2t_ref: (hid, C) f32   (pre-transposed 1x1 convs)
    # wsp_ref: (2*k*k,) f32 in SMEM: [avg-kernel row-major | max-kernel row-major]
    # rc_ref : (2, HW) int32: row 0 = y index, row 1 = x index of each position
    x = x_ref[...]
    bN, C, HW = x.shape
    k = ksize
    pad = (k - 1) // 2

    # ---------------- channel attention ----------------
    avg_c = jnp.mean(x, axis=2)                       # (bN, C)   lane reduce
    max_c = jnp.max(x, axis=2)                        # (bN, C)
    w1t = w1t_ref[...]                                # (C, hid)
    w2t = w2t_ref[...]                                # (hid, C)

    def mlp(v):                                       # shared 1x1-conv MLP
        h = jnp.maximum(jnp.dot(v, w1t, preferred_element_type=jnp.float32), 0.0)
        return jnp.dot(h, w2t, preferred_element_type=jnp.float32)

    ch_scale = jax.nn.sigmoid(mlp(avg_c) + mlp(max_c))    # (bN, C)
    out1 = x * ch_scale[:, :, None]                       # (bN, C, HW)

    # ---------------- spatial attention ----------------
    avg_s = jnp.mean(out1, axis=1)                    # (bN, HW)  sublane reduce
    max_s = jnp.max(out1, axis=1)                     # (bN, HW)

    row = rc_ref[0:1, :]                              # (1, HW) int32
    col = rc_ref[1:2, :]                              # (1, HW) int32

    # k x k conv (pad = (k-1)//2) on the flattened maps: a shift of (di, dj) in
    # (H, W) is a lane roll by di*W + dj in HW; out-of-range taps are masked.
    acc = jnp.zeros((bN, HW), jnp.float32)
    for ki in range(k):
        di = ki - pad
        for kj in range(k):
            dj = kj - pad
            shift = di * W + dj
            amt = (-shift) % HW
            if amt == 0:
                a_t, m_t = avg_s, max_s
            else:
                a_t = pltpu.roll(avg_s, shift=amt, axis=1)   # XLU lane roll
                m_t = pltpu.roll(max_s, shift=amt, axis=1)
            valid = ((row >= -di) & (row < H - di)
                     & (col >= -dj) & (col < W - dj))        # (1, HW) bool
            wa = wsp_ref[ki * k + kj]                        # scalar (SMEM)
            wm = wsp_ref[k * k + ki * k + kj]
            tap = wa * a_t + wm * m_t                        # (bN, HW)
            acc = acc + jnp.where(valid, tap, 0.0)

    sp_scale = jax.nn.sigmoid(acc)                           # (bN, HW)
    o_ref[...] = out1 * sp_scale[:, None, :]                 # broadcast over C


def _choose_bn(n, c, hw, budget_bytes=40 << 20):
    """Largest bN dividing n s.t. blocks fit a conservative VMEM budget (safe on
    v7x's 64 MiB) while keeping at least 2 grid steps when n >= 2."""
    per_batch = c * hw * 4                      # f32 bytes of one batch element
    best = 1
    for cand in range(1, n + 1):
        if n % cand:
            continue
        if 6 * cand * per_batch > budget_bytes:  # in+out double-buffered + temps
            continue
        if n >= 2 and n // cand < 2:             # keep >=2 steps (megacore/pipe)
            continue
        best = cand
    return best


# -----------------------------------------------------------------------------
# Wrapper (host-side glue: reshapes + weight prep only).
# -----------------------------------------------------------------------------
def cbam_pallas(x, w1, w2, wsp):
    """x: (N, C, H, W) f32; w1: (C//r, C); w2: (C, C//r); wsp: (1, 2, k, k)."""
    N, C, H, W = x.shape
    HW = H * W
    hid = w1.shape[0]
    k = wsp.shape[-1]

    x2 = x.reshape(N, C, HW)                               # lane-dense layout
    w1t = jnp.transpose(w1).astype(jnp.float32)            # (C, hid)
    w2t = jnp.transpose(w2).astype(jnp.float32)            # (hid, C)
    wsp_flat = wsp.reshape(-1).astype(jnp.float32)         # (2*k*k,)
    pos = jnp.arange(HW, dtype=jnp.int32)
    rc = jnp.stack([pos // W, pos % W], axis=0)            # (2, HW) int32

    bN = _choose_bn(N, C, HW)
    grid = (N // bN,)
    block_bytes = bN * C * HW * 4
    vmem_limit = int(min(64 << 20, max(32 << 20, 6 * block_bytes + (4 << 20))))

    kernel = functools.partial(_cbam_kernel, H=H, W=W, ksize=k)
    out2 = pl.pallas_call(
        kernel,
        out_shape=jax.ShapeDtypeStruct((N, C, HW), jnp.float32),
        grid=grid,
        in_specs=[
            pl.BlockSpec((bN, C, HW), lambda n: (n, 0, 0)),
            pl.BlockSpec((C, hid), lambda n: (0, 0)),
            pl.BlockSpec((hid, C), lambda n: (0, 0)),
            pl.BlockSpec(memory_space=pltpu.MemorySpace.SMEM),
            pl.BlockSpec((2, HW), lambda n: (0, 0)),
        ],
        out_specs=pl.BlockSpec((bN, C, HW), lambda n: (n, 0, 0)),
        compiler_params=pltpu.CompilerParams(
            dimension_semantics=("parallel",),
            vmem_limit_bytes=vmem_limit,
        ),
    )(x2, w1t, w2t, wsp_flat, rc)
    return out2.reshape(N, C, H, W)


# -----------------------------------------------------------------------------
# Pure-JAX reference (mirrors the PyTorch module) for a correctness check.
# -----------------------------------------------------------------------------
def cbam_ref(x, w1, w2, wsp):
    avg_c = jnp.mean(x, axis=(2, 3))                    # (N, C)
    max_c = jnp.max(x, axis=(2, 3))                     # (N, C)

    def mlp(v):
        h = jnp.maximum(v @ w1.T, 0.0)                  # (N, hid)
        return h @ w2.T                                 # (N, C)

    ca = jax.nn.sigmoid(mlp(avg_c) + mlp(max_c))        # (N, C)
    out1 = x * ca[:, :, None, None]

    avg_s = jnp.mean(out1, axis=1, keepdims=True)       # (N, 1, H, W)
    max_s = jnp.max(out1, axis=1, keepdims=True)        # (N, 1, H, W)
    cat = jnp.concatenate([avg_s, max_s], axis=1)       # (N, 2, H, W)
    pad = (wsp.shape[-1] - 1) // 2
    conv = jax.lax.conv_general_dilated(
        cat, wsp, window_strides=(1, 1), padding=((pad, pad), (pad, pad)),
        dimension_numbers=("NCHW", "OIHW", "NCHW"))
    sa = jax.nn.sigmoid(conv)                           # (N, 1, H, W)
    return out1 * sa


if __name__ == "__main__":
    # Small shapes consistent with the module: reduction=16 => need C >= 16.
    N, C, H, W = 2, 32, 16, 16
    reduction, ksize = 16, 7
    hid = C // reduction

    key = jax.random.PRNGKey(0)
    k1, k2, k3, k4 = jax.random.split(key, 4)
    x = jax.random.normal(k1, (N, C, H, W), dtype=jnp.float32)
    # Deterministic synthetic parameters (shapes from the module's __init__)
    w1 = 0.1 * jax.random.normal(k2, (hid, C), dtype=jnp.float32)         # Conv2d(C, C//r, 1)
    w2 = 0.1 * jax.random.normal(k3, (C, hid), dtype=jnp.float32)         # Conv2d(C//r, C, 1)
    wsp = 0.1 * jax.random.normal(k4, (1, 2, ksize, ksize), jnp.float32)  # Conv2d(2, 1, 7)

    out = cbam_pallas(x, w1, w2, wsp)
    out = jax.block_until_ready(out)

    ref = cbam_ref(x, w1, w2, wsp)
    err = float(jnp.max(jnp.abs(out - ref)))
    assert out.shape == (N, C, H, W) and out.dtype == jnp.float32
    assert err < 1e-4, f"max abs error {err}"
    print("KERNEL_OK")
</pallas_src>

<mosaic_0001>
module attributes {stable_mosaic.version = 11 : i64} {
  func.func @_cbam_kernel(%arg0: i32, %arg1: memref<1x32x256xf32, #tpu.memory_space<vmem>>, %arg2: memref<32x2xf32, #tpu.memory_space<vmem>>, %arg3: memref<2x32xf32, #tpu.memory_space<vmem>>, %arg4: memref<98xf32, #tpu.memory_space<smem>>, %arg5: memref<2x256xi32, #tpu.memory_space<vmem>>, %arg6: memref<1x32x256xf32, #tpu.memory_space<vmem>>) attributes {dimension_semantics = [#tpu.dimension_semantics<parallel>], iteration_bounds = array<i64: 2>, scalar_prefetch = 0 : i64, scratch_operands = 0 : i64, tpu.core_type = #tpu.core_type<tc>, window_params = [{transform_indices = @transform_0, window_bounds = array<i64: 1, 32, 256>}, {pipeline_mode = #tpu.pipeline_mode<synchronous>, transform_indices = @transform_1, window_bounds = array<i64: 32, 2>}, {pipeline_mode = #tpu.pipeline_mode<synchronous>, transform_indices = @transform_2, window_bounds = array<i64: 2, 32>}, {transform_indices = @transform_3, window_bounds = array<i64: 98>}, {pipeline_mode = #tpu.pipeline_mode<synchronous>, transform_indices = @transform_4, window_bounds = array<i64: 2, 256>}, {transform_indices = @transform_5, window_bounds = array<i64: 1, 32, 256>}]} {
    %c0 = arith.constant 0 : index
    %c0_0 = arith.constant 0 : index
    %c0_1 = arith.constant 0 : index
    %0 = vector.load %arg1[%c0, %c0_0, %c0_1] : memref<1x32x256xf32, #tpu.memory_space<vmem>>, vector<1x32x256xf32>
    %cst = arith.constant dense<0.000000e+00> : vector<1x32xf32>
    %1 = vector.multi_reduction <add>, %0, %cst [2] : vector<1x32x256xf32> to vector<1x32xf32>
    %cst_2 = arith.constant 2.560000e+02 : f32
    %2 = vector.broadcast %cst_2 : f32 to vector<1x32xf32>
    %3 = arith.divf %1, %2 : vector<1x32xf32>
    %cst_3 = arith.constant dense<0xFF800000> : vector<1x32xf32>
    %4 = vector.multi_reduction <maximumf>, %0, %cst_3 [2] : vector<1x32x256xf32> to vector<1x32xf32>
    %c0_4 = arith.constant 0 : index
    %c0_5 = arith.constant 0 : index
    %5 = vector.load %arg2[%c0_4, %c0_5] : memref<32x2xf32, #tpu.memory_space<vmem>>, vector<32x2xf32>
    %c0_6 = arith.constant 0 : index
    %c0_7 = arith.constant 0 : index
    %6 = vector.load %arg3[%c0_6, %c0_7] : memref<2x32xf32, #tpu.memory_space<vmem>>, vector<2x32xf32>
    %cst_8 = arith.constant dense<0.000000e+00> : vector<1x2xf32>
    %7 = tpu.matmul %3, %5, %cst_8 {dimension_numbers = #tpu.dot_dimension_numbers<[1], [0], [0], [1], [0, 0, 1, 1], [], []>} : vector<1x32xf32>, vector<32x2xf32>, vector<1x2xf32> -> vector<1x2xf32>
    %cst_9 = arith.constant 0.000000e+00 : f32
    %8 = vector.broadcast %cst_9 : f32 to vector<1x2xf32>
    %9 = arith.maximumf %7, %8 : vector<1x2xf32>
    %cst_10 = arith.constant dense<0.000000e+00> : vector<1x32xf32>
    %10 = tpu.matmul %9, %6, %cst_10 {dimension_numbers = #tpu.dot_dimension_numbers<[1], [0], [0], [1], [0, 0, 1, 1], [], []>} : vector<1x2xf32>, vector<2x32xf32>, vector<1x32xf32> -> vector<1x32xf32>
    %cst_11 = arith.constant dense<0.000000e+00> : vector<1x2xf32>
    %11 = tpu.matmul %4, %5, %cst_11 {dimension_numbers = #tpu.dot_dimension_numbers<[1], [0], [0], [1], [0, 0, 1, 1], [], []>} : vector<1x32xf32>, vector<32x2xf32>, vector<1x2xf32> -> vector<1x2xf32>
    %cst_12 = arith.constant 0.000000e+00 : f32
    %12 = vector.broadcast %cst_12 : f32 to vector<1x2xf32>
    %13 = arith.maximumf %11, %12 : vector<1x2xf32>
    %cst_13 = arith.constant dense<0.000000e+00> : vector<1x32xf32>
    %14 = tpu.matmul %13, %6, %cst_13 {dimension_numbers = #tpu.dot_dimension_numbers<[1], [0], [0], [1], [0, 0, 1, 1], [], []>} : vector<1x2xf32>, vector<2x32xf32>, vector<1x32xf32> -> vector<1x32xf32>
    %15 = arith.addf %10, %14 : vector<1x32xf32>
    %16 = arith.negf %15 : vector<1x32xf32>
    %17 = math.exp %16 : vector<1x32xf32>
    %cst_14 = arith.constant 1.000000e+00 : f32
    %18 = vector.broadcast %cst_14 : f32 to vector<1x32xf32>
    %19 = arith.addf %18, %17 : vector<1x32xf32>
    %20 = arith.divf %18, %19 : vector<1x32xf32>
    %21 = vector.shape_cast %20 : vector<1x32xf32> to vector<1x32x1xf32>
    %22 = vector.broadcast %21 : vector<1x32x1xf32> to vector<1x32x256xf32>
    %23 = arith.mulf %0, %22 : vector<1x32x256xf32>
    %cst_15 = arith.constant dense<0.000000e+00> : vector<1x256xf32>
    %24 = vector.multi_reduction <add>, %23, %cst_15 [1] : vector<1x32x256xf32> to vector<1x256xf32>
    %cst_16 = arith.constant 3.200000e+01 : f32
    %25 = vector.broadcast %cst_16 : f32 to vector<1x256xf32>
    %26 = arith.divf %24, %25 : vector<1x256xf32>
    %cst_17 = arith.constant dense<0xFF800000> : vector<1x256xf32>
    %27 = vector.multi_reduction <maximumf>, %23, %cst_17 [1] : vector<1x32x256xf32> to vector<1x256xf32>
    %c0_18 = arith.constant 0 : index
    %c0_19 = arith.constant 0 : index
    %28 = vector.load %arg5[%c0_18, %c0_19] : memref<2x256xi32, #tpu.memory_space<vmem>>, vector<1x256xi32>
    %c1 = arith.constant 1 : index
    %c0_20 = arith.constant 0 : index
    %29 = vector.load %arg5[%c1, %c0_20] : memref<2x256xi32, #tpu.memory_space<vmem>>, vector<1x256xi32>
    %cst_21 = arith.constant 0.000000e+00 : f32
    %30 = vector.broadcast %cst_21 : f32 to vector<1x256xf32>
    %c51_i32 = arith.constant 51 : i32
    %31 = tpu.dynamic_rotate %26 by %c51_i32 dim 1 : vector<1x256xf32>, i32 -> vector<1x256xf32>
    %c51_i32_22 = arith.constant 51 : i32
    %32 = tpu.dynamic_rotate %27 by %c51_i32_22 dim 1 : vector<1x256xf32>, i32 -> vector<1x256xf32>
    %c3_i32 = arith.constant 3 : i32
    %33 = vector.broadcast %c3_i32 : i32 to vector<1x256xi32>
    %34 = arith.cmpi sge, %28, %33 : vector<1x256xi32>
    %c19_i32 = arith.constant 19 : i32
    %35 = vector.broadcast %c19_i32 : i32 to vector<1x256xi32>
    %36 = arith.cmpi slt, %28, %35 : vector<1x256xi32>
    %37 = arith.andi %34, %36 : vector<1x256xi1>
    %c3_i32_23 = arith.constant 3 : i32
    %38 = vector.broadcast %c3_i32_23 : i32 to vector<1x256xi32>
    %39 = arith.cmpi sge, %29, %38 : vector<1x256xi32>
    %40 = arith.andi %37, %39 : vector<1x256xi1>
    %c19_i32_24 = arith.constant 19 : i32
    %41 = vector.broadcast %c19_i32_24 : i32 to vector<1x256xi32>
    %42 = arith.cmpi slt, %29, %41 : vector<1x256xi32>
    %43 = arith.andi %40, %42 : vector<1x256xi1>
    %c0_25 = arith.constant 0 : index
    %44 = memref.load %arg4[%c0_25] : memref<98xf32, #tpu.memory_space<smem>>
    %c49 = arith.constant 49 : index
    %45 = memref.load %arg4[%c49] : memref<98xf32, #tpu.memory_space<smem>>
    %46 = vector.broadcast %44 : f32 to vector<1x256xf32>
    %47 = arith.mulf %46, %31 : vector<1x256xf32>
    %48 = vector.broadcast %45 : f32 to vector<1x256xf32>
    %49 = arith.mulf %48, %32 : vector<1x256xf32>
    %50 = arith.addf %47, %49 : vector<1x256xf32>
    %cst_26 = arith.constant 0.000000e+00 : f32
    %51 = vector.broadcast %cst_26 : f32 to vector<1x256xf32>
    %52 = arith.select %43, %50, %51 : vector<1x256xi1>, vector<1x256xf32>
    %53 = arith.addf %30, %52 : vector<1x256xf32>
    %c50_i32 = arith.constant 50 : i32
    %54 = tpu.dynamic_rotate %26 by %c50_i32 dim 1 : vector<1x256xf32>, i32 -> vector<1x256xf32>
    %c50_i32_27 = arith.constant 50 : i32
    %55 = tpu.dynamic_rotate %27 by %c50_i32_27 dim 1 : vector<1x256xf32>, i32 -> vector<1x256xf32>
    %c3_i32_28 = arith.constant 3 : i32
    %56 = vector.broadcast %c3_i32_28 : i32 to vector<1x256xi32>
    %57 = arith.cmpi sge, %28, %56 : vector<1x256xi32>
    %c19_i32_29 = arith.constant 19 : i32
    %58 = vector.broadcast %c19_i32_29 : i32 to vector<1x256xi32>
    %59 = arith.cmpi slt, %28, %58 : vector<1x256xi32>
    %60 = arith.andi %57, %59 : vector<1x256xi1>
    %c2_i32 = arith.constant 2 : i32
    %61 = vector.broadcast %c2_i32 : i32 to vector<1x256xi32>
    %62 = arith.cmpi sge, %29, %61 : vector<1x256xi32>
    %63 = arith.andi %60, %62 : vector<1x256xi1>
    %c18_i32 = arith.constant 18 : i32
    %64 = vector.broadcast %c18_i32 : i32 to vector<1x256xi32>
    %65 = arith.cmpi slt, %29, %64 : vector<1x256xi32>
    %66 = arith.andi %63, %65 : vector<1x256xi1>
    %c1_30 = arith.constant 1 : index
    %67 = memref.load %arg4[%c1_30] : memref<98xf32, #tpu.memory_space<smem>>
    %c50 = arith.constant 50 : index
    %68 = memref.load %arg4[%c50] : memref<98xf32, #tpu.memory_space<smem>>
    %69 = vector.broadcast %67 : f32 to vector<1x256xf32>
    %70 = arith.mulf %69, %54 : vector<1x256xf32>
    %71 = vector.broadcast %68 : f32 to vector<1x256xf32>
    %72 = arith.mulf %71, %55 : vector<1x256xf32>
    %73 = arith.addf %70, %72 : vector<1x256xf32>
    %cst_31 = arith.constant 0.000000e+00 : f32
    %74 = vector.broadcast %cst_31 : f32 to vector<1x256xf32>
    %75 = arith.select %66, %73, %74 : vector<1x256xi1>, vector<1x256xf32>
    %76 = arith.addf %53, %75 : vector<1x256xf32>
    %c49_i32 = arith.constant 49 : i32
    %77 = tpu.dynamic_rotate %26 by %c49_i32 dim 1 : vector<1x256xf32>, i32 -> vector<1x256xf32>
    %c49_i32_32 = arith.constant 49 : i32
    %78 = tpu.dynamic_rotate %27 by %c49_i32_32 dim 1 : vector<1x256xf32>, i32 -> vector<1x256xf32>
    %c3_i32_33 = arith.constant 3 : i32
    %79 = vector.broadcast %c3_i32_33 : i32 to vector<1x256xi32>
    %80 = arith.cmpi sge, %28, %79 : vector<1x256xi32>
    %c19_i32_34 = arith.constant 19 : i32
    %81 = vector.broadcast %c19_i32_34 : i32 to vector<1x256xi32>
    %82 = arith.cmpi slt, %28, %81 : vector<1x256xi32>
    %83 = arith.andi %80, %82 : vector<1x256xi1>
    %c1_i32 = arith.constant 1 : i32
    %84 = vector.broadcast %c1_i32 : i32 to vector<1x256xi32>
    %85 = arith.cmpi sge, %29, %84 : vector<1x256xi32>
    %86 = arith.andi %83, %85 : vector<1x256xi1>
    %c17_i32 = arith.constant 17 : i32
    %87 = vector.broadcast %c17_i32 : i32 to vector<1x256xi32>
    %88 = arith.cmpi slt, %29, %87 : vector<1x256xi32>
    %89 = arith.andi %86, %88 : vector<1x256xi1>
    %c2 = arith.constant 2 : index
    %90 = memref.load %arg4[%c2] : memref<98xf32, #tpu.memory_space<smem>>
    %c51 = arith.constant 51 : index
    %91 = memref.load %arg4[%c51] : memref<98xf32, #tpu.memory_space<smem>>
    %92 = vector.broadcast %90 : f32 to vector<1x256xf32>
    %93 = arith.mulf %92, %77 : vector<1x256xf32>
    %94 = vector.broadcast %91 : f32 to vector<1x256xf32>
    %95 = arith.mulf %94, %78 : vector<1x256xf32>
    %96 = arith.addf %93, %95 : vector<1x256xf32>
    %cst_35 = arith.constant 0.000000e+00 : f32
    %97 = vector.broadcast %cst_35 : f32 to vector<1x256xf32>
    %98 = arith.select %89, %96, %97 : vector<1x256xi1>, vector<1x256xf32>
    %99 = arith.addf %76, %98 : vector<1x256xf32>
    %c48_i32 = arith.constant 48 : i32
    %100 = tpu.dynamic_rotate %26 by %c48_i32 dim 1 : vector<1x256xf32>, i32 -> vector<1x256xf32>
    %c48_i32_36 = arith.constant 48 : i32
    %101 = tpu.dynamic_rotate %27 by %c48_i32_36 dim 1 : vector<1x256xf32>, i32 -> vector<1x256xf32>
    %c3_i32_37 = arith.constant 3 : i32
    %102 = vector.broadcast %c3_i32_37 : i32 to vector<1x256xi32>
    %103 = arith.cmpi sge, %28, %102 : vector<1x256xi32>
    %c19_i32_38 = arith.constant 19 : i32
    %104 = vector.broadcast %c19_i32_38 : i32 to vector<1x256xi32>
    %105 = arith.cmpi slt, %28, %104 : vector<1x256xi32>
    %106 = arith.andi %103, %105 : vector<1x256xi1>
    %c0_i32 = arith.constant 0 : i32
    %107 = vector.broadcast %c0_i32 : i32 to vector<1x256xi32>
    %108 = arith.cmpi sge, %29, %107 : vector<1x256xi32>
    %109 = arith.andi %106, %108 : vector<1x256xi1>
    %c16_i32 = arith.constant 16 : i32
    %110 = vector.broadcast %c16_i32 : i32 to vector<1x256xi32>
    %111 = arith.cmpi slt, %29, %110 : vector<1x256xi32>
    %112 = arith.andi %109, %111 : vector<1x256xi1>
    %c3 = arith.constant 3 : index
    %113 = memref.load %arg4[%c3] : memref<98xf32, #tpu.memory_space<smem>>
    %c52 = arith.constant 52 : index
    %114 = memref.load %arg4[%c52] : memref<98xf32, #tpu.memory_space<smem>>
    %115 = vector.broadcast %113 : f32 to vector<1x256xf32>
    %116 = arith.mulf %115, %100 : vector<1x256xf32>
    %117 = vector.broadcast %114 : f32 to vector<1x256xf32>
    %118 = arith.mulf %117, %101 : vector<1x256xf32>
    %119 = arith.addf %116, %118 : vector<1x256xf32>
    %cst_39 = arith.constant 0.000000e+00 : f32
    %120 = vector.broadcast %cst_39 : f32 to vector<1x256xf32>
    %121 = arith.select %112, %119, %120 : vector<1x256xi1>, vector<1x256xf32>
    %122 = arith.addf %99, %121 : vector<1x256xf32>
    %c47_i32 = arith.constant 47 : i32
    %123 = tpu.dynamic_rotate %26 by %c47_i32 dim 1 : vector<1x256xf32>, i32 -> vector<1x256xf32>
    %c47_i32_40 = arith.constant 47 : i32
    %124 = tpu.dynamic_rotate %27 by %c47_i32_40 dim 1 : vector<1x256xf32>, i32 -> vector<1x256xf32>
    %c3_i32_41 = arith.constant 3 : i32
    %125 = vector.broadcast %c3_i32_41 : i32 to vector<1x256xi32>
    %126 = arith.cmpi sge, %28, %125 : vector<1x256xi32>
    %c19_i32_42 = arith.constant 19 : i32
    %127 = vector.broadcast %c19_i32_42 : i32 to vector<1x256xi32>
    %128 = arith.cmpi slt, %28, %127 : vector<1x256xi32>
    %129 = arith.andi %126, %128 : vector<1x256xi1>
    %c-1_i32 = arith.constant -1 : i32
    %130 = vector.broadcast %c-1_i32 : i32 to vector<1x256xi32>
    %131 = arith.cmpi sge, %29, %130 : vector<1x256xi32>
    %132 = arith.andi %129, %131 : vector<1x256xi1>
    %c15_i32 = arith.constant 15 : i32
    %133 = vector.broadcast %c15_i32 : i32 to vector<1x256xi32>
    %134 = arith.cmpi slt, %29, %133 : vector<1x256xi32>
    %135 = arith.andi %132, %134 : vector<1x256xi1>
    %c4 = arith.constant 4 : index
    %136 = memref.load %arg4[%c4] : memref<98xf32, #tpu.memory_space<smem>>
    %c53 = arith.constant 53 : index
    %137 = memref.load %arg4[%c53] : memref<98xf32, #tpu.memory_space<smem>>
    %138 = vector.broadcast %136 : f32 to vector<1x256xf32>
    %139 = arith.mulf %138, %123 : vector<1x256xf32>
    %140 = vector.broadcast %137 : f32 to vector<1x256xf32>
    %141 = arith.mulf %140, %124 : vector<1x256xf32>
    %142 = arith.addf %139, %141 : vector<1x256xf32>
    %cst_43 = arith.constant 0.000000e+00 : f32
    %143 = vector.broadcast %cst_43 : f32 to vector<1x256xf32>
    %144 = arith.select %135, %142, %143 : vector<1x256xi1>, vector<1x256xf32>
    %145 = arith.addf %122, %144 : vector<1x256xf32>
    %c46_i32 = arith.constant 46 : i32
    %146 = tpu.dynamic_rotate %26 by %c46_i32 dim 1 : vector<1x256xf32>, i32 -> vector<1x256xf32>
    %c46_i32_44 = arith.constant 46 : i32
    %147 = tpu.dynamic_rotate %27 by %c46_i32_44 dim 1 : vector<1x256xf32>, i32 -> vector<1x256xf32>
    %c3_i32_45 = arith.constant 3 : i32
    %148 = vector.broadcast %c3_i32_45 : i32 to vector<1x256xi32>
    %149 = arith.cmpi sge, %28, %148 : vector<1x256xi32>
    %c19_i32_46 = arith.constant 19 : i32
    %150 = vector.broadcast %c19_i32_46 : i32 to vector<1x256xi32>
    %151 = arith.cmpi slt, %28, %150 : vector<1x256xi32>
    %152 = arith.andi %149, %151 : vector<1x256xi1>
    %c-2_i32 = arith.constant -2 : i32
    %153 = vector.broadcast %c-2_i32 : i32 to vector<1x256xi32>
    %154 = arith.cmpi sge, %29, %153 : vector<1x256xi32>
    %155 = arith.andi %152, %154 : vector<1x256xi1>
    %c14_i32 = arith.constant 14 : i32
    %156 = vector.broadcast %c14_i32 : i32 to vector<1x256xi32>
    %157 = arith.cmpi slt, %29, %156 : vector<1x256xi32>
    %158 = arith.andi %155, %157 : vector<1x256xi1>
    %c5 = arith.constant 5 : index
    %159 = memref.load %arg4[%c5] : memref<98xf32, #tpu.memory_space<smem>>
    %c54 = arith.constant 54 : index
    %160 = memref.load %arg4[%c54] : memref<98xf32, #tpu.memory_space<smem>>
    %161 = vector.broadcast %159 : f32 to vector<1x256xf32>
    %162 = arith.mulf %161, %146 : vector<1x256xf32>
    %163 = vector.broadcast %160 : f32 to vector<1x256xf32>
    %164 = arith.mulf %163, %147 : vector<1x256xf32>
    %165 = arith.addf %162, %164 : vector<1x256xf32>
    %cst_47 = arith.constant 0.000000e+00 : f32
    %166 = vector.broadcast %cst_47 : f32 to vector<1x256xf32>
    %167 = arith.select %158, %165, %166 : vector<1x256xi1>, vector<1x256xf32>
    %168 = arith.addf %145, %167 : vector<1x256xf32>
    %c45_i32 = arith.constant 45 : i32
    %169 = tpu.dynamic_rotate %26 by %c45_i32 dim 1 : vector<1x256xf32>, i32 -> vector<1x256xf32>
    %c45_i32_48 = arith.constant 45 : i32
    %170 = tpu.dynamic_rotate %27 by %c45_i32_48 dim 1 : vector<1x256xf32>, i32 -> vector<1x256xf32>
    %c3_i32_49 = arith.constant 3 : i32
    %171 = vector.broadcast %c3_i32_49 : i32 to vector<1x256xi32>
    %172 = arith.cmpi sge, %28, %171 : vector<1x256xi32>
    %c19_i32_50 = arith.constant 19 : i32
    %173 = vector.broadcast %c19_i32_50 : i32 to vector<1x256xi32>
    %174 = arith.cmpi slt, %28, %173 : vector<1x256xi32>
    %175 = arith.andi %172, %174 : vector<1x256xi1>
    %c-3_i32 = arith.constant -3 : i32
    %176 = vector.broadcast %c-3_i32 : i32 to vector<1x256xi32>
    %177 = arith.cmpi sge, %29, %176 : vector<1x256xi32>
    %178 = arith.andi %175, %177 : vector<1x256xi1>
    %c13_i32 = arith.constant 13 : i32
    %179 = vector.broadcast %c13_i32 : i32 to vector<1x256xi32>
    %180 = arith.cmpi slt, %29, %179 : vector<1x256xi32>
    %181 = arith.andi %178, %180 : vector<1x256xi1>
    %c6 = arith.constant 6 : index
    %182 = memref.load %arg4[%c6] : memref<98xf32, #tpu.memory_space<smem>>
    %c55 = arith.constant 55 : index
    %183 = memref.load %arg4[%c55] : memref<98xf32, #tpu.memory_space<smem>>
    %184 = vector.broadcast %182 : f32 to vector<1x256xf32>
    %185 = arith.mulf %184, %169 : vector<1x256xf32>
    %186 = vector.broadcast %183 : f32 to vector<1x256xf32>
    %187 = arith.mulf %186, %170 : vector<1x256xf32>
    %188 = arith.addf %185, %187 : vector<1x256xf32>
    %cst_51 = arith.constant 0.000000e+00 : f32
    %189 = vector.broadcast %cst_51 : f32 to vector<1x256xf32>
    %190 = arith.select %181, %188, %189 : vector<1x256xi1>, vector<1x256xf32>
    %191 = arith.addf %168, %190 : vector<1x256xf32>
    %c35_i32 = arith.constant 35 : i32
    %192 = tpu.dynamic_rotate %26 by %c35_i32 dim 1 : vector<1x256xf32>, i32 -> vector<1x256xf32>
    %c35_i32_52 = arith.constant 35 : i32
    %193 = tpu.dynamic_rotate %27 by %c35_i32_52 dim 1 : vector<1x256xf32>, i32 -> vector<1x256xf32>
    %c2_i32_53 = arith.constant 2 : i32
    %194 = vector.broadcast %c2_i32_53 : i32 to vector<1x256xi32>
    %195 = arith.cmpi sge, %28, %194 : vector<1x256xi32>
    %c18_i32_54 = arith.constant 18 : i32
    %196 = vector.broadcast %c18_i32_54 : i32 to vector<1x256xi32>
    %197 = arith.cmpi slt, %28, %196 : vector<1x256xi32>
    %198 = arith.andi %195, %197 : vector<1x256xi1>
    %c3_i32_55 = arith.constant 3 : i32
    %199 = vector.broadcast %c3_i32_55 : i32 to vector<1x256xi32>
    %200 = arith.cmpi sge, %29, %199 : vector<1x256xi32>
    %201 = arith.andi %198, %200 : vector<1x256xi1>
    %c19_i32_56 = arith.constant 19 : i32
    %202 = vector.broadcast %c19_i32_56 : i32 to vector<1x256xi32>
    %203 = arith.cmpi slt, %29, %202 : vector<1x256xi32>
    %204 = arith.andi %201, %203 : vector<1x256xi1>
    %c7 = arith.constant 7 : index
    %205 = memref.load %arg4[%c7] : memref<98xf32, #tpu.memory_space<smem>>
    %c56 = arith.constant 56 : index
    %206 = memref.load %arg4[%c56] : memref<98xf32, #tpu.memory_space<smem>>
    %207 = vector.broadcast %205 : f32 to vector<1x256xf32>
    %208 = arith.mulf %207, %192 : vector<1x256xf32>
    %209 = vector.broadcast %206 : f32 to vector<1x256xf32>
    %210 = arith.mulf %209, %193 : vector<1x256xf32>
    %211 = arith.addf %208, %210 : vector<1x256xf32>
    %cst_57 = arith.constant 0.000000e+00 : f32
    %212 = vector.broadcast %cst_57 : f32 to vector<1x256xf32>
    %213 = arith.select %204, %211, %212 : vector<1x256xi1>, vector<1x256xf32>
    %214 = arith.addf %191, %213 : vector<1x256xf32>
    %c34_i32 = arith.constant 34 : i32
    %215 = tpu.dynamic_rotate %26 by %c34_i32 dim 1 : vector<1x256xf32>, i32 -> vector<1x256xf32>
    %c34_i32_58 = arith.constant 34 : i32
    %216 = tpu.dynamic_rotate %27 by %c34_i32_58 dim 1 : vector<1x256xf32>, i32 -> vector<1x256xf32>
    %c2_i32_59 = arith.constant 2 : i32
    %217 = vector.broadcast %c2_i32_59 : i32 to vector<1x256xi32>
    %218 = arith.cmpi sge, %28, %217 : vector<1x256xi32>
    %c18_i32_60 = arith.constant 18 : i32
    %219 = vector.broadcast %c18_i32_60 : i32 to vector<1x256xi32>
    %220 = arith.cmpi slt, %28, %219 : vector<1x256xi32>
    %221 = arith.andi %218, %220 : vector<1x256xi1>
    %c2_i32_61 = arith.constant 2 : i32
    %222 = vector.broadcast %c2_i32_61 : i32 to vector<1x256xi32>
    %223 = arith.cmpi sge, %29, %222 : vector<1x256xi32>
    %224 = arith.andi %221, %223 : vector<1x256xi1>
    %c18_i32_62 = arith.constant 18 : i32
    %225 = vector.broadcast %c18_i32_62 : i32 to vector<1x256xi32>
    %226 = arith.cmpi slt, %29, %225 : vector<1x256xi32>
    %227 = arith.andi %224, %226 : vector<1x256xi1>
    %c8 = arith.constant 8 : index
    %228 = memref.load %arg4[%c8] : memref<98xf32, #tpu.memory_space<smem>>
    %c57 = arith.constant 57 : index
    %229 = memref.load %arg4[%c57] : memref<98xf32, #tpu.memory_space<smem>>
    %230 = vector.broadcast %228 : f32 to vector<1x256xf32>
    %231 = arith.mulf %230, %215 : vector<1x256xf32>
    %232 = vector.broadcast %229 : f32 to vector<1x256xf32>
    %233 = arith.mulf %232, %216 : vector<1x256xf32>
    %234 = arith.addf %231, %233 : vector<1x256xf32>
    %cst_63 = arith.constant 0.000000e+00 : f32
    %235 = vector.broadcast %cst_63 : f32 to vector<1x256xf32>
    %236 = arith.select %227, %234, %235 : vector<1x256xi1>, vector<1x256xf32>
    %237 = arith.addf %214, %236 : vector<1x256xf32>
    %c33_i32 = arith.constant 33 : i32
    %238 = tpu.dynamic_rotate %26 by %c33_i32 dim 1 : vector<1x256xf32>, i32 -> vector<1x256xf32>
    %c33_i32_64 = arith.constant 33 : i32
    %239 = tpu.dynamic_rotate %27 by %c33_i32_64 dim 1 : vector<1x256xf32>, i32 -> vector<1x256xf32>
    %c2_i32_65 = arith.constant 2 : i32
    %240 = vector.broadcast %c2_i32_65 : i32 to vector<1x256xi32>
    %241 = arith.cmpi sge, %28, %240 : vector<1x256xi32>
    %c18_i32_66 = arith.constant 18 : i32
    %242 = vector.broadcast %c18_i32_66 : i32 to vector<1x256xi32>
    %243 = arith.cmpi slt, %28, %242 : vector<1x256xi32>
    %244 = arith.andi %241, %243 : vector<1x256xi1>
    %c1_i32_67 = arith.constant 1 : i32
    %245 = vector.broadcast %c1_i32_67 : i32 to vector<1x256xi32>
    %246 = arith.cmpi sge, %29, %245 : vector<1x256xi32>
    %247 = arith.andi %244, %246 : vector<1x256xi1>
    %c17_i32_68 = arith.constant 17 : i32
    %248 = vector.broadcast %c17_i32_68 : i32 to vector<1x256xi32>
    %249 = arith.cmpi slt, %29, %248 : vector<1x256xi32>
    %250 = arith.andi %247, %249 : vector<1x256xi1>
    %c9 = arith.constant 9 : index
    %251 = memref.load %arg4[%c9] : memref<98xf32, #tpu.memory_space<smem>>
    %c58 = arith.constant 58 : index
    %252 = memref.load %arg4[%c58] : memref<98xf32, #tpu.memory_space<smem>>
    %253 = vector.broadcast %251 : f32 to vector<1x256xf32>
    %254 = arith.mulf %253, %238 : vector<1x256xf32>
    %255 = vector.broadcast %252 : f32 to vector<1x256xf32>
    %256 = arith.mulf %255, %239 : vector<1x256xf32>
    %257 = arith.addf %254, %256 : vector<1x256xf32>
    %cst_69 = arith.constant 0.000000e+00 : f32
    %258 = vector.broadcast %cst_69 : f32 to vector<1x256xf32>
    %259 = arith.select %250, %257, %258 : vector<1x256xi1>, vector<1x256xf32>
    %260 = arith.addf %237, %259 : vector<1x256xf32>
    %c32_i32 = arith.constant 32 : i32
    %261 = tpu.dynamic_rotate %26 by %c32_i32 dim 1 : vector<1x256xf32>, i32 -> vector<1x256xf32>
    %c32_i32_70 = arith.constant 32 : i32
    %262 = tpu.dynamic_rotate %27 by %c32_i32_70 dim 1 : vector<1x256xf32>, i32 -> vector<1x256xf32>
    %c2_i32_71 = arith.constant 2 : i32
    %263 = vector.broadcast %c2_i32_71 : i32 to vector<1x256xi32>
    %264 = arith.cmpi sge, %28, %263 : vector<1x256xi32>
    %c18_i32_72 = arith.constant 18 : i32
    %265 = vector.broadcast %c18_i32_72 : i32 to vector<1x256xi32>
    %266 = arith.cmpi slt, %28, %265 : vector<1x256xi32>
    %267 = arith.andi %264, %266 : vector<1x256xi1>
    %c0_i32_73 = arith.constant 0 : i32
    %268 = vector.broadcast %c0_i32_73 : i32 to vector<1x256xi32>
    %269 = arith.cmpi sge, %29, %268 : vector<1x256xi32>
    %270 = arith.andi %267, %269 : vector<1x256xi1>
    %c16_i32_74 = arith.constant 16 : i32
    %271 = vector.broadcast %c16_i32_74 : i32 to vector<1x256xi32>
    %272 = arith.cmpi slt, %29, %271 : vector<1x256xi32>
    %273 = arith.andi %270, %272 : vector<1x256xi1>
    %c10 = arith.constant 10 : index
    %274 = memref.load %arg4[%c10] : memref<98xf32, #tpu.memory_space<smem>>
    %c59 = arith.constant 59 : index
    %275 = memref.load %arg4[%c59] : memref<98xf32, #tpu.memory_space<smem>>
    %276 = vector.broadcast %274 : f32 to vector<1x256xf32>
    %277 = arith.mulf %276, %261 : vector<1x256xf32>
    %278 = vector.broadcast %275 : f32 to vector<1x256xf32>
    %279 = arith.mulf %278, %262 : vector<1x256xf32>
    %280 = arith.addf %277, %279 : vector<1x256xf32>
    %cst_75 = arith.constant 0.000000e+00 : f32
    %281 = vector.broadcast %cst_75 : f32 to vector<1x256xf32>
    %282 = arith.select %273, %280, %281 : vector<1x256xi1>, vector<1x256xf32>
    %283 = arith.addf %260, %282 : vector<1x256xf32>
    %c31_i32 = arith.constant 31 : i32
    %284 = tpu.dynamic_rotate %26 by %c31_i32 dim 1 : vector<1x256xf32>, i32 -> vector<1x256xf32>
    %c31_i32_76 = arith.constant 31 : i32
    %285 = tpu.dynamic_rotate %27 by %c31_i32_76 dim 1 : vector<1x256xf32>, i32 -> vector<1x256xf32>
    %c2_i32_77 = arith.constant 2 : i32
    %286 = vector.broadcast %c2_i32_77 : i32 to vector<1x256xi32>
    %287 = arith.cmpi sge, %28, %286 : vector<1x256xi32>
    %c18_i32_78 = arith.constant 18 : i32
    %288 = vector.broadcast %c18_i32_78 : i32 to vector<1x256xi32>
    %289 = arith.cmpi slt, %28, %288 : vector<1x256xi32>
    %290 = arith.andi %287, %289 : vector<1x256xi1>
    %c-1_i32_79 = arith.constant -1 : i32
    %291 = vector.broadcast %c-1_i32_79 : i32 to vector<1x256xi32>
    %292 = arith.cmpi sge, %29, %291 : vector<1x256xi32>
    %293 = arith.andi %290, %292 : vector<1x256xi1>
    %c15_i32_80 = arith.constant 15 : i32
    %294 = vector.broadcast %c15_i32_80 : i32 to vector<1x256xi32>
    %295 = arith.cmpi slt, %29, %294 : vector<1x256xi32>
    %296 = arith.andi %293, %295 : vector<1x256xi1>
    %c11 = arith.constant 11 : index
    %297 = memref.load %arg4[%c11] : memref<98xf32, #tpu.memory_space<smem>>
    %c60 = arith.constant 60 : index
    %298 = memref.load %arg4[%c60] : memref<98xf32, #tpu.memory_space<smem>>
    %299 = vector.broadcast %297 : f32 to vector<1x256xf32>
    %300 = arith.mulf %299, %284 : vector<1x256xf32>
    %301 = vector.broadcast %298 : f32 to vector<1x256xf32>
    %302 = arith.mulf %301, %285 : vector<1x256xf32>
    %303 = arith.addf %300, %302 : vector<1x256xf32>
    %cst_81 = arith.constant 0.000000e+00 : f32
    %304 = vector.broadcast %cst_81 : f32 to vector<1x256xf32>
    %305 = arith.select %296, %303, %304 : vector<1x256xi1>, vector<1x256xf32>
    %306 = arith.addf %283, %305 : vector<1x256xf32>
    %c30_i32 = arith.constant 30 : i32
    %307 = tpu.dynamic_rotate %26 by %c30_i32 dim 1 : vector<1x256xf32>, i32 -> vector<1x256xf32>
    %c30_i32_82 = arith.constant 30 : i32
    %308 = tpu.dynamic_rotate %27 by %c30_i32_82 dim 1 : vector<1x256xf32>, i32 -> vector<1x256xf32>
    %c2_i32_83 = arith.constant 2 : i32
    %309 = vector.broadcast %c2_i32_83 : i32 to vector<1x256xi32>
    %310 = arith.cmpi sge, %28, %309 : vector<1x256xi32>
    %c18_i32_84 = arith.constant 18 : i32
    %311 = vector.broadcast %c18_i32_84 : i32 to vector<1x256xi32>
    %312 = arith.cmpi slt, %28, %311 : vector<1x256xi32>
    %313 = arith.andi %310, %312 : vector<1x256xi1>
    %c-2_i32_85 = arith.constant -2 : i32
    %314 = vector.broadcast %c-2_i32_85 : i32 to vector<1x256xi32>
    %315 = arith.cmpi sge, %29, %314 : vector<1x256xi32>
    %316 = arith.andi %313, %315 : vector<1x256xi1>
    %c14_i32_86 = arith.constant 14 : i32
    %317 = vector.broadcast %c14_i32_86 : i32 to vector<1x256xi32>
    %318 = arith.cmpi slt, %29, %317 : vector<1x256xi32>
    %319 = arith.andi %316, %318 : vector<1x256xi1>
    %c12 = arith.constant 12 : index
    %320 = memref.load %arg4[%c12] : memref<98xf32, #tpu.memory_space<smem>>
    %c61 = arith.constant 61 : index
    %321 = memref.load %arg4[%c61] : memref<98xf32, #tpu.memory_space<smem>>
    %322 = vector.broadcast %320 : f32 to vector<1x256xf32>
    %323 = arith.mulf %322, %307 : vector<1x256xf32>
    %324 = vector.broadcast %321 : f32 to vector<1x256xf32>
    %325 = arith.mulf %324, %308 : vector<1x256xf32>
    %326 = arith.addf %323, %325 : vector<1x256xf32>
    %cst_87 = arith.constant 0.000000e+00 : f32
    %327 = vector.broadcast %cst_87 : f32 to vector<1x256xf32>
    %328 = arith.select %319, %326, %327 : vector<1x256xi1>, vector<1x256xf32>
    %329 = arith.addf %306, %328 : vector<1x256xf32>
    %c29_i32 = arith.constant 29 : i32
    %330 = tpu.dynamic_rotate %26 by %c29_i32 dim 1 : vector<1x256xf32>, i32 -> vector<1x256xf32>
    %c29_i32_88 = arith.constant 29 : i32
    %331 = tpu.dynamic_rotate %27 by %c29_i32_88 dim 1 : vector<1x256xf32>, i32 -> vector<1x256xf32>
    %c2_i32_89 = arith.constant 2 : i32
    %332 = vector.broadcast %c2_i32_89 : i32 to vector<1x256xi32>
    %333 = arith.cmpi sge, %28, %332 : vector<1x256xi32>
    %c18_i32_90 = arith.constant 18 : i32
    %334 = vector.broadcast %c18_i32_90 : i32 to vector<1x256xi32>
    %335 = arith.cmpi slt, %28, %334 : vector<1x256xi32>
    %336 = arith.andi %333, %335 : vector<1x256xi1>
    %c-3_i32_91 = arith.constant -3 : i32
    %337 = vector.broadcast %c-3_i32_91 : i32 to vector<1x256xi32>
    %338 = arith.cmpi sge, %29, %337 : vector<1x256xi32>
    %339 = arith.andi %336, %338 : vector<1x256xi1>
    %c13_i32_92 = arith.constant 13 : i32
    %340 = vector.broadcast %c13_i32_92 : i32 to vector<1x256xi32>
    %341 = arith.cmpi slt, %29, %340 : vector<1x256xi32>
    %342 = arith.andi %339, %341 : vector<1x256xi1>
    %c13 = arith.constant 13 : index
    %343 = memref.load %arg4[%c13] : memref<98xf32, #tpu.memory_space<smem>>
    %c62 = arith.constant 62 : index
    %344 = memref.load %arg4[%c62] : memref<98xf32, #tpu.memory_space<smem>>
    %345 = vector.broadcast %343 : f32 to vector<1x256xf32>
    %346 = arith.mulf %345, %330 : vector<1x256xf32>
    %347 = vector.broadcast %344 : f32 to vector<1x256xf32>
    %348 = arith.mulf %347, %331 : vector<1x256xf32>
    %349 = arith.addf %346, %348 : vector<1x256xf32>
    %cst_93 = arith.constant 0.000000e+00 : f32
    %350 = vector.broadcast %cst_93 : f32 to vector<1x256xf32>
    %351 = arith.select %342, %349, %350 : vector<1x256xi1>, vector<1x256xf32>
    %352 = arith.addf %329, %351 : vector<1x256xf32>
    %c19_i32_94 = arith.constant 19 : i32
    %353 = tpu.dynamic_rotate %26 by %c19_i32_94 dim 1 : vector<1x256xf32>, i32 -> vector<1x256xf32>
    %c19_i32_95 = arith.constant 19 : i32
    %354 = tpu.dynamic_rotate %27 by %c19_i32_95 dim 1 : vector<1x256xf32>, i32 -> vector<1x256xf32>
    %c1_i32_96 = arith.constant 1 : i32
    %355 = vector.broadcast %c1_i32_96 : i32 to vector<1x256xi32>
    %356 = arith.cmpi sge, %28, %355 : vector<1x256xi32>
    %c17_i32_97 = arith.constant 17 : i32
    %357 = vector.broadcast %c17_i32_97 : i32 to vector<1x256xi32>
    %358 = arith.cmpi slt, %28, %357 : vector<1x256xi32>
    %359 = arith.andi %356, %358 : vector<1x256xi1>
    %c3_i32_98 = arith.constant 3 : i32
    %360 = vector.broadcast %c3_i32_98 : i32 to vector<1x256xi32>
    %361 = arith.cmpi sge, %29, %360 : vector<1x256xi32>
    %362 = arith.andi %359, %361 : vector<1x256xi1>
    %c19_i32_99 = arith.constant 19 : i32
    %363 = vector.broadcast %c19_i32_99 : i32 to vector<1x256xi32>
    %364 = arith.cmpi slt, %29, %363 : vector<1x256xi32>
    %365 = arith.andi %362, %364 : vector<1x256xi1>
    %c14 = arith.constant 14 : index
    %366 = memref.load %arg4[%c14] : memref<98xf32, #tpu.memory_space<smem>>
    %c63 = arith.constant 63 : index
    %367 = memref.load %arg4[%c63] : memref<98xf32, #tpu.memory_space<smem>>
    %368 = vector.broadcast %366 : f32 to vector<1x256xf32>
    %369 = arith.mulf %368, %353 : vector<1x256xf32>
    %370 = vector.broadcast %367 : f32 to vector<1x256xf32>
    %371 = arith.mulf %370, %354 : vector<1x256xf32>
    %372 = arith.addf %369, %371 : vector<1x256xf32>
    %cst_100 = arith.constant 0.000000e+00 : f32
    %373 = vector.broadcast %cst_100 : f32 to vector<1x256xf32>
    %374 = arith.select %365, %372, %373 : vector<1x256xi1>, vector<1x256xf32>
    %375 = arith.addf %352, %374 : vector<1x256xf32>
    %c18_i32_101 = arith.constant 18 : i32
    %376 = tpu.dynamic_rotate %26 by %c18_i32_101 dim 1 : vector<1x256xf32>, i32 -> vector<1x256xf32>
    %c18_i32_102 = arith.constant 18 : i32
    %377 = tpu.dynamic_rotate %27 by %c18_i32_102 dim 1 : vector<1x256xf32>, i32 -> vector<1x256xf32>
    %c1_i32_103 = arith.constant 1 : i32
    %378 = vector.broadcast %c1_i32_103 : i32 to vector<1x256xi32>
    %379 = arith.cmpi sge, %28, %378 : vector<1x256xi32>
    %c17_i32_104 = arith.constant 17 : i32
    %380 = vector.broadcast %c17_i32_104 : i32 to vector<1x256xi32>
    %381 = arith.cmpi slt, %28, %380 : vector<1x256xi32>
    %382 = arith.andi %379, %381 : vector<1x256xi1>
    %c2_i32_105 = arith.constant 2 : i32
    %383 = vector.broadcast %c2_i32_105 : i32 to vector<1x256xi32>
    %384 = arith.cmpi sge, %29, %383 : vector<1x256xi32>
    %385 = arith.andi %382, %384 : vector<1x256xi1>
    %c18_i32_106 = arith.constant 18 : i32
    %386 = vector.broadcast %c18_i32_106 : i32 to vector<1x256xi32>
    %387 = arith.cmpi slt, %29, %386 : vector<1x256xi32>
    %388 = arith.andi %385, %387 : vector<1x256xi1>
    %c15 = arith.constant 15 : index
    %389 = memref.load %arg4[%c15] : memref<98xf32, #tpu.memory_space<smem>>
    %c64 = arith.constant 64 : index
    %390 = memref.load %arg4[%c64] : memref<98xf32, #tpu.memory_space<smem>>
    %391 = vector.broadcast %389 : f32 to vector<1x256xf32>
    %392 = arith.mulf %391, %376 : vector<1x256xf32>
    %393 = vector.broadcast %390 : f32 to vector<1x256xf32>
    %394 = arith.mulf %393, %377 : vector<1x256xf32>
    %395 = arith.addf %392, %394 : vector<1x256xf32>
    %cst_107 = arith.constant 0.000000e+00 : f32
    %396 = vector.broadcast %cst_107 : f32 to vector<1x256xf32>
    %397 = arith.select %388, %395, %396 : vector<1x256xi1>, vector<1x256xf32>
    %398 = arith.addf %375, %397 : vector<1x256xf32>
    %c17_i32_108 = arith.constant 17 : i32
    %399 = tpu.dynamic_rotate %26 by %c17_i32_108 dim 1 : vector<1x256xf32>, i32 -> vector<1x256xf32>
    %c17_i32_109 = arith.constant 17 : i32
    %400 = tpu.dynamic_rotate %27 by %c17_i32_109 dim 1 : vector<1x256xf32>, i32 -> vector<1x256xf32>
    %c1_i32_110 = arith.constant 1 : i32
    %401 = vector.broadcast %c1_i32_110 : i32 to vector<1x256xi32>
    %402 = arith.cmpi sge, %28, %401 : vector<1x256xi32>
    %c17_i32_111 = arith.constant 17 : i32
    %403 = vector.broadcast %c17_i32_111 : i32 to vector<1x256xi32>
    %404 = arith.cmpi slt, %28, %403 : vector<1x256xi32>
    %405 = arith.andi %402, %404 : vector<1x256xi1>
    %c1_i32_112 = arith.constant 1 : i32
    %406 = vector.broadcast %c1_i32_112 : i32 to vector<1x256xi32>
    %407 = arith.cmpi sge, %29, %406 : vector<1x256xi32>
    %408 = arith.andi %405, %407 : vector<1x256xi1>
    %c17_i32_113 = arith.constant 17 : i32
    %409 = vector.broadcast %c17_i32_113 : i32 to vector<1x256xi32>
    %410 = arith.cmpi slt, %29, %409 : vector<1x256xi32>
    %411 = arith.andi %408, %410 : vector<1x256xi1>
    %c16 = arith.constant 16 : index
    %412 = memref.load %arg4[%c16] : memref<98xf32, #tpu.memory_space<smem>>
    %c65 = arith.constant 65 : index
    %413 = memref.load %arg4[%c65] : memref<98xf32, #tpu.memory_space<smem>>
    %414 = vector.broadcast %412 : f32 to vector<1x256xf32>
    %415 = arith.mulf %414, %399 : vector<1x256xf32>
    %416 = vector.broadcast %413 : f32 to vector<1x256xf32>
    %417 = arith.mulf %416, %400 : vector<1x256xf32>
    %418 = arith.addf %415, %417 : vector<1x256xf32>
    %cst_114 = arith.constant 0.000000e+00 : f32
    %419 = vector.broadcast %cst_114 : f32 to vector<1x256xf32>
    %420 = arith.select %411, %418, %419 : vector<1x256xi1>, vector<1x256xf32>
    %421 = arith.addf %398, %420 : vector<1x256xf32>
    %c16_i32_115 = arith.constant 16 : i32
    %422 = tpu.dynamic_rotate %26 by %c16_i32_115 dim 1 : vector<1x256xf32>, i32 -> vector<1x256xf32>
    %c16_i32_116 = arith.constant 16 : i32
    %423 = tpu.dynamic_rotate %27 by %c16_i32_116 dim 1 : vector<1x256xf32>, i32 -> vector<1x256xf32>
    %c1_i32_117 = arith.constant 1 : i32
    %424 = vector.broadcast %c1_i32_117 : i32 to vector<1x256xi32>
    %425 = arith.cmpi sge, %28, %424 : vector<1x256xi32>
    %c17_i32_118 = arith.constant 17 : i32
    %426 = vector.broadcast %c17_i32_118 : i32 to vector<1x256xi32>
    %427 = arith.cmpi slt, %28, %426 : vector<1x256xi32>
    %428 = arith.andi %425, %427 : vector<1x256xi1>
    %c0_i32_119 = arith.constant 0 : i32
    %429 = vector.broadcast %c0_i32_119 : i32 to vector<1x256xi32>
    %430 = arith.cmpi sge, %29, %429 : vector<1x256xi32>
    %431 = arith.andi %428, %430 : vector<1x256xi1>
    %c16_i32_120 = arith.constant 16 : i32
    %432 = vector.broadcast %c16_i32_120 : i32 to vector<1x256xi32>
    %433 = arith.cmpi slt, %29, %432 : vector<1x256xi32>
    %434 = arith.andi %431, %433 : vector<1x256xi1>
    %c17 = arith.constant 17 : index
    %435 = memref.load %arg4[%c17] : memref<98xf32, #tpu.memory_space<smem>>
    %c66 = arith.constant 66 : index
    %436 = memref.load %arg4[%c66] : memref<98xf32, #tpu.memory_space<smem>>
    %437 = vector.broadcast %435 : f32 to vector<1x256xf32>
    %438 = arith.mulf %437, %422 : vector<1x256xf32>
    %439 = vector.broadcast %436 : f32 to vector<1x256xf32>
    %440 = arith.mulf %439, %423 : vector<1x256xf32>
    %441 = arith.addf %438, %440 : vector<1x256xf32>
    %cst_121 = arith.constant 0.000000e+00 : f32
    %442 = vector.broadcast %cst_121 : f32 to vector<1x256xf32>
    %443 = arith.select %434, %441, %442 : vector<1x256xi1>, vector<1x256xf32>
    %444 = arith.addf %421, %443 : vector<1x256xf32>
    %c15_i32_122 = arith.constant 15 : i32
    %445 = tpu.dynamic_rotate %26 by %c15_i32_122 dim 1 : vector<1x256xf32>, i32 -> vector<1x256xf32>
    %c15_i32_123 = arith.constant 15 : i32
    %446 = tpu.dynamic_rotate %27 by %c15_i32_123 dim 1 : vector<1x256xf32>, i32 -> vector<1x256xf32>
    %c1_i32_124 = arith.constant 1 : i32
    %447 = vector.broadcast %c1_i32_124 : i32 to vector<1x256xi32>
    %448 = arith.cmpi sge, %28, %447 : vector<1x256xi32>
    %c17_i32_125 = arith.constant 17 : i32
    %449 = vector.broadcast %c17_i32_125 : i32 to vector<1x256xi32>
    %450 = arith.cmpi slt, %28, %449 : vector<1x256xi32>
    %451 = arith.andi %448, %450 : vector<1x256xi1>
    %c-1_i32_126 = arith.constant -1 : i32
    %452 = vector.broadcast %c-1_i32_126 : i32 to vector<1x256xi32>
    %453 = arith.cmpi sge, %29, %452 : vector<1x256xi32>
    %454 = arith.andi %451, %453 : vector<1x256xi1>
    %c15_i32_127 = arith.constant 15 : i32
    %455 = vector.broadcast %c15_i32_127 : i32 to vector<1x256xi32>
    %456 = arith.cmpi slt, %29, %455 : vector<1x256xi32>
    %457 = arith.andi %454, %456 : vector<1x256xi1>
    %c18 = arith.constant 18 : index
    %458 = memref.load %arg4[%c18] : memref<98xf32, #tpu.memory_space<smem>>
    %c67 = arith.constant 67 : index
    %459 = memref.load %arg4[%c67] : memref<98xf32, #tpu.memory_space<smem>>
    %460 = vector.broadcast %458 : f32 to vector<1x256xf32>
    %461 = arith.mulf %460, %445 : vector<1x256xf32>
    %462 = vector.broadcast %459 : f32 to vector<1x256xf32>
    %463 = arith.mulf %462, %446 : vector<1x256xf32>
    %464 = arith.addf %461, %463 : vector<1x256xf32>
    %cst_128 = arith.constant 0.000000e+00 : f32
    %465 = vector.broadcast %cst_128 : f32 to vector<1x256xf32>
    %466 = arith.select %457, %464, %465 : vector<1x256xi1>, vector<1x256xf32>
    %467 = arith.addf %444, %466 : vector<1x256xf32>
    %c14_i32_129 = arith.constant 14 : i32
    %468 = tpu.dynamic_rotate %26 by %c14_i32_129 dim 1 : vector<1x256xf32>, i32 -> vector<1x256xf32>
    %c14_i32_130 = arith.constant 14 : i32
    %469 = tpu.dynamic_rotate %27 by %c14_i32_130 dim 1 : vector<1x256xf32>, i32 -> vector<1x256xf32>
    %c1_i32_131 = arith.constant 1 : i32
    %470 = vector.broadcast %c1_i32_131 : i32 to vector<1x256xi32>
    %471 = arith.cmpi sge, %28, %470 : vector<1x256xi32>
    %c17_i32_132 = arith.constant 17 : i32
    %472 = vector.broadcast %c17_i32_132 : i32 to vector<1x256xi32>
    %473 = arith.cmpi slt, %28, %472 : vector<1x256xi32>
    %474 = arith.andi %471, %473 : vector<1x256xi1>
    %c-2_i32_133 = arith.constant -2 : i32
    %475 = vector.broadcast %c-2_i32_133 : i32 to vector<1x256xi32>
    %476 = arith.cmpi sge, %29, %475 : vector<1x256xi32>
    %477 = arith.andi %474, %476 : vector<1x256xi1>
    %c14_i32_134 = arith.constant 14 : i32
    %478 = vector.broadcast %c14_i32_134 : i32 to vector<1x256xi32>
    %479 = arith.cmpi slt, %29, %478 : vector<1x256xi32>
    %480 = arith.andi %477, %479 : vector<1x256xi1>
    %c19 = arith.constant 19 : index
    %481 = memref.load %arg4[%c19] : memref<98xf32, #tpu.memory_space<smem>>
    %c68 = arith.constant 68 : index
    %482 = memref.load %arg4[%c68] : memref<98xf32, #tpu.memory_space<smem>>
    %483 = vector.broadcast %481 : f32 to vector<1x256xf32>
    %484 = arith.mulf %483, %468 : vector<1x256xf32>
    %485 = vector.broadcast %482 : f32 to vector<1x256xf32>
    %486 = arith.mulf %485, %469 : vector<1x256xf32>
    %487 = arith.addf %484, %486 : vector<1x256xf32>
    %cst_135 = arith.constant 0.000000e+00 : f32
    %488 = vector.broadcast %cst_135 : f32 to vector<1x256xf32>
    %489 = arith.select %480, %487, %488 : vector<1x256xi1>, vector<1x256xf32>
    %490 = arith.addf %467, %489 : vector<1x256xf32>
    %c13_i32_136 = arith.constant 13 : i32
    %491 = tpu.dynamic_rotate %26 by %c13_i32_136 dim 1 : vector<1x256xf32>, i32 -> vector<1x256xf32>
    %c13_i32_137 = arith.constant 13 : i32
    %492 = tpu.dynamic_rotate %27 by %c13_i32_137 dim 1 : vector<1x256xf32>, i32 -> vector<1x256xf32>
    %c1_i32_138 = arith.constant 1 : i32
    %493 = vector.broadcast %c1_i32_138 : i32 to vector<1x256xi32>
    %494 = arith.cmpi sge, %28, %493 : vector<1x256xi32>
    %c17_i32_139 = arith.constant 17 : i32
    %495 = vector.broadcast %c17_i32_139 : i32 to vector<1x256xi32>
    %496 = arith.cmpi slt, %28, %495 : vector<1x256xi32>
    %497 = arith.andi %494, %496 : vector<1x256xi1>
    %c-3_i32_140 = arith.constant -3 : i32
    %498 = vector.broadcast %c-3_i32_140 : i32 to vector<1x256xi32>
    %499 = arith.cmpi sge, %29, %498 : vector<1x256xi32>
    %500 = arith.andi %497, %499 : vector<1x256xi1>
    %c13_i32_141 = arith.constant 13 : i32
    %501 = vector.broadcast %c13_i32_141 : i32 to vector<1x256xi32>
    %502 = arith.cmpi slt, %29, %501 : vector<1x256xi32>
    %503 = arith.andi %500, %502 : vector<1x256xi1>
    %c20 = arith.constant 20 : index
    %504 = memref.load %arg4[%c20] : memref<98xf32, #tpu.memory_space<smem>>
    %c69 = arith.constant 69 : index
    %505 = memref.load %arg4[%c69] : memref<98xf32, #tpu.memory_space<smem>>
    %506 = vector.broadcast %504 : f32 to vector<1x256xf32>
    %507 = arith.mulf %506, %491 : vector<1x256xf32>
    %508 = vector.broadcast %505 : f32 to vector<1x256xf32>
    %509 = arith.mulf %508, %492 : vector<1x256xf32>
    %510 = arith.addf %507, %509 : vector<1x256xf32>
    %cst_142 = arith.constant 0.000000e+00 : f32
    %511 = vector.broadcast %cst_142 : f32 to vector<1x256xf32>
    %512 = arith.select %503, %510, %511 : vector<1x256xi1>, vector<1x256xf32>
    %513 = arith.addf %490, %512 : vector<1x256xf32>
    %c3_i32_143 = arith.constant 3 : i32
    %514 = tpu.dynamic_rotate %26 by %c3_i32_143 dim 1 : vector<1x256xf32>, i32 -> vector<1x256xf32>
    %c3_i32_144 = arith.constant 3 : i32
    %515 = tpu.dynamic_rotate %27 by %c3_i32_144 dim 1 : vector<1x256xf32>, i32 -> vector<1x256xf32>
    %c0_i32_145 = arith.constant 0 : i32
    %516 = vector.broadcast %c0_i32_145 : i32 to vector<1x256xi32>
    %517 = arith.cmpi sge, %28, %516 : vector<1x256xi32>
    %c16_i32_146 = arith.constant 16 : i32
    %518 = vector.broadcast %c16_i32_146 : i32 to vector<1x256xi32>
    %519 = arith.cmpi slt, %28, %518 : vector<1x256xi32>
    %520 = arith.andi %517, %519 : vector<1x256xi1>
    %c3_i32_147 = arith.constant 3 : i32
    %521 = vector.broadcast %c3_i32_147 : i32 to vector<1x256xi32>
    %522 = arith.cmpi sge, %29, %521 : vector<1x256xi32>
    %523 = arith.andi %520, %522 : vector<1x256xi1>
    %c19_i32_148 = arith.constant 19 : i32
    %524 = vector.broadcast %c19_i32_148 : i32 to vector<1x256xi32>
    %525 = arith.cmpi slt, %29, %524 : vector<1x256xi32>
    %526 = arith.andi %523, %525 : vector<1x256xi1>
    %c21 = arith.constant 21 : index
    %527 = memref.load %arg4[%c21] : memref<98xf32, #tpu.memory_space<smem>>
    %c70 = arith.constant 70 : index
    %528 = memref.load %arg4[%c70] : memref<98xf32, #tpu.memory_space<smem>>
    %529 = vector.broadcast %527 : f32 to vector<1x256xf32>
    %530 = arith.mulf %529, %514 : vector<1x256xf32>
    %531 = vector.broadcast %528 : f32 to vector<1x256xf32>
    %532 = arith.mulf %531, %515 : vector<1x256xf32>
    %533 = arith.addf %530, %532 : vector<1x256xf32>
    %cst_149 = arith.constant 0.000000e+00 : f32
    %534 = vector.broadcast %cst_149 : f32 to vector<1x256xf32>
    %535 = arith.select %526, %533, %534 : vector<1x256xi1>, vector<1x256xf32>
    %536 = arith.addf %513, %535 : vector<1x256xf32>
    %c2_i32_150 = arith.constant 2 : i32
    %537 = tpu.dynamic_rotate %26 by %c2_i32_150 dim 1 : vector<1x256xf32>, i32 -> vector<1x256xf32>
    %c2_i32_151 = arith.constant 2 : i32
    %538 = tpu.dynamic_rotate %27 by %c2_i32_151 dim 1 : vector<1x256xf32>, i32 -> vector<1x256xf32>
    %c0_i32_152 = arith.constant 0 : i32
    %539 = vector.broadcast %c0_i32_152 : i32 to vector<1x256xi32>
    %540 = arith.cmpi sge, %28, %539 : vector<1x256xi32>
    %c16_i32_153 = arith.constant 16 : i32
    %541 = vector.broadcast %c16_i32_153 : i32 to vector<1x256xi32>
    %542 = arith.cmpi slt, %28, %541 : vector<1x256xi32>
    %543 = arith.andi %540, %542 : vector<1x256xi1>
    %c2_i32_154 = arith.constant 2 : i32
    %544 = vector.broadcast %c2_i32_154 : i32 to vector<1x256xi32>
    %545 = arith.cmpi sge, %29, %544 : vector<1x256xi32>
    %546 = arith.andi %543, %545 : vector<1x256xi1>
    %c18_i32_155 = arith.constant 18 : i32
    %547 = vector.broadcast %c18_i32_155 : i32 to vector<1x256xi32>
    %548 = arith.cmpi slt, %29, %547 : vector<1x256xi32>
    %549 = arith.andi %546, %548 : vector<1x256xi1>
    %c22 = arith.constant 22 : index
    %550 = memref.load %arg4[%c22] : memref<98xf32, #tpu.memory_space<smem>>
    %c71 = arith.constant 71 : index
    %551 = memref.load %arg4[%c71] : memref<98xf32, #tpu.memory_space<smem>>
    %552 = vector.broadcast %550 : f32 to vector<1x256xf32>
    %553 = arith.mulf %552, %537 : vector<1x256xf32>
    %554 = vector.broadcast %551 : f32 to vector<1x256xf32>
    %555 = arith.mulf %554, %538 : vector<1x256xf32>
    %556 = arith.addf %553, %555 : vector<1x256xf32>
    %cst_156 = arith.constant 0.000000e+00 : f32
    %557 = vector.broadcast %cst_156 : f32 to vector<1x256xf32>
    %558 = arith.select %549, %556, %557 : vector<1x256xi1>, vector<1x256xf32>
    %559 = arith.addf %536, %558 : vector<1x256xf32>
    %c1_i32_157 = arith.constant 1 : i32
    %560 = tpu.dynamic_rotate %26 by %c1_i32_157 dim 1 : vector<1x256xf32>, i32 -> vector<1x256xf32>
    %c1_i32_158 = arith.constant 1 : i32
    %561 = tpu.dynamic_rotate %27 by %c1_i32_158 dim 1 : vector<1x256xf32>, i32 -> vector<1x256xf32>
    %c0_i32_159 = arith.constant 0 : i32
    %562 = vector.broadcast %c0_i32_159 : i32 to vector<1x256xi32>
    %563 = arith.cmpi sge, %28, %562 : vector<1x256xi32>
    %c16_i32_160 = arith.constant 16 : i32
    %564 = vector.broadcast %c16_i32_160 : i32 to vector<1x256xi32>
    %565 = arith.cmpi slt, %28, %564 : vector<1x256xi32>
    %566 = arith.andi %563, %565 : vector<1x256xi1>
    %c1_i32_161 = arith.constant 1 : i32
    %567 = vector.broadcast %c1_i32_161 : i32 to vector<1x256xi32>
    %568 = arith.cmpi sge, %29, %567 : vector<1x256xi32>
    %569 = arith.andi %566, %568 : vector<1x256xi1>
    %c17_i32_162 = arith.constant 17 : i32
    %570 = vector.broadcast %c17_i32_162 : i32 to vector<1x256xi32>
    %571 = arith.cmpi slt, %29, %570 : vector<1x256xi32>
    %572 = arith.andi %569, %571 : vector<1x256xi1>
    %c23 = arith.constant 23 : index
    %573 = memref.load %arg4[%c23] : memref<98xf32, #tpu.memory_space<smem>>
    %c72 = arith.constant 72 : index
    %574 = memref.load %arg4[%c72] : memref<98xf32, #tpu.memory_space<smem>>
    %575 = vector.broadcast %573 : f32 to vector<1x256xf32>
    %576 = arith.mulf %575, %560 : vector<1x256xf32>
    %577 = vector.broadcast %574 : f32 to vector<1x256xf32>
    %578 = arith.mulf %577, %561 : vector<1x256xf32>
    %579 = arith.addf %576, %578 : vector<1x256xf32>
    %cst_163 = arith.constant 0.000000e+00 : f32
    %580 = vector.broadcast %cst_163 : f32 to vector<1x256xf32>
    %581 = arith.select %572, %579, %580 : vector<1x256xi1>, vector<1x256xf32>
    %582 = arith.addf %559, %581 : vector<1x256xf32>
    %c0_i32_164 = arith.constant 0 : i32
    %583 = vector.broadcast %c0_i32_164 : i32 to vector<1x256xi32>
    %584 = arith.cmpi sge, %28, %583 : vector<1x256xi32>
    %c16_i32_165 = arith.constant 16 : i32
    %585 = vector.broadcast %c16_i32_165 : i32 to vector<1x256xi32>
    %586 = arith.cmpi slt, %28, %585 : vector<1x256xi32>
    %587 = arith.andi %584, %586 : vector<1x256xi1>
    %c0_i32_166 = arith.constant 0 : i32
    %588 = vector.broadcast %c0_i32_166 : i32 to vector<1x256xi32>
    %589 = arith.cmpi sge, %29, %588 : vector<1x256xi32>
    %590 = arith.andi %587, %589 : vector<1x256xi1>
    %c16_i32_167 = arith.constant 16 : i32
    %591 = vector.broadcast %c16_i32_167 : i32 to vector<1x256xi32>
    %592 = arith.cmpi slt, %29, %591 : vector<1x256xi32>
    %593 = arith.andi %590, %592 : vector<1x256xi1>
    %c24 = arith.constant 24 : index
    %594 = memref.load %arg4[%c24] : memref<98xf32, #tpu.memory_space<smem>>
    %c73 = arith.constant 73 : index
    %595 = memref.load %arg4[%c73] : memref<98xf32, #tpu.memory_space<smem>>
    %596 = vector.broadcast %594 : f32 to vector<1x256xf32>
    %597 = arith.mulf %596, %26 : vector<1x256xf32>
    %598 = vector.broadcast %595 : f32 to vector<1x256xf32>
    %599 = arith.mulf %598, %27 : vector<1x256xf32>
    %600 = arith.addf %597, %599 : vector<1x256xf32>
    %cst_168 = arith.constant 0.000000e+00 : f32
    %601 = vector.broadcast %cst_168 : f32 to vector<1x256xf32>
    %602 = arith.select %593, %600, %601 : vector<1x256xi1>, vector<1x256xf32>
    %603 = arith.addf %582, %602 : vector<1x256xf32>
    %c255_i32 = arith.constant 255 : i32
    %604 = tpu.dynamic_rotate %26 by %c255_i32 dim 1 : vector<1x256xf32>, i32 -> vector<1x256xf32>
    %c255_i32_169 = arith.constant 255 : i32
    %605 = tpu.dynamic_rotate %27 by %c255_i32_169 dim 1 : vector<1x256xf32>, i32 -> vector<1x256xf32>
    %c0_i32_170 = arith.constant 0 : i32
    %606 = vector.broadcast %c0_i32_170 : i32 to vector<1x256xi32>
    %607 = arith.cmpi sge, %28, %606 : vector<1x256xi32>
    %c16_i32_171 = arith.constant 16 : i32
    %608 = vector.broadcast %c16_i32_171 : i32 to vector<1x256xi32>
    %609 = arith.cmpi slt, %28, %608 : vector<1x256xi32>
    %610 = arith.andi %607, %609 : vector<1x256xi1>
    %c-1_i32_172 = arith.constant -1 : i32
    %611 = vector.broadcast %c-1_i32_172 : i32 to vector<1x256xi32>
    %612 = arith.cmpi sge, %29, %611 : vector<1x256xi32>
    %613 = arith.andi %610, %612 : vector<1x256xi1>
    %c15_i32_173 = arith.constant 15 : i32
    %614 = vector.broadcast %c15_i32_173 : i32 to vector<1x256xi32>
    %615 = arith.cmpi slt, %29, %614 : vector<1x256xi32>
    %616 = arith.andi %613, %615 : vector<1x256xi1>
    %c25 = arith.constant 25 : index
    %617 = memref.load %arg4[%c25] : memref<98xf32, #tpu.memory_space<smem>>
    %c74 = arith.constant 74 : index
    %618 = memref.load %arg4[%c74] : memref<98xf32, #tpu.memory_space<smem>>
    %619 = vector.broadcast %617 : f32 to vector<1x256xf32>
    %620 = arith.mulf %619, %604 : vector<1x256xf32>
    %621 = vector.broadcast %618 : f32 to vector<1x256xf32>
    %622 = arith.mulf %621, %605 : vector<1x256xf32>
    %623 = arith.addf %620, %622 : vector<1x256xf32>
    %cst_174 = arith.constant 0.000000e+00 : f32
    %624 = vector.broadcast %cst_174 : f32 to vector<1x256xf32>
    %625 = arith.select %616, %623, %624 : vector<1x256xi1>, vector<1x256xf32>
    %626 = arith.addf %603, %625 : vector<1x256xf32>
    %c254_i32 = arith.constant 254 : i32
    %627 = tpu.dynamic_rotate %26 by %c254_i32 dim 1 : vector<1x256xf32>, i32 -> vector<1x256xf32>
    %c254_i32_175 = arith.constant 254 : i32
    %628 = tpu.dynamic_rotate %27 by %c254_i32_175 dim 1 : vector<1x256xf32>, i32 -> vector<1x256xf32>
    %c0_i32_176 = arith.constant 0 : i32
    %629 = vector.broadcast %c0_i32_176 : i32 to vector<1x256xi32>
    %630 = arith.cmpi sge, %28, %629 : vector<1x256xi32>
    %c16_i32_177 = arith.constant 16 : i32
    %631 = vector.broadcast %c16_i32_177 : i32 to vector<1x256xi32>
    %632 = arith.cmpi slt, %28, %631 : vector<1x256xi32>
    %633 = arith.andi %630, %632 : vector<1x256xi1>
    %c-2_i32_178 = arith.constant -2 : i32
    %634 = vector.broadcast %c-2_i32_178 : i32 to vector<1x256xi32>
    %635 = arith.cmpi sge, %29, %634 : vector<1x256xi32>
    %636 = arith.andi %633, %635 : vector<1x256xi1>
    %c14_i32_179 = arith.constant 14 : i32
    %637 = vector.broadcast %c14_i32_179 : i32 to vector<1x256xi32>
    %638 = arith.cmpi slt, %29, %637 : vector<1x256xi32>
    %639 = arith.andi %636, %638 : vector<1x256xi1>
    %c26 = arith.constant 26 : index
    %640 = memref.load %arg4[%c26] : memref<98xf32, #tpu.memory_space<smem>>
    %c75 = arith.constant 75 : index
    %641 = memref.load %arg4[%c75] : memref<98xf32, #tpu.memory_space<smem>>
    %642 = vector.broadcast %640 : f32 to vector<1x256xf32>
    %643 = arith.mulf %642, %627 : vector<1x256xf32>
    %644 = vector.broadcast %641 : f32 to vector<1x256xf32>
    %645 = arith.mulf %644, %628 : vector<1x256xf32>
    %646 = arith.addf %643, %645 : vector<1x256xf32>
    %cst_180 = arith.constant 0.000000e+00 : f32
    %647 = vector.broadcast %cst_180 : f32 to vector<1x256xf32>
    %648 = arith.select %639, %646, %647 : vector<1x256xi1>, vector<1x256xf32>
    %649 = arith.addf %626, %648 : vector<1x256xf32>
    %c253_i32 = arith.constant 253 : i32
    %650 = tpu.dynamic_rotate %26 by %c253_i32 dim 1 : vector<1x256xf32>, i32 -> vector<1x256xf32>
    %c253_i32_181 = arith.constant 253 : i32
    %651 = tpu.dynamic_rotate %27 by %c253_i32_181 dim 1 : vector<1x256xf32>, i32 -> vector<1x256xf32>
    %c0_i32_182 = arith.constant 0 : i32
    %652 = vector.broadcast %c0_i32_182 : i32 to vector<1x256xi32>
    %653 = arith.cmpi sge, %28, %652 : vector<1x256xi32>
    %c16_i32_183 = arith.constant 16 : i32
    %654 = vector.broadcast %c16_i32_183 : i32 to vector<1x256xi32>
    %655 = arith.cmpi slt, %28, %654 : vector<1x256xi32>
    %656 = arith.andi %653, %655 : vector<1x256xi1>
    %c-3_i32_184 = arith.constant -3 : i32
    %657 = vector.broadcast %c-3_i32_184 : i32 to vector<1x256xi32>
    %658 = arith.cmpi sge, %29, %657 : vector<1x256xi32>
    %659 = arith.andi %656, %658 : vector<1x256xi1>
    %c13_i32_185 = arith.constant 13 : i32
    %660 = vector.broadcast %c13_i32_185 : i32 to vector<1x256xi32>
    %661 = arith.cmpi slt, %29, %660 : vector<1x256xi32>
    %662 = arith.andi %659, %661 : vector<1x256xi1>
    %c27 = arith.constant 27 : index
    %663 = memref.load %arg4[%c27] : memref<98xf32, #tpu.memory_space<smem>>
    %c76 = arith.constant 76 : index
    %664 = memref.load %arg4[%c76] : memref<98xf32, #tpu.memory_space<smem>>
    %665 = vector.broadcast %663 : f32 to vector<1x256xf32>
    %666 = arith.mulf %665, %650 : vector<1x256xf32>
    %667 = vector.broadcast %664 : f32 to vector<1x256xf32>
    %668 = arith.mulf %667, %651 : vector<1x256xf32>
    %669 = arith.addf %666, %668 : vector<1x256xf32>
    %cst_186 = arith.constant 0.000000e+00 : f32
    %670 = vector.broadcast %cst_186 : f32 to vector<1x256xf32>
    %671 = arith.select %662, %669, %670 : vector<1x256xi1>, vector<1x256xf32>
    %672 = arith.addf %649, %671 : vector<1x256xf32>
    %c243_i32 = arith.constant 243 : i32
    %673 = tpu.dynamic_rotate %26 by %c243_i32 dim 1 : vector<1x256xf32>, i32 -> vector<1x256xf32>
    %c243_i32_187 = arith.constant 243 : i32
    %674 = tpu.dynamic_rotate %27 by %c243_i32_187 dim 1 : vector<1x256xf32>, i32 -> vector<1x256xf32>
    %c-1_i32_188 = arith.constant -1 : i32
    %675 = vector.broadcast %c-1_i32_188 : i32 to vector<1x256xi32>
    %676 = arith.cmpi sge, %28, %675 : vector<1x256xi32>
    %c15_i32_189 = arith.constant 15 : i32
    %677 = vector.broadcast %c15_i32_189 : i32 to vector<1x256xi32>
    %678 = arith.cmpi slt, %28, %677 : vector<1x256xi32>
    %679 = arith.andi %676, %678 : vector<1x256xi1>
    %c3_i32_190 = arith.constant 3 : i32
    %680 = vector.broadcast %c3_i32_190 : i32 to vector<1x256xi32>
    %681 = arith.cmpi sge, %29, %680 : vector<1x256xi32>
    %682 = arith.andi %679, %681 : vector<1x256xi1>
    %c19_i32_191 = arith.constant 19 : i32
    %683 = vector.broadcast %c19_i32_191 : i32 to vector<1x256xi32>
    %684 = arith.cmpi slt, %29, %683 : vector<1x256xi32>
    %685 = arith.andi %682, %684 : vector<1x256xi1>
    %c28 = arith.constant 28 : index
    %686 = memref.load %arg4[%c28] : memref<98xf32, #tpu.memory_space<smem>>
    %c77 = arith.constant 77 : index
    %687 = memref.load %arg4[%c77] : memref<98xf32, #tpu.memory_space<smem>>
    %688 = vector.broadcast %686 : f32 to vector<1x256xf32>
    %689 = arith.mulf %688, %673 : vector<1x256xf32>
    %690 = vector.broadcast %687 : f32 to vector<1x256xf32>
    %691 = arith.mulf %690, %674 : vector<1x256xf32>
    %692 = arith.addf %689, %691 : vector<1x256xf32>
    %cst_192 = arith.constant 0.000000e+00 : f32
    %693 = vector.broadcast %cst_192 : f32 to vector<1x256xf32>
    %694 = arith.select %685, %692, %693 : vector<1x256xi1>, vector<1x256xf32>
    %695 = arith.addf %672, %694 : vector<1x256xf32>
    %c242_i32 = arith.constant 242 : i32
    %696 = tpu.dynamic_rotate %26 by %c242_i32 dim 1 : vector<1x256xf32>, i32 -> vector<1x256xf32>
    %c242_i32_193 = arith.constant 242 : i32
    %697 = tpu.dynamic_rotate %27 by %c242_i32_193 dim 1 : vector<1x256xf32>, i32 -> vector<1x256xf32>
    %c-1_i32_194 = arith.constant -1 : i32
    %698 = vector.broadcast %c-1_i32_194 : i32 to vector<1x256xi32>
    %699 = arith.cmpi sge, %28, %698 : vector<1x256xi32>
    %c15_i32_195 = arith.constant 15 : i32
    %700 = vector.broadcast %c15_i32_195 : i32 to vector<1x256xi32>
    %701 = arith.cmpi slt, %28, %700 : vector<1x256xi32>
    %702 = arith.andi %699, %701 : vector<1x256xi1>
    %c2_i32_196 = arith.constant 2 : i32
    %703 = vector.broadcast %c2_i32_196 : i32 to vector<1x256xi32>
    %704 = arith.cmpi sge, %29, %703 : vector<1x256xi32>
    %705 = arith.andi %702, %704 : vector<1x256xi1>
    %c18_i32_197 = arith.constant 18 : i32
    %706 = vector.broadcast %c18_i32_197 : i32 to vector<1x256xi32>
    %707 = arith.cmpi slt, %29, %706 : vector<1x256xi32>
    %708 = arith.andi %705, %707 : vector<1x256xi1>
    %c29 = arith.constant 29 : index
    %709 = memref.load %arg4[%c29] : memref<98xf32, #tpu.memory_space<smem>>
    %c78 = arith.constant 78 : index
    %710 = memref.load %arg4[%c78] : memref<98xf32, #tpu.memory_space<smem>>
    %711 = vector.broadcast %709 : f32 to vector<1x256xf32>
    %712 = arith.mulf %711, %696 : vector<1x256xf32>
    %713 = vector.broadcast %710 : f32 to vector<1x256xf32>
    %714 = arith.mulf %713, %697 : vector<1x256xf32>
    %715 = arith.addf %712, %714 : vector<1x256xf32>
    %cst_198 = arith.constant 0.000000e+00 : f32
    %716 = vector.broadcast %cst_198 : f32 to vector<1x256xf32>
    %717 = arith.select %708, %715, %716 : vector<1x256xi1>, vector<1x256xf32>
    %718 = arith.addf %695, %717 : vector<1x256xf32>
    %c241_i32 = arith.constant 241 : i32
    %719 = tpu.dynamic_rotate %26 by %c241_i32 dim 1 : vector<1x256xf32>, i32 -> vector<1x256xf32>
    %c241_i32_199 = arith.constant 241 : i32
    %720 = tpu.dynamic_rotate %27 by %c241_i32_199 dim 1 : vector<1x256xf32>, i32 -> vector<1x256xf32>
    %c-1_i32_200 = arith.constant -1 : i32
    %721 = vector.broadcast %c-1_i32_200 : i32 to vector<1x256xi32>
    %722 = arith.cmpi sge, %28, %721 : vector<1x256xi32>
    %c15_i32_201 = arith.constant 15 : i32
    %723 = vector.broadcast %c15_i32_201 : i32 to vector<1x256xi32>
    %724 = arith.cmpi slt, %28, %723 : vector<1x256xi32>
    %725 = arith.andi %722, %724 : vector<1x256xi1>
    %c1_i32_202 = arith.constant 1 : i32
    %726 = vector.broadcast %c1_i32_202 : i32 to vector<1x256xi32>
    %727 = arith.cmpi sge, %29, %726 : vector<1x256xi32>
    %728 = arith.andi %725, %727 : vector<1x256xi1>
    %c17_i32_203 = arith.constant 17 : i32
    %729 = vector.broadcast %c17_i32_203 : i32 to vector<1x256xi32>
    %730 = arith.cmpi slt, %29, %729 : vector<1x256xi32>
    %731 = arith.andi %728, %730 : vector<1x256xi1>
    %c30 = arith.constant 30 : index
    %732 = memref.load %arg4[%c30] : memref<98xf32, #tpu.memory_space<smem>>
    %c79 = arith.constant 79 : index
    %733 = memref.load %arg4[%c79] : memref<98xf32, #tpu.memory_space<smem>>
    %734 = vector.broadcast %732 : f32 to vector<1x256xf32>
    %735 = arith.mulf %734, %719 : vector<1x256xf32>
    %736 = vector.broadcast %733 : f32 to vector<1x256xf32>
    %737 = arith.mulf %736, %720 : vector<1x256xf32>
    %738 = arith.addf %735, %737 : vector<1x256xf32>
    %cst_204 = arith.constant 0.000000e+00 : f32
    %739 = vector.broadcast %cst_204 : f32 to vector<1x256xf32>
    %740 = arith.select %731, %738, %739 : vector<1x256xi1>, vector<1x256xf32>
    %741 = arith.addf %718, %740 : vector<1x256xf32>
    %c240_i32 = arith.constant 240 : i32
    %742 = tpu.dynamic_rotate %26 by %c240_i32 dim 1 : vector<1x256xf32>, i32 -> vector<1x256xf32>
    %c240_i32_205 = arith.constant 240 : i32
    %743 = tpu.dynamic_rotate %27 by %c240_i32_205 dim 1 : vector<1x256xf32>, i32 -> vector<1x256xf32>
    %c-1_i32_206 = arith.constant -1 : i32
    %744 = vector.broadcast %c-1_i32_206 : i32 to vector<1x256xi32>
    %745 = arith.cmpi sge, %28, %744 : vector<1x256xi32>
    %c15_i32_207 = arith.constant 15 : i32
    %746 = vector.broadcast %c15_i32_207 : i32 to vector<1x256xi32>
    %747 = arith.cmpi slt, %28, %746 : vector<1x256xi32>
    %748 = arith.andi %745, %747 : vector<1x256xi1>
    %c0_i32_208 = arith.constant 0 : i32
    %749 = vector.broadcast %c0_i32_208 : i32 to vector<1x256xi32>
    %750 = arith.cmpi sge, %29, %749 : vector<1x256xi32>
    %751 = arith.andi %748, %750 : vector<1x256xi1>
    %c16_i32_209 = arith.constant 16 : i32
    %752 = vector.broadcast %c16_i32_209 : i32 to vector<1x256xi32>
    %753 = arith.cmpi slt, %29, %752 : vector<1x256xi32>
    %754 = arith.andi %751, %753 : vector<1x256xi1>
    %c31 = arith.constant 31 : index
    %755 = memref.load %arg4[%c31] : memref<98xf32, #tpu.memory_space<smem>>
    %c80 = arith.constant 80 : index
    %756 = memref.load %arg4[%c80] : memref<98xf32, #tpu.memory_space<smem>>
    %757 = vector.broadcast %755 : f32 to vector<1x256xf32>
    %758 = arith.mulf %757, %742 : vector<1x256xf32>
    %759 = vector.broadcast %756 : f32 to vector<1x256xf32>
    %760 = arith.mulf %759, %743 : vector<1x256xf32>
    %761 = arith.addf %758, %760 : vector<1x256xf32>
    %cst_210 = arith.constant 0.000000e+00 : f32
    %762 = vector.broadcast %cst_210 : f32 to vector<1x256xf32>
    %763 = arith.select %754, %761, %762 : vector<1x256xi1>, vector<1x256xf32>
    %764 = arith.addf %741, %763 : vector<1x256xf32>
    %c239_i32 = arith.constant 239 : i32
    %765 = tpu.dynamic_rotate %26 by %c239_i32 dim 1 : vector<1x256xf32>, i32 -> vector<1x256xf32>
    %c239_i32_211 = arith.constant 239 : i32
    %766 = tpu.dynamic_rotate %27 by %c239_i32_211 dim 1 : vector<1x256xf32>, i32 -> vector<1x256xf32>
    %c-1_i32_212 = arith.constant -1 : i32
    %767 = vector.broadcast %c-1_i32_212 : i32 to vector<1x256xi32>
    %768 = arith.cmpi sge, %28, %767 : vector<1x256xi32>
    %c15_i32_213 = arith.constant 15 : i32
    %769 = vector.broadcast %c15_i32_213 : i32 to vector<1x256xi32>
    %770 = arith.cmpi slt, %28, %769 : vector<1x256xi32>
    %771 = arith.andi %768, %770 : vector<1x256xi1>
    %c-1_i32_214 = arith.constant -1 : i32
    %772 = vector.broadcast %c-1_i32_214 : i32 to vector<1x256xi32>
    %773 = arith.cmpi sge, %29, %772 : vector<1x256xi32>
    %774 = arith.andi %771, %773 : vector<1x256xi1>
    %c15_i32_215 = arith.constant 15 : i32
    %775 = vector.broadcast %c15_i32_215 : i32 to vector<1x256xi32>
    %776 = arith.cmpi slt, %29, %775 : vector<1x256xi32>
    %777 = arith.andi %774, %776 : vector<1x256xi1>
    %c32 = arith.constant 32 : index
    %778 = memref.load %arg4[%c32] : memref<98xf32, #tpu.memory_space<smem>>
    %c81 = arith.constant 81 : index
    %779 = memref.load %arg4[%c81] : memref<98xf32, #tpu.memory_space<smem>>
    %780 = vector.broadcast %778 : f32 to vector<1x256xf32>
    %781 = arith.mulf %780, %765 : vector<1x256xf32>
    %782 = vector.broadcast %779 : f32 to vector<1x256xf32>
    %783 = arith.mulf %782, %766 : vector<1x256xf32>
    %784 = arith.addf %781, %783 : vector<1x256xf32>
    %cst_216 = arith.constant 0.000000e+00 : f32
    %785 = vector.broadcast %cst_216 : f32 to vector<1x256xf32>
    %786 = arith.select %777, %784, %785 : vector<1x256xi1>, vector<1x256xf32>
    %787 = arith.addf %764, %786 : vector<1x256xf32>
    %c238_i32 = arith.constant 238 : i32
    %788 = tpu.dynamic_rotate %26 by %c238_i32 dim 1 : vector<1x256xf32>, i32 -> vector<1x256xf32>
    %c238_i32_217 = arith.constant 238 : i32
    %789 = tpu.dynamic_rotate %27 by %c238_i32_217 dim 1 : vector<1x256xf32>, i32 -> vector<1x256xf32>
    %c-1_i32_218 = arith.constant -1 : i32
    %790 = vector.broadcast %c-1_i32_218 : i32 to vector<1x256xi32>
    %791 = arith.cmpi sge, %28, %790 : vector<1x256xi32>
    %c15_i32_219 = arith.constant 15 : i32
    %792 = vector.broadcast %c15_i32_219 : i32 to vector<1x256xi32>
    %793 = arith.cmpi slt, %28, %792 : vector<1x256xi32>
    %794 = arith.andi %791, %793 : vector<1x256xi1>
    %c-2_i32_220 = arith.constant -2 : i32
    %795 = vector.broadcast %c-2_i32_220 : i32 to vector<1x256xi32>
    %796 = arith.cmpi sge, %29, %795 : vector<1x256xi32>
    %797 = arith.andi %794, %796 : vector<1x256xi1>
    %c14_i32_221 = arith.constant 14 : i32
    %798 = vector.broadcast %c14_i32_221 : i32 to vector<1x256xi32>
    %799 = arith.cmpi slt, %29, %798 : vector<1x256xi32>
    %800 = arith.andi %797, %799 : vector<1x256xi1>
    %c33 = arith.constant 33 : index
    %801 = memref.load %arg4[%c33] : memref<98xf32, #tpu.memory_space<smem>>
    %c82 = arith.constant 82 : index
    %802 = memref.load %arg4[%c82] : memref<98xf32, #tpu.memory_space<smem>>
    %803 = vector.broadcast %801 : f32 to vector<1x256xf32>
    %804 = arith.mulf %803, %788 : vector<1x256xf32>
    %805 = vector.broadcast %802 : f32 to vector<1x256xf32>
    %806 = arith.mulf %805, %789 : vector<1x256xf32>
    %807 = arith.addf %804, %806 : vector<1x256xf32>
    %cst_222 = arith.constant 0.000000e+00 : f32
    %808 = vector.broadcast %cst_222 : f32 to vector<1x256xf32>
    %809 = arith.select %800, %807, %808 : vector<1x256xi1>, vector<1x256xf32>
    %810 = arith.addf %787, %809 : vector<1x256xf32>
    %c237_i32 = arith.constant 237 : i32
    %811 = tpu.dynamic_rotate %26 by %c237_i32 dim 1 : vector<1x256xf32>, i32 -> vector<1x256xf32>
    %c237_i32_223 = arith.constant 237 : i32
    %812 = tpu.dynamic_rotate %27 by %c237_i32_223 dim 1 : vector<1x256xf32>, i32 -> vector<1x256xf32>
    %c-1_i32_224 = arith.constant -1 : i32
    %813 = vector.broadcast %c-1_i32_224 : i32 to vector<1x256xi32>
    %814 = arith.cmpi sge, %28, %813 : vector<1x256xi32>
    %c15_i32_225 = arith.constant 15 : i32
    %815 = vector.broadcast %c15_i32_225 : i32 to vector<1x256xi32>
    %816 = arith.cmpi slt, %28, %815 : vector<1x256xi32>
    %817 = arith.andi %814, %816 : vector<1x256xi1>
    %c-3_i32_226 = arith.constant -3 : i32
    %818 = vector.broadcast %c-3_i32_226 : i32 to vector<1x256xi32>
    %819 = arith.cmpi sge, %29, %818 : vector<1x256xi32>
    %820 = arith.andi %817, %819 : vector<1x256xi1>
    %c13_i32_227 = arith.constant 13 : i32
    %821 = vector.broadcast %c13_i32_227 : i32 to vector<1x256xi32>
    %822 = arith.cmpi slt, %29, %821 : vector<1x256xi32>
    %823 = arith.andi %820, %822 : vector<1x256xi1>
    %c34 = arith.constant 34 : index
    %824 = memref.load %arg4[%c34] : memref<98xf32, #tpu.memory_space<smem>>
    %c83 = arith.constant 83 : index
    %825 = memref.load %arg4[%c83] : memref<98xf32, #tpu.memory_space<smem>>
    %826 = vector.broadcast %824 : f32 to vector<1x256xf32>
    %827 = arith.mulf %826, %811 : vector<1x256xf32>
    %828 = vector.broadcast %825 : f32 to vector<1x256xf32>
    %829 = arith.mulf %828, %812 : vector<1x256xf32>
    %830 = arith.addf %827, %829 : vector<1x256xf32>
    %cst_228 = arith.constant 0.000000e+00 : f32
    %831 = vector.broadcast %cst_228 : f32 to vector<1x256xf32>
    %832 = arith.select %823, %830, %831 : vector<1x256xi1>, vector<1x256xf32>
    %833 = arith.addf %810, %832 : vector<1x256xf32>
    %c227_i32 = arith.constant 227 : i32
    %834 = tpu.dynamic_rotate %26 by %c227_i32 dim 1 : vector<1x256xf32>, i32 -> vector<1x256xf32>
    %c227_i32_229 = arith.constant 227 : i32
    %835 = tpu.dynamic_rotate %27 by %c227_i32_229 dim 1 : vector<1x256xf32>, i32 -> vector<1x256xf32>
    %c-2_i32_230 = arith.constant -2 : i32
    %836 = vector.broadcast %c-2_i32_230 : i32 to vector<1x256xi32>
    %837 = arith.cmpi sge, %28, %836 : vector<1x256xi32>
    %c14_i32_231 = arith.constant 14 : i32
    %838 = vector.broadcast %c14_i32_231 : i32 to vector<1x256xi32>
    %839 = arith.cmpi slt, %28, %838 : vector<1x256xi32>
    %840 = arith.andi %837, %839 : vector<1x256xi1>
    %c3_i32_232 = arith.constant 3 : i32
    %841 = vector.broadcast %c3_i32_232 : i32 to vector<1x256xi32>
    %842 = arith.cmpi sge, %29, %841 : vector<1x256xi32>
    %843 = arith.andi %840, %842 : vector<1x256xi1>
    %c19_i32_233 = arith.constant 19 : i32
    %844 = vector.broadcast %c19_i32_233 : i32 to vector<1x256xi32>
    %845 = arith.cmpi slt, %29, %844 : vector<1x256xi32>
    %846 = arith.andi %843, %845 : vector<1x256xi1>
    %c35 = arith.constant 35 : index
    %847 = memref.load %arg4[%c35] : memref<98xf32, #tpu.memory_space<smem>>
    %c84 = arith.constant 84 : index
    %848 = memref.load %arg4[%c84] : memref<98xf32, #tpu.memory_space<smem>>
    %849 = vector.broadcast %847 : f32 to vector<1x256xf32>
    %850 = arith.mulf %849, %834 : vector<1x256xf32>
    %851 = vector.broadcast %848 : f32 to vector<1x256xf32>
    %852 = arith.mulf %851, %835 : vector<1x256xf32>
    %853 = arith.addf %850, %852 : vector<1x256xf32>
    %cst_234 = arith.constant 0.000000e+00 : f32
    %854 = vector.broadcast %cst_234 : f32 to vector<1x256xf32>
    %855 = arith.select %846, %853, %854 : vector<1x256xi1>, vector<1x256xf32>
    %856 = arith.addf %833, %855 : vector<1x256xf32>
    %c226_i32 = arith.constant 226 : i32
    %857 = tpu.dynamic_rotate %26 by %c226_i32 dim 1 : vector<1x256xf32>, i32 -> vector<1x256xf32>
    %c226_i32_235 = arith.constant 226 : i32
    %858 = tpu.dynamic_rotate %27 by %c226_i32_235 dim 1 : vector<1x256xf32>, i32 -> vector<1x256xf32>
    %c-2_i32_236 = arith.constant -2 : i32
    %859 = vector.broadcast %c-2_i32_236 : i32 to vector<1x256xi32>
    %860 = arith.cmpi sge, %28, %859 : vector<1x256xi32>
    %c14_i32_237 = arith.constant 14 : i32
    %861 = vector.broadcast %c14_i32_237 : i32 to vector<1x256xi32>
    %862 = arith.cmpi slt, %28, %861 : vector<1x256xi32>
    %863 = arith.andi %860, %862 : vector<1x256xi1>
    %c2_i32_238 = arith.constant 2 : i32
    %864 = vector.broadcast %c2_i32_238 : i32 to vector<1x256xi32>
    %865 = arith.cmpi sge, %29, %864 : vector<1x256xi32>
    %866 = arith.andi %863, %865 : vector<1x256xi1>
    %c18_i32_239 = arith.constant 18 : i32
    %867 = vector.broadcast %c18_i32_239 : i32 to vector<1x256xi32>
    %868 = arith.cmpi slt, %29, %867 : vector<1x256xi32>
    %869 = arith.andi %866, %868 : vector<1x256xi1>
    %c36 = arith.constant 36 : index
    %870 = memref.load %arg4[%c36] : memref<98xf32, #tpu.memory_space<smem>>
    %c85 = arith.constant 85 : index
    %871 = memref.load %arg4[%c85] : memref<98xf32, #tpu.memory_space<smem>>
    %872 = vector.broadcast %870 : f32 to vector<1x256xf32>
    %873 = arith.mulf %872, %857 : vector<1x256xf32>
    %874 = vector.broadcast %871 : f32 to vector<1x256xf32>
    %875 = arith.mulf %874, %858 : vector<1x256xf32>
    %876 = arith.addf %873, %875 : vector<1x256xf32>
    %cst_240 = arith.constant 0.000000e+00 : f32
    %877 = vector.broadcast %cst_240 : f32 to vector<1x256xf32>
    %878 = arith.select %869, %876, %877 : vector<1x256xi1>, vector<1x256xf32>
    %879 = arith.addf %856, %878 : vector<1x256xf32>
    %c225_i32 = arith.constant 225 : i32
    %880 = tpu.dynamic_rotate %26 by %c225_i32 dim 1 : vector<1x256xf32>, i32 -> vector<1x256xf32>
    %c225_i32_241 = arith.constant 225 : i32
    %881 = tpu.dynamic_rotate %27 by %c225_i32_241 dim 1 : vector<1x256xf32>, i32 -> vector<1x256xf32>
    %c-2_i32_242 = arith.constant -2 : i32
    %882 = vector.broadcast %c-2_i32_242 : i32 to vector<1x256xi32>
    %883 = arith.cmpi sge, %28, %882 : vector<1x256xi32>
    %c14_i32_243 = arith.constant 14 : i32
    %884 = vector.broadcast %c14_i32_243 : i32 to vector<1x256xi32>
    %885 = arith.cmpi slt, %28, %884 : vector<1x256xi32>
    %886 = arith.andi %883, %885 : vector<1x256xi1>
    %c1_i32_244 = arith.constant 1 : i32
    %887 = vector.broadcast %c1_i32_244 : i32 to vector<1x256xi32>
    %888 = arith.cmpi sge, %29, %887 : vector<1x256xi32>
    %889 = arith.andi %886, %888 : vector<1x256xi1>
    %c17_i32_245 = arith.constant 17 : i32
    %890 = vector.broadcast %c17_i32_245 : i32 to vector<1x256xi32>
    %891 = arith.cmpi slt, %29, %890 : vector<1x256xi32>
    %892 = arith.andi %889, %891 : vector<1x256xi1>
    %c37 = arith.constant 37 : index
    %893 = memref.load %arg4[%c37] : memref<98xf32, #tpu.memory_space<smem>>
    %c86 = arith.constant 86 : index
    %894 = memref.load %arg4[%c86] : memref<98xf32, #tpu.memory_space<smem>>
    %895 = vector.broadcast %893 : f32 to vector<1x256xf32>
    %896 = arith.mulf %895, %880 : vector<1x256xf32>
    %897 = vector.broadcast %894 : f32 to vector<1x256xf32>
    %898 = arith.mulf %897, %881 : vector<1x256xf32>
    %899 = arith.addf %896, %898 : vector<1x256xf32>
    %cst_246 = arith.constant 0.000000e+00 : f32
    %900 = vector.broadcast %cst_246 : f32 to vector<1x256xf32>
    %901 = arith.select %892, %899, %900 : vector<1x256xi1>, vector<1x256xf32>
    %902 = arith.addf %879, %901 : vector<1x256xf32>
    %c224_i32 = arith.constant 224 : i32
    %903 = tpu.dynamic_rotate %26 by %c224_i32 dim 1 : vector<1x256xf32>, i32 -> vector<1x256xf32>
    %c224_i32_247 = arith.constant 224 : i32
    %904 = tpu.dynamic_rotate %27 by %c224_i32_247 dim 1 : vector<1x256xf32>, i32 -> vector<1x256xf32>
    %c-2_i32_248 = arith.constant -2 : i32
    %905 = vector.broadcast %c-2_i32_248 : i32 to vector<1x256xi32>
    %906 = arith.cmpi sge, %28, %905 : vector<1x256xi32>
    %c14_i32_249 = arith.constant 14 : i32
    %907 = vector.broadcast %c14_i32_249 : i32 to vector<1x256xi32>
    %908 = arith.cmpi slt, %28, %907 : vector<1x256xi32>
    %909 = arith.andi %906, %908 : vector<1x256xi1>
    %c0_i32_250 = arith.constant 0 : i32
    %910 = vector.broadcast %c0_i32_250 : i32 to vector<1x256xi32>
    %911 = arith.cmpi sge, %29, %910 : vector<1x256xi32>
    %912 = arith.andi %909, %911 : vector<1x256xi1>
    %c16_i32_251 = arith.constant 16 : i32
    %913 = vector.broadcast %c16_i32_251 : i32 to vector<1x256xi32>
    %914 = arith.cmpi slt, %29, %913 : vector<1x256xi32>
    %915 = arith.andi %912, %914 : vector<1x256xi1>
    %c38 = arith.constant 38 : index
    %916 = memref.load %arg4[%c38] : memref<98xf32, #tpu.memory_space<smem>>
    %c87 = arith.constant 87 : index
    %917 = memref.load %arg4[%c87] : memref<98xf32, #tpu.memory_space<smem>>
    %918 = vector.broadcast %916 : f32 to vector<1x256xf32>
    %919 = arith.mulf %918, %903 : vector<1x256xf32>
    %920 = vector.broadcast %917 : f32 to vector<1x256xf32>
    %921 = arith.mulf %920, %904 : vector<1x256xf32>
    %922 = arith.addf %919, %921 : vector<1x256xf32>
    %cst_252 = arith.constant 0.000000e+00 : f32
    %923 = vector.broadcast %cst_252 : f32 to vector<1x256xf32>
    %924 = arith.select %915, %922, %923 : vector<1x256xi1>, vector<1x256xf32>
    %925 = arith.addf %902, %924 : vector<1x256xf32>
    %c223_i32 = arith.constant 223 : i32
    %926 = tpu.dynamic_rotate %26 by %c223_i32 dim 1 : vector<1x256xf32>, i32 -> vector<1x256xf32>
    %c223_i32_253 = arith.constant 223 : i32
    %927 = tpu.dynamic_rotate %27 by %c223_i32_253 dim 1 : vector<1x256xf32>, i32 -> vector<1x256xf32>
    %c-2_i32_254 = arith.constant -2 : i32
    %928 = vector.broadcast %c-2_i32_254 : i32 to vector<1x256xi32>
    %929 = arith.cmpi sge, %28, %928 : vector<1x256xi32>
    %c14_i32_255 = arith.constant 14 : i32
    %930 = vector.broadcast %c14_i32_255 : i32 to vector<1x256xi32>
    %931 = arith.cmpi slt, %28, %930 : vector<1x256xi32>
    %932 = arith.andi %929, %931 : vector<1x256xi1>
    %c-1_i32_256 = arith.constant -1 : i32
    %933 = vector.broadcast %c-1_i32_256 : i32 to vector<1x256xi32>
    %934 = arith.cmpi sge, %29, %933 : vector<1x256xi32>
    %935 = arith.andi %932, %934 : vector<1x256xi1>
    %c15_i32_257 = arith.constant 15 : i32
    %936 = vector.broadcast %c15_i32_257 : i32 to vector<1x256xi32>
    %937 = arith.cmpi slt, %29, %936 : vector<1x256xi32>
    %938 = arith.andi %935, %937 : vector<1x256xi1>
    %c39 = arith.constant 39 : index
    %939 = memref.load %arg4[%c39] : memref<98xf32, #tpu.memory_space<smem>>
    %c88 = arith.constant 88 : index
    %940 = memref.load %arg4[%c88] : memref<98xf32, #tpu.memory_space<smem>>
    %941 = vector.broadcast %939 : f32 to vector<1x256xf32>
    %942 = arith.mulf %941, %926 : vector<1x256xf32>
    %943 = vector.broadcast %940 : f32 to vector<1x256xf32>
    %944 = arith.mulf %943, %927 : vector<1x256xf32>
    %945 = arith.addf %942, %944 : vector<1x256xf32>
    %cst_258 = arith.constant 0.000000e+00 : f32
    %946 = vector.broadcast %cst_258 : f32 to vector<1x256xf32>
    %947 = arith.select %938, %945, %946 : vector<1x256xi1>, vector<1x256xf32>
    %948 = arith.addf %925, %947 : vector<1x256xf32>
    %c222_i32 = arith.constant 222 : i32
    %949 = tpu.dynamic_rotate %26 by %c222_i32 dim 1 : vector<1x256xf32>, i32 -> vector<1x256xf32>
    %c222_i32_259 = arith.constant 222 : i32
    %950 = tpu.dynamic_rotate %27 by %c222_i32_259 dim 1 : vector<1x256xf32>, i32 -> vector<1x256xf32>
    %c-2_i32_260 = arith.constant -2 : i32
    %951 = vector.broadcast %c-2_i32_260 : i32 to vector<1x256xi32>
    %952 = arith.cmpi sge, %28, %951 : vector<1x256xi32>
    %c14_i32_261 = arith.constant 14 : i32
    %953 = vector.broadcast %c14_i32_261 : i32 to vector<1x256xi32>
    %954 = arith.cmpi slt, %28, %953 : vector<1x256xi32>
    %955 = arith.andi %952, %954 : vector<1x256xi1>
    %c-2_i32_262 = arith.constant -2 : i32
    %956 = vector.broadcast %c-2_i32_262 : i32 to vector<1x256xi32>
    %957 = arith.cmpi sge, %29, %956 : vector<1x256xi32>
    %958 = arith.andi %955, %957 : vector<1x256xi1>
    %c14_i32_263 = arith.constant 14 : i32
    %959 = vector.broadcast %c14_i32_263 : i32 to vector<1x256xi32>
    %960 = arith.cmpi slt, %29, %959 : vector<1x256xi32>
    %961 = arith.andi %958, %960 : vector<1x256xi1>
    %c40 = arith.constant 40 : index
    %962 = memref.load %arg4[%c40] : memref<98xf32, #tpu.memory_space<smem>>
    %c89 = arith.constant 89 : index
    %963 = memref.load %arg4[%c89] : memref<98xf32, #tpu.memory_space<smem>>
    %964 = vector.broadcast %962 : f32 to vector<1x256xf32>
    %965 = arith.mulf %964, %949 : vector<1x256xf32>
    %966 = vector.broadcast %963 : f32 to vector<1x256xf32>
    %967 = arith.mulf %966, %950 : vector<1x256xf32>
    %968 = arith.addf %965, %967 : vector<1x256xf32>
    %cst_264 = arith.constant 0.000000e+00 : f32
    %969 = vector.broadcast %cst_264 : f32 to vector<1x256xf32>
    %970 = arith.select %961, %968, %969 : vector<1x256xi1>, vector<1x256xf32>
    %971 = arith.addf %948, %970 : vector<1x256xf32>
    %c221_i32 = arith.constant 221 : i32
    %972 = tpu.dynamic_rotate %26 by %c221_i32 dim 1 : vector<1x256xf32>, i32 -> vector<1x256xf32>
    %c221_i32_265 = arith.constant 221 : i32
    %973 = tpu.dynamic_rotate %27 by %c221_i32_265 dim 1 : vector<1x256xf32>, i32 -> vector<1x256xf32>
    %c-2_i32_266 = arith.constant -2 : i32
    %974 = vector.broadcast %c-2_i32_266 : i32 to vector<1x256xi32>
    %975 = arith.cmpi sge, %28, %974 : vector<1x256xi32>
    %c14_i32_267 = arith.constant 14 : i32
    %976 = vector.broadcast %c14_i32_267 : i32 to vector<1x256xi32>
    %977 = arith.cmpi slt, %28, %976 : vector<1x256xi32>
    %978 = arith.andi %975, %977 : vector<1x256xi1>
    %c-3_i32_268 = arith.constant -3 : i32
    %979 = vector.broadcast %c-3_i32_268 : i32 to vector<1x256xi32>
    %980 = arith.cmpi sge, %29, %979 : vector<1x256xi32>
    %981 = arith.andi %978, %980 : vector<1x256xi1>
    %c13_i32_269 = arith.constant 13 : i32
    %982 = vector.broadcast %c13_i32_269 : i32 to vector<1x256xi32>
    %983 = arith.cmpi slt, %29, %982 : vector<1x256xi32>
    %984 = arith.andi %981, %983 : vector<1x256xi1>
    %c41 = arith.constant 41 : index
    %985 = memref.load %arg4[%c41] : memref<98xf32, #tpu.memory_space<smem>>
    %c90 = arith.constant 90 : index
    %986 = memref.load %arg4[%c90] : memref<98xf32, #tpu.memory_space<smem>>
    %987 = vector.broadcast %985 : f32 to vector<1x256xf32>
    %988 = arith.mulf %987, %972 : vector<1x256xf32>
    %989 = vector.broadcast %986 : f32 to vector<1x256xf32>
    %990 = arith.mulf %989, %973 : vector<1x256xf32>
    %991 = arith.addf %988, %990 : vector<1x256xf32>
    %cst_270 = arith.constant 0.000000e+00 : f32
    %992 = vector.broadcast %cst_270 : f32 to vector<1x256xf32>
    %993 = arith.select %984, %991, %992 : vector<1x256xi1>, vector<1x256xf32>
    %994 = arith.addf %971, %993 : vector<1x256xf32>
    %c211_i32 = arith.constant 211 : i32
    %995 = tpu.dynamic_rotate %26 by %c211_i32 dim 1 : vector<1x256xf32>, i32 -> vector<1x256xf32>
    %c211_i32_271 = arith.constant 211 : i32
    %996 = tpu.dynamic_rotate %27 by %c211_i32_271 dim 1 : vector<1x256xf32>, i32 -> vector<1x256xf32>
    %c-3_i32_272 = arith.constant -3 : i32
    %997 = vector.broadcast %c-3_i32_272 : i32 to vector<1x256xi32>
    %998 = arith.cmpi sge, %28, %997 : vector<1x256xi32>
    %c13_i32_273 = arith.constant 13 : i32
    %999 = vector.broadcast %c13_i32_273 : i32 to vector<1x256xi32>
    %1000 = arith.cmpi slt, %28, %999 : vector<1x256xi32>
    %1001 = arith.andi %998, %1000 : vector<1x256xi1>
    %c3_i32_274 = arith.constant 3 : i32
    %1002 = vector.broadcast %c3_i32_274 : i32 to vector<1x256xi32>
    %1003 = arith.cmpi sge, %29, %1002 : vector<1x256xi32>
    %1004 = arith.andi %1001, %1003 : vector<1x256xi1>
    %c19_i32_275 = arith.constant 19 : i32
    %1005 = vector.broadcast %c19_i32_275 : i32 to vector<1x256xi32>
    %1006 = arith.cmpi slt, %29, %1005 : vector<1x256xi32>
    %1007 = arith.andi %1004, %1006 : vector<1x256xi1>
    %c42 = arith.constant 42 : index
    %1008 = memref.load %arg4[%c42] : memref<98xf32, #tpu.memory_space<smem>>
    %c91 = arith.constant 91 : index
    %1009 = memref.load %arg4[%c91] : memref<98xf32, #tpu.memory_space<smem>>
    %1010 = vector.broadcast %1008 : f32 to vector<1x256xf32>
    %1011 = arith.mulf %1010, %995 : vector<1x256xf32>
    %1012 = vector.broadcast %1009 : f32 to vector<1x256xf32>
    %1013 = arith.mulf %1012, %996 : vector<1x256xf32>
    %1014 = arith.addf %1011, %1013 : vector<1x256xf32>
    %cst_276 = arith.constant 0.000000e+00 : f32
    %1015 = vector.broadcast %cst_276 : f32 to vector<1x256xf32>
    %1016 = arith.select %1007, %1014, %1015 : vector<1x256xi1>, vector<1x256xf32>
    %1017 = arith.addf %994, %1016 : vector<1x256xf32>
    %c210_i32 = arith.constant 210 : i32
    %1018 = tpu.dynamic_rotate %26 by %c210_i32 dim 1 : vector<1x256xf32>, i32 -> vector<1x256xf32>
    %c210_i32_277 = arith.constant 210 : i32
    %1019 = tpu.dynamic_rotate %27 by %c210_i32_277 dim 1 : vector<1x256xf32>, i32 -> vector<1x256xf32>
    %c-3_i32_278 = arith.constant -3 : i32
    %1020 = vector.broadcast %c-3_i32_278 : i32 to vector<1x256xi32>
    %1021 = arith.cmpi sge, %28, %1020 : vector<1x256xi32>
    %c13_i32_279 = arith.constant 13 : i32
    %1022 = vector.broadcast %c13_i32_279 : i32 to vector<1x256xi32>
    %1023 = arith.cmpi slt, %28, %1022 : vector<1x256xi32>
    %1024 = arith.andi %1021, %1023 : vector<1x256xi1>
    %c2_i32_280 = arith.constant 2 : i32
    %1025 = vector.broadcast %c2_i32_280 : i32 to vector<1x256xi32>
    %1026 = arith.cmpi sge, %29, %1025 : vector<1x256xi32>
    %1027 = arith.andi %1024, %1026 : vector<1x256xi1>
    %c18_i32_281 = arith.constant 18 : i32
    %1028 = vector.broadcast %c18_i32_281 : i32 to vector<1x256xi32>
    %1029 = arith.cmpi slt, %29, %1028 : vector<1x256xi32>
    %1030 = arith.andi %1027, %1029 : vector<1x256xi1>
    %c43 = arith.constant 43 : index
    %1031 = memref.load %arg4[%c43] : memref<98xf32, #tpu.memory_space<smem>>
    %c92 = arith.constant 92 : index
    %1032 = memref.load %arg4[%c92] : memref<98xf32, #tpu.memory_space<smem>>
    %1033 = vector.broadcast %1031 : f32 to vector<1x256xf32>
    %1034 = arith.mulf %1033, %1018 : vector<1x256xf32>
    %1035 = vector.broadcast %1032 : f32 to vector<1x256xf32>
    %1036 = arith.mulf %1035, %1019 : vector<1x256xf32>
    %1037 = arith.addf %1034, %1036 : vector<1x256xf32>
    %cst_282 = arith.constant 0.000000e+00 : f32
    %1038 = vector.broadcast %cst_282 : f32 to vector<1x256xf32>
    %1039 = arith.select %1030, %1037, %1038 : vector<1x256xi1>, vector<1x256xf32>
    %1040 = arith.addf %1017, %1039 : vector<1x256xf32>
    %c209_i32 = arith.constant 209 : i32
    %1041 = tpu.dynamic_rotate %26 by %c209_i32 dim 1 : vector<1x256xf32>, i32 -> vector<1x256xf32>
    %c209_i32_283 = arith.constant 209 : i32
    %1042 = tpu.dynamic_rotate %27 by %c209_i32_283 dim 1 : vector<1x256xf32>, i32 -> vector<1x256xf32>
    %c-3_i32_284 = arith.constant -3 : i32
    %1043 = vector.broadcast %c-3_i32_284 : i32 to vector<1x256xi32>
    %1044 = arith.cmpi sge, %28, %1043 : vector<1x256xi32>
    %c13_i32_285 = arith.constant 13 : i32
    %1045 = vector.broadcast %c13_i32_285 : i32 to vector<1x256xi32>
    %1046 = arith.cmpi slt, %28, %1045 : vector<1x256xi32>
    %1047 = arith.andi %1044, %1046 : vector<1x256xi1>
    %c1_i32_286 = arith.constant 1 : i32
    %1048 = vector.broadcast %c1_i32_286 : i32 to vector<1x256xi32>
    %1049 = arith.cmpi sge, %29, %1048 : vector<1x256xi32>
    %1050 = arith.andi %1047, %1049 : vector<1x256xi1>
    %c17_i32_287 = arith.constant 17 : i32
    %1051 = vector.broadcast %c17_i32_287 : i32 to vector<1x256xi32>
    %1052 = arith.cmpi slt, %29, %1051 : vector<1x256xi32>
    %1053 = arith.andi %1050, %1052 : vector<1x256xi1>
    %c44 = arith.constant 44 : index
    %1054 = memref.load %arg4[%c44] : memref<98xf32, #tpu.memory_space<smem>>
    %c93 = arith.constant 93 : index
    %1055 = memref.load %arg4[%c93] : memref<98xf32, #tpu.memory_space<smem>>
    %1056 = vector.broadcast %1054 : f32 to vector<1x256xf32>
    %1057 = arith.mulf %1056, %1041 : vector<1x256xf32>
    %1058 = vector.broadcast %1055 : f32 to vector<1x256xf32>
    %1059 = arith.mulf %1058, %1042 : vector<1x256xf32>
    %1060 = arith.addf %1057, %1059 : vector<1x256xf32>
    %cst_288 = arith.constant 0.000000e+00 : f32
    %1061 = vector.broadcast %cst_288 : f32 to vector<1x256xf32>
    %1062 = arith.select %1053, %1060, %1061 : vector<1x256xi1>, vector<1x256xf32>
    %1063 = arith.addf %1040, %1062 : vector<1x256xf32>
    %c208_i32 = arith.constant 208 : i32
    %1064 = tpu.dynamic_rotate %26 by %c208_i32 dim 1 : vector<1x256xf32>, i32 -> vector<1x256xf32>
    %c208_i32_289 = arith.constant 208 : i32
    %1065 = tpu.dynamic_rotate %27 by %c208_i32_289 dim 1 : vector<1x256xf32>, i32 -> vector<1x256xf32>
    %c-3_i32_290 = arith.constant -3 : i32
    %1066 = vector.broadcast %c-3_i32_290 : i32 to vector<1x256xi32>
    %1067 = arith.cmpi sge, %28, %1066 : vector<1x256xi32>
    %c13_i32_291 = arith.constant 13 : i32
    %1068 = vector.broadcast %c13_i32_291 : i32 to vector<1x256xi32>
    %1069 = arith.cmpi slt, %28, %1068 : vector<1x256xi32>
    %1070 = arith.andi %1067, %1069 : vector<1x256xi1>
    %c0_i32_292 = arith.constant 0 : i32
    %1071 = vector.broadcast %c0_i32_292 : i32 to vector<1x256xi32>
    %1072 = arith.cmpi sge, %29, %1071 : vector<1x256xi32>
    %1073 = arith.andi %1070, %1072 : vector<1x256xi1>
    %c16_i32_293 = arith.constant 16 : i32
    %1074 = vector.broadcast %c16_i32_293 : i32 to vector<1x256xi32>
    %1075 = arith.cmpi slt, %29, %1074 : vector<1x256xi32>
    %1076 = arith.andi %1073, %1075 : vector<1x256xi1>
    %c45 = arith.constant 45 : index
    %1077 = memref.load %arg4[%c45] : memref<98xf32, #tpu.memory_space<smem>>
    %c94 = arith.constant 94 : index
    %1078 = memref.load %arg4[%c94] : memref<98xf32, #tpu.memory_space<smem>>
    %1079 = vector.broadcast %1077 : f32 to vector<1x256xf32>
    %1080 = arith.mulf %1079, %1064 : vector<1x256xf32>
    %1081 = vector.broadcast %1078 : f32 to vector<1x256xf32>
    %1082 = arith.mulf %1081, %1065 : vector<1x256xf32>
    %1083 = arith.addf %1080, %1082 : vector<1x256xf32>
    %cst_294 = arith.constant 0.000000e+00 : f32
    %1084 = vector.broadcast %cst_294 : f32 to vector<1x256xf32>
    %1085 = arith.select %1076, %1083, %1084 : vector<1x256xi1>, vector<1x256xf32>
    %1086 = arith.addf %1063, %1085 : vector<1x256xf32>
    %c207_i32 = arith.constant 207 : i32
    %1087 = tpu.dynamic_rotate %26 by %c207_i32 dim 1 : vector<1x256xf32>, i32 -> vector<1x256xf32>
    %c207_i32_295 = arith.constant 207 : i32
    %1088 = tpu.dynamic_rotate %27 by %c207_i32_295 dim 1 : vector<1x256xf32>, i32 -> vector<1x256xf32>
    %c-3_i32_296 = arith.constant -3 : i32
    %1089 = vector.broadcast %c-3_i32_296 : i32 to vector<1x256xi32>
    %1090 = arith.cmpi sge, %28, %1089 : vector<1x256xi32>
    %c13_i32_297 = arith.constant 13 : i32
    %1091 = vector.broadcast %c13_i32_297 : i32 to vector<1x256xi32>
    %1092 = arith.cmpi slt, %28, %1091 : vector<1x256xi32>
    %1093 = arith.andi %1090, %1092 : vector<1x256xi1>
    %c-1_i32_298 = arith.constant -1 : i32
    %1094 = vector.broadcast %c-1_i32_298 : i32 to vector<1x256xi32>
    %1095 = arith.cmpi sge, %29, %1094 : vector<1x256xi32>
    %1096 = arith.andi %1093, %1095 : vector<1x256xi1>
    %c15_i32_299 = arith.constant 15 : i32
    %1097 = vector.broadcast %c15_i32_299 : i32 to vector<1x256xi32>
    %1098 = arith.cmpi slt, %29, %1097 : vector<1x256xi32>
    %1099 = arith.andi %1096, %1098 : vector<1x256xi1>
    %c46 = arith.constant 46 : index
    %1100 = memref.load %arg4[%c46] : memref<98xf32, #tpu.memory_space<smem>>
    %c95 = arith.constant 95 : index
    %1101 = memref.load %arg4[%c95] : memref<98xf32, #tpu.memory_space<smem>>
    %1102 = vector.broadcast %1100 : f32 to vector<1x256xf32>
    %1103 = arith.mulf %1102, %1087 : vector<1x256xf32>
    %1104 = vector.broadcast %1101 : f32 to vector<1x256xf32>
    %1105 = arith.mulf %1104, %1088 : vector<1x256xf32>
    %1106 = arith.addf %1103, %1105 : vector<1x256xf32>
    %cst_300 = arith.constant 0.000000e+00 : f32
    %1107 = vector.broadcast %cst_300 : f32 to vector<1x256xf32>
    %1108 = arith.select %1099, %1106, %1107 : vector<1x256xi1>, vector<1x256xf32>
    %1109 = arith.addf %1086, %1108 : vector<1x256xf32>
    %c206_i32 = arith.constant 206 : i32
    %1110 = tpu.dynamic_rotate %26 by %c206_i32 dim 1 : vector<1x256xf32>, i32 -> vector<1x256xf32>
    %c206_i32_301 = arith.constant 206 : i32
    %1111 = tpu.dynamic_rotate %27 by %c206_i32_301 dim 1 : vector<1x256xf32>, i32 -> vector<1x256xf32>
    %c-3_i32_302 = arith.constant -3 : i32
    %1112 = vector.broadcast %c-3_i32_302 : i32 to vector<1x256xi32>
    %1113 = arith.cmpi sge, %28, %1112 : vector<1x256xi32>
    %c13_i32_303 = arith.constant 13 : i32
    %1114 = vector.broadcast %c13_i32_303 : i32 to vector<1x256xi32>
    %1115 = arith.cmpi slt, %28, %1114 : vector<1x256xi32>
    %1116 = arith.andi %1113, %1115 : vector<1x256xi1>
    %c-2_i32_304 = arith.constant -2 : i32
    %1117 = vector.broadcast %c-2_i32_304 : i32 to vector<1x256xi32>
    %1118 = arith.cmpi sge, %29, %1117 : vector<1x256xi32>
    %1119 = arith.andi %1116, %1118 : vector<1x256xi1>
    %c14_i32_305 = arith.constant 14 : i32
    %1120 = vector.broadcast %c14_i32_305 : i32 to vector<1x256xi32>
    %1121 = arith.cmpi slt, %29, %1120 : vector<1x256xi32>
    %1122 = arith.andi %1119, %1121 : vector<1x256xi1>
    %c47 = arith.constant 47 : index
    %1123 = memref.load %arg4[%c47] : memref<98xf32, #tpu.memory_space<smem>>
    %c96 = arith.constant 96 : index
    %1124 = memref.load %arg4[%c96] : memref<98xf32, #tpu.memory_space<smem>>
    %1125 = vector.broadcast %1123 : f32 to vector<1x256xf32>
    %1126 = arith.mulf %1125, %1110 : vector<1x256xf32>
    %1127 = vector.broadcast %1124 : f32 to vector<1x256xf32>
    %1128 = arith.mulf %1127, %1111 : vector<1x256xf32>
    %1129 = arith.addf %1126, %1128 : vector<1x256xf32>
    %cst_306 = arith.constant 0.000000e+00 : f32
    %1130 = vector.broadcast %cst_306 : f32 to vector<1x256xf32>
    %1131 = arith.select %1122, %1129, %1130 : vector<1x256xi1>, vector<1x256xf32>
    %1132 = arith.addf %1109, %1131 : vector<1x256xf32>
    %c205_i32 = arith.constant 205 : i32
    %1133 = tpu.dynamic_rotate %26 by %c205_i32 dim 1 : vector<1x256xf32>, i32 -> vector<1x256xf32>
    %c205_i32_307 = arith.constant 205 : i32
    %1134 = tpu.dynamic_rotate %27 by %c205_i32_307 dim 1 : vector<1x256xf32>, i32 -> vector<1x256xf32>
    %c-3_i32_308 = arith.constant -3 : i32
    %1135 = vector.broadcast %c-3_i32_308 : i32 to vector<1x256xi32>
    %1136 = arith.cmpi sge, %28, %1135 : vector<1x256xi32>
    %c13_i32_309 = arith.constant 13 : i32
    %1137 = vector.broadcast %c13_i32_309 : i32 to vector<1x256xi32>
    %1138 = arith.cmpi slt, %28, %1137 : vector<1x256xi32>
    %1139 = arith.andi %1136, %1138 : vector<1x256xi1>
    %c-3_i32_310 = arith.constant -3 : i32
    %1140 = vector.broadcast %c-3_i32_310 : i32 to vector<1x256xi32>
    %1141 = arith.cmpi sge, %29, %1140 : vector<1x256xi32>
    %1142 = arith.andi %1139, %1141 : vector<1x256xi1>
    %c13_i32_311 = arith.constant 13 : i32
    %1143 = vector.broadcast %c13_i32_311 : i32 to vector<1x256xi32>
    %1144 = arith.cmpi slt, %29, %1143 : vector<1x256xi32>
    %1145 = arith.andi %1142, %1144 : vector<1x256xi1>
    %c48 = arith.constant 48 : index
    %1146 = memref.load %arg4[%c48] : memref<98xf32, #tpu.memory_space<smem>>
    %c97 = arith.constant 97 : index
    %1147 = memref.load %arg4[%c97] : memref<98xf32, #tpu.memory_space<smem>>
    %1148 = vector.broadcast %1146 : f32 to vector<1x256xf32>
    %1149 = arith.mulf %1148, %1133 : vector<1x256xf32>
    %1150 = vector.broadcast %1147 : f32 to vector<1x256xf32>
    %1151 = arith.mulf %1150, %1134 : vector<1x256xf32>
    %1152 = arith.addf %1149, %1151 : vector<1x256xf32>
    %cst_312 = arith.constant 0.000000e+00 : f32
    %1153 = vector.broadcast %cst_312 : f32 to vector<1x256xf32>
    %1154 = arith.select %1145, %1152, %1153 : vector<1x256xi1>, vector<1x256xf32>
    %1155 = arith.addf %1132, %1154 : vector<1x256xf32>
    %1156 = arith.negf %1155 : vector<1x256xf32>
    %1157 = math.exp %1156 : vector<1x256xf32>
    %cst_313 = arith.constant 1.000000e+00 : f32
    %1158 = vector.broadcast %cst_313 : f32 to vector<1x256xf32>
    %1159 = arith.addf %1158, %1157 : vector<1x256xf32>
    %1160 = arith.divf %1158, %1159 : vector<1x256xf32>
    %1161 = vector.shape_cast %1160 : vector<1x256xf32> to vector<1x1x256xf32>
    %1162 = vector.broadcast %1161 : vector<1x1x256xf32> to vector<1x32x256xf32>
    %1163 = arith.mulf %23, %1162 : vector<1x32x256xf32>
    %c0_314 = arith.constant 0 : index
    %c0_315 = arith.constant 0 : index
    %c0_316 = arith.constant 0 : index
    %1164 = vector.load %arg6[%c0_314, %c0_315, %c0_316] : memref<1x32x256xf32, #tpu.memory_space<vmem>>, vector<1x32x256xf32>
    tpu.vector_store %arg6[%c0_314, %c0_315, %c0_316], %1163 {strides = array<i32>} : memref<1x32x256xf32, #tpu.memory_space<vmem>>, vector<1x32x256xf32>,
    return
  }
  func.func @transform_0(%arg0: i32) -> (i32, i32, i32) {
    %c0_i32 = arith.constant 0 : i32
    %c0_i32_0 = arith.constant 0 : i32
    %c0_i32_1 = arith.constant 0 : i32
    return %arg0, %c0_i32, %c0_i32_0 : i32, i32, i32
  }
  func.func @transform_1(%arg0: i32) -> (i32, i32) {
    %c0_i32 = arith.constant 0 : i32
    %c0_i32_0 = arith.constant 0 : i32
    %c0_i32_1 = arith.constant 0 : i32
    return %c0_i32, %c0_i32_0 : i32, i32
  }
  func.func @transform_2(%arg0: i32) -> (i32, i32) {
    %c0_i32 = arith.constant 0 : i32
    %c0_i32_0 = arith.constant 0 : i32
    %c0_i32_1 = arith.constant 0 : i32
    return %c0_i32, %c0_i32_0 : i32, i32
  }
  func.func @transform_3(%arg0: i32) -> i32 {
    %c0_i32 = arith.constant 0 : i32
    %c0_i32_0 = arith.constant 0 : i32
    return %c0_i32 : i32
  }
  func.func @transform_4(%arg0: i32) -> (i32, i32) {
    %c0_i32 = arith.constant 0 : i32
    %c0_i32_0 = arith.constant 0 : i32
    %c0_i32_1 = arith.constant 0 : i32
    return %c0_i32, %c0_i32_0 : i32, i32
  }
  func.func @transform_5(%arg0: i32) -> (i32, i32, i32) {
    %c0_i32 = arith.constant 0 : i32
    %c0_i32_0 = arith.constant 0 : i32
    %c0_i32_1 = arith.constant 0 : i32
    return %arg0, %c0_i32, %c0_i32_0 : i32, i32, i32
  }
}

</mosaic_0001>

<bundles_post_ra>
// kernel: tpu_custom_call.1
= control target key start
LH: loop header
LB: loop body
LE: loop exit
PB: predicated region body
PF: predicated region fallthrough
CT: control target
= control target key end

     0   :  { %s6830_s0 = inlined_call_operand.hbm [shape: f32[2,32,256], index: 0, kind: input, shape index: {}]   ;;  %s6831_s1 = inlined_call_operand.vmem [shape: f32[32,2], index: 1, kind: input, shape index: {}]   ;;  %s6832_s2 = inlined_call_operand.vmem [shape: f32[2,32], index: 2, kind: input, shape index: {}]   ;;  %s6833_s3 = inlined_call_operand.vmem [shape: f32[98], index: 3, kind: input, shape index: {}]   ;;  %s6834_s4 = inlined_call_operand.vmem [shape: s32[2,256], index: 4, kind: input, shape index: {}]   ;;  %s6835_s5 = inlined_call_operand.hbm [shape: f32[2,32,256], index: 5, kind: output, shape index: {}]  }
   0x1   :  { %7038 = sst [smem:[#allocation94_spill]] %s6830_s0 }
   0x2   :  { %7039 = sst [smem:[#allocation95_spill]] %s6831_s1 }
   0x3   :  { %7040 = sst [smem:[#allocation96_spill]] %s6832_s2 }
   0x4   :  { %7041 = sst [smem:[#allocation97_spill]] %s6833_s3 }
   0x5   :  { %7042 = sst [smem:[#allocation98_spill]] %s6834_s4 }
   0x6   :  { %7043 = sst [smem:[#allocation99_spill]] %s6835_s5 }
   0x7   :  { %10 = vsyncpa [#allocation3], 0 }
   0x8   :  { %12 = vsyncpa [#allocation3 + $0x1], 0 }
   0x9   :  { %13 = vsyncpa [#allocation5], 0 }
   0xa   :  { %14 = vsyncpa [#allocation4], 0 }
   0xb   :  { %16 = vsyncpa [#allocation4 + $0x1], 0  ;;  %s3594_s18 = smov 0   ;;  %s3596_s19 = smov 0  }
   0xc   :  { %s3598_s20 = smov 0   ;;  %s3600_s21 = smov 0  }
   0xd LB: > { %7044 = sst [smem:[#allocation11_spill]] %s3492_s18  ;;  %s3615_s22 = sadd.s32 4294967295, %s3504_s21   ;;  %s3504_s21 = sphi %s3600_s21, %s7649_s21   ;;  %s3500_s20 = sphi %s3598_s20, %s7652_s20   ;;  %s3496_s19 = sphi %s3596_s19, %s7651_s19   ;;  %s3492_s18 = sphi %s3594_s18, %s7650_s18  }
   0xe   : > { %7045 = sst [smem:[#allocation12_spill]] %s3496_s19  ;;  %s3085_s23 = sadd.s32 4294967294, %s3504_s21  }
   0xf   : > { %7046 = sst [smem:[#allocation13_spill]] %s3500_s20  ;;  %s3619_s24 = sadd.s32 1, %s3504_s21  }
  0x10   : > { %7047 = sst [smem:[#allocation14_spill]] %s3504_s21  ;;  %s29_s25 = sadd.s32 1, %s3500_s20 }
  0x11   : > { %7048 = sst [smem:[#allocation15_spill]] %s3615_s22  ;;  %s26_s26 = ssub.s32 %s3504_s21, %s3619_s24 }
  0x12   : > { %7049 = sst [smem:[#allocation16_spill]] %s3619_s24  ;;  %p36_p0 = scmp.ne.s32.totalorder %s3500_s20, %s3496_s19 }
  0x13   : > { %p27_p1 = scmp.eq.s32.totalorder %s26_s26, 0  ;;  %p37_p2 = scmp.eq.s32.totalorder %s3504_s21, 0 }
  0x14   : > { %p42_p3 = scmp.ne.s32.totalorder %s3496_s19, %s3492_s18  ;;  %p6837_p4 = scmp.eq.s32.totalorder %s3615_s22, 0 }
  0x15   : > { %s3631_s27 = scalar_select %p27_p1, %s3500_s20, %s29_s25  }
  0x16   : > { %p3633_p5 = por %p37_p2, %p36_p0  ;;  %p3639_p6 = por %p6837_p4, %p42_p3 }
  0x17   : > { %7050 = sst [smem:[#allocation17_spill]] %s3631_s27  ;;  %p150_p7 = scmp.eq.s32.totalorder %s3615_s22, 1 }
  0x18   : > { %s7052_s29 = scalar_select %p3639_p6, 1, 0 }
  0x19   : > { %p156_p8 = scmp.eq.s32.totalorder %s3085_s23, 1  ;;  %p3086_p9 = scmp.ge.s32.totalorder %s3504_s21, 1 }
  0x1a   : > { %p163_p10 = scmp.lt.s32.totalorder %s3504_s21, 3  ;;  %p3646_p11 = por %p150_p7, %p36_p0 }
  0x1b   : > { %p3650_p12 = por %p156_p8, %p42_p3  ;;  %s7058_s3 = sld [smem:[#allocation97_spill]] }
  0x1c   : > { %s7053_s30 = scalar_select %p3646_p11, 1, 0 }
  0x1d   : > { %s7055_s6 = scalar_select %p3650_p12, 1, 0 }
  0x1e   : > { %7054 = sst [smem:[#allocation18_spill]] %s7053_s30  ;;  %p3654_p13 = pnand %p3086_p9, %p163_p10 }
  0x1f   : > { %7056 = sst [smem:[#allocation19_spill]] %s7055_s6  ;;  %p3289_p2 = scmp.lt.s32.totalorder %s3504_s21, 2 }
  0x20   : > { %p3276_p1 = pneg %p3654_p13  ;;  %s196_s12 = sand.u32 1, %s3500_s20  }
  0x21   : > { %s182_s10 = sshll.u32 %s7058_s3, 4  ;;  %p3674_p3 = pnand %p3289_p2, %p3633_p5  ;;  %s183_s10 = int_to_ptr.vmem [resolvable:$true] %s182_s10 }
  0x22   : > { %p3667_p7 = pnand %p3276_p1, %p6837_p4  ;;  %s3089_s14 = sshll.u32 %s196_s12, 6 }
  0x23   : > { %s3389_s15 = scalar_lea.vmem %s183_s10, 16  ;;  %p3397_p12 = scmp.lt.s32.totalorder %s183_s10, %s183_s10 }
  0x24   : > { %p3390_p8 = scmp.ne.s32.totalorder %s183_s10, %s3389_s15  ;;  %p3391_p9 = pneg %p3667_p7 }
  0x25   : > { %p3398_p11 = scmp.lt.s32.totalorder %s3389_s15, %s3389_s15 }
  0x26   : > { %p3392_p10 = pnand %p3391_p9, %p3390_p8 }
  0x27   : > { %p3399_p1 = por %p3398_p11, %p3397_p12 }
  0x28   : > { %p3393_p0 = pneg %p3392_p10 }
  0x2a   : > { %p3400_p4 = pnand %p3399_p1, %p3393_p0 }
  0x2c   : > { %3403 = shalt.err (!%p3400_p4)
}
  0x2d   : > { %s3506_s16 = smov [#allocation6]   ;;  %s3207_s17 = sshll.u32 %s3504_s21, 10 }
  0x2e   : > { %3279 = dma.vmem_to_smem (!%p3667_p7), %s183_s10, 16, %s3506_s16, [#allocation5]  }
  0x2f   : > { %s200_s23 = scalar_lea.vmem [#allocation2], %s3089_s14  ;;  %s7061_s0 = sld [smem:[#allocation94_spill]] }
  0x30   : > { %s207_s25 = sshll.u32 %s200_s23, 4  ;;  %s3690_s9 = scalar_lea.sflag [#allocation3], %s196_s12  ;;  %s3688_s25 = int_to_ptr.vmem [resolvable:$true] %s207_s25 }
  0x31   : > { %p3406_p5 = pneg %p3674_p3 }
  0x35   : > { %s3686_s8 = scalar_lea.hbm %s7061_s0, %s3207_s17  ;;  %s3409_s15 = scalar_lea.hbm %s7061_s0, 2048 }
  0x36   : > { %s3404_s11 = scalar_lea.hbm %s3686_s8, 1024  ;;  %p3410_p0 = scmp.lt.u32.totalorder %s3686_s8, %s7061_s0 }
  0x37   : > { %p3405_p4 = scmp.ne.s32.totalorder %s3686_s8, %s3404_s11  ;;  %p3411_p2 = scmp.lt.u32.totalorder %s3409_s15, %s3404_s11 }
  0x38   : > { %p3413_p8 = scmp.lt.u32.totalorder %s3404_s11, %s3686_s8 }
  0x39   : > { %p3407_p11 = pnand %p3406_p5, %p3405_p4  ;;  %p3412_p7 = por %p3411_p2, %p3410_p0 }
  0x3b   : > { %p3408_p12 = pneg %p3407_p11  ;;  %p3414_p9 = por %p3413_p8, %p3412_p7 }
  0x3d   : > { %p3415_p10 = pnand %p3414_p9, %p3408_p12 }
  0x3f   : > { %3418 = shalt.err (!%p3415_p10)
}
  0x40   : > { %s3419_s12 = scalar_lea.vmem %s3688_s25, 1024  ;;  %s3507_s23 = smov [#allocation2]  }
  0x41   : > { %p3420_p1 = scmp.ne.s32.totalorder %s3688_s25, %s3419_s12  ;;  %s3424_s26 = sshll.u32 %s3507_s23, 4  ;;  %s3425_s26 = int_to_ptr.vmem [resolvable:$false] %s3424_s26 }
  0x42   : > { %s3426_s28 = scalar_lea.vmem %s3425_s26, 2048  ;;  %p3427_p6 = scmp.lt.s32.totalorder %s3688_s25, %s3425_s26 }
  0x43   : > { %p3422_p4 = pnand %p3420_p1, %p3406_p5  ;;  %p3428_p0 = scmp.lt.s32.totalorder %s3426_s28, %s3419_s12 }
  0x45   : > { %p3423_p11 = pneg %p3422_p4  ;;  %p3429_p2 = por %p3428_p0, %p3427_p6 }
  0x47   : > { %p3430_p7 = pnand %p3429_p2, %p3423_p11 }
  0x49   : > { %3433 = shalt.err (!%p3430_p7)
}
  0x4a   : > { %s3508_s11 = smov 256   ;;  %s3509_s10 = smov 16  }
  0x4b   : > { %3283 = dma.hbm_to_vmem [thread:$0]  (!%p3674_p3), %s3686_s8, 1024, %s3688_s25, %s3690_s9, %s3508_s11, %s3508_s11, %s3509_s10  }
  0x4c   : > { %219 = sbr.rel (%p3654_p13) target bundleno = 1458 (0x5b2), region = 40 }
  0x53   : > { %s3721_s14 = sand.u32 1, %s3496_s19   ;;  %p7063_p6 = scmp.ne.s32.totalorder %s7052_s29, 0 }
  0x54   : > { %7062 = sst [smem:[#allocation20_spill]] %s3721_s14  ;;  %s6839_s15 = sshll.u32 %s3721_s14, 6 }
  0x55   : > { %s222_s16 = scalar_lea.sflag [#allocation3], %s3721_s14  ;;  %s225_s17 = scalar_lea.vmem [#allocation2], %s6839_s15 }
  0x56   : > { %3479 = dma.done.wait (%p7063_p6), %s222_s16, 1024  }
  0x57   : > { %3481 = vsyncadd (%p7063_p6), %s222_s16, 4294966272  ;;  %p7064_p3 = scmp.eq.s32.totalorder %s3615_s22, 0 }
  0x59   : > { %3483 = dma.done.wait (%p7064_p3), [#allocation5], 16   ;;  %p7065_p13 = pmov %p7064_p3 }
  0x5b   : > { %3485 = vsyncadd (%p7065_p13), [#allocation5], 4294967280 }
  0x5c   : > { %234 = sfence }
  0x5d   : > { %v3735_v0 = vld [vmem:[%s225_s17 + $0x20] sm:$0xff]  ;;  %v3737_v1 = vld [vmem:[%s225_s17 + $0x28] sm:$0xff]  ;;  %v3745_v5 = vld [vmem:[%s225_s17 + $0x30] sm:$0xff]  ;;  %s7066_s1 = sld [smem:[#allocation95_spill]]  ;;  %v3510_v19 = vmov 0.0|0.0   ;;  %vm3511_vm0 = vmmov 0   ;;  %v303_v24 = vlaneseq }
  0x5e   : > { %v3739_v2 = vld [vmem:[%s225_s17] sm:$0xff]  ;;  %v271_v3 = vadd.f32 %v3737_v1, %v3735_v0  ;;  %v3743_v4 = vld [vmem:[%s225_s17 + $0x8] sm:$0xff]  ;;  %v3747_v6 = vld [vmem:[%s225_s17 + $0x38] sm:$0xff]  ;;  %v288_v15 = vmax.f32 %v3735_v0, %v3737_v1  ;;  %3255 = vmatprep.subr.bf16.mxu0 %v3510_v19  ;;  %3261 = vmatprep.subr.bf16.mxu1 %v3510_v19  ;;  %v3512_v23 = vmov 0.0   ;;  %vm314_vm1 = vcmask 130112   ;;  %s7068_s2 = sld [smem:[#allocation96_spill]] }
  0x5f   : > { %v265_v7 = vadd.f32 %v3743_v4, %v3739_v2  ;;  %v3751_v8 = vld [vmem:[%s225_s17 + $0x10] sm:$0xff]  ;;  %v3753_v9 = vld [vmem:[%s225_s17 + $0x18] sm:$0xff]  ;;  %v274_v10 = vadd.f32 %v3747_v6, %v3745_v5  ;;  %v282_v13 = vmax.f32 %v3739_v2, %v3743_v4  ;;  %v291_v14 = vmax.f32 %v3745_v5, %v3747_v6  ;;  %3231 = vmatprep.mubr.msk.f32.mxu0 %vm3511_vm0, %v3512_v23  ;;  %s3513_s11 = smov 51   ;;  %s3514_s10 = smov 50  }
  0x60   : > { %272 = vadd.xlane.f32.xlu1 %v271_v3  ;;  %v268_v11 = vadd.f32 %v3753_v9, %v3751_v8  ;;  %v285_v12 = vmax.f32 %v3751_v8, %v3753_v9  ;;  %3242 = vmatprep.mubr.msk.f32.mxu1 %vm3511_vm0, %v3512_v23  ;;  %v3781_v25 = vand.u32 127, %v303_v24  ;;  %v3783_v26 = vshrl.u32 %v303_v24, 7  ;;  %s3515_s16 = smov 49   ;;  %s3516_s17 = smov 48  }
  0x61   : > { %266 = vadd.xlane.f32.xlu0 %v265_v7  ;;  %vm321_vm2 = vcmask 195712   ;;  %vm328_vm3 = vcmask 261312   ;;  %vm330_vm4 = vcmask 261120   ;;  %vm504_vm5 = vcmask 1041408   ;;  %s3517_s29 = smov 47   ;;  %s3518_s7 = smov 46  }
  0x62   : > { %7067 = vst [vmem:[#allocation21_spill] sm:$0xff] %v3783_v26  ;;  %v323_v28 = vadd.s32 4294967272, %v3781_v25  ;;  %v309_v29 = vadd.s32 4294967288, %v3781_v25  ;;  %v316_v30 = vadd.s32 4294967280, %v3781_v25  ;;  %v307_v32 = vsub.s32 %v3781_v25, %v3783_v26  ;;  %s3519_s13 = smov 45   ;;  %s3520_s25 = smov 35  }
  0x63   : > { %v294_v16 = vld [vmem:[%s7066_s1] sm:$0xff]  ;;  %v295_v17 = vld [vmem:[%s7066_s1 + $0x8] sm:$0xff]  ;;  %v296_v20 = vld [vmem:[%s7066_s1 + $0x10] sm:$0xff]  ;;  %vm500_vm6 = vcmask 15360   ;;  %s3521_s8 = smov 34   ;;  %s3522_s9 = smov 33  }
  0x64   : > { %275 = vadd.xlane.f32.xlu1 %v274_v10  ;;  %v3256_v18 = vpack.c.bf16 %v295_v17, %v294_v16  ;;  %v297_v21 = vld [vmem:[%s7066_s1 + $0x18] sm:$0xff]  ;;  %v326_v34 = vsub.s32 %v323_v28, %v3783_v26  ;;  %v312_v36 = vsub.s32 %v309_v29, %v3783_v26  ;;  %v319_v37 = vsub.s32 %v316_v30, %v3783_v26  ;;  %v298_v60 = vld [vmem:[%s7068_s2] sm:$0x3]  ;;  %s3523_s12 = smov 32   ;;  %s6840_s23 = smov 31  }
  0x65   : > { %269 = vadd.xlane.f32.xlu0 %v268_v11  ;;  %v3259_v22 = vpack.c.bf16 %v297_v21, %v296_v20  ;;  %s6842_s26 = smov 30   ;;  %s6844_s28 = smov 29   ;;  %vm730_vm12 = vcmp.lt.s32.totalorder %v3781_v25, 51  ;;  %vm780_vm13 = vcmp.lt.s32.totalorder %v3781_v25, 50  ;;  %vm827_vm14 = vcmp.lt.s32.totalorder %v3781_v25, 49 }
  0x66   : > { %3257 = vmatpush3.bf16.msra.mxu0 %v3256_v18  ;;  %3263 = vmatpush3.bf16.msra.mxu1 %v3256_v18  ;;  %s6846_s15 = smov 19   ;;  %s7135_s4 = sld [smem:[#allocation98_spill]]  ;;  %vm874_vm15 = vcmp.lt.s32.totalorder %v3781_v25, 48 }
  0x67   : > { %3258 = vmatprep.subr.bf16.mxu0 %v3510_v19  ;;  %3264 = vmatprep.subr.bf16.mxu1 %v3510_v19  ;;  %v6904_v19 = vsub.s32 0, %v3783_v26  ;;  %s4336_s0 = sld [smem:[#allocation6 + $0x3c]]  ;;  %s4338_s1 = sld [smem:[#allocation6 + $0x3d]] }
  0x68   : > { %286 = vmax.xlane.f32.xlu1 %v285_v12  ;;  %s4355_s27 = sld [smem:[#allocation6 + $0x41]]  ;;  %s4360_s20 = sld [smem:[#allocation6 + $0x42]] }
  0x69   : > { %283 = vmax.xlane.f32.xlu0 %v282_v13  ;;  %s4362_s19 = sld [smem:[#allocation6 + $0x43]]  ;;  %s7141_s24 = smov 127  }
  0x6a   : > { %3260 = vmatpush3.bf16.msra.mxu0 %v3259_v22  ;;  %3266 = vmatpush3.bf16.msra.mxu1 %v3259_v22  ;;  %s4370_s2 = sld [smem:[#allocation6 + $0x44]]  ;;  %s4372_s3 = sld [smem:[#allocation6 + $0x45]] }
  0x6b   : > { %3250 = vmatprep.subr.mxu0 %v3512_v23  ;;  %3245 = vmatprep.subr.mxu1 %v3512_v23  ;;  %s4374_s21 = sld [smem:[#allocation6 + $0x46]]  ;;  %s4376_s6 = sld [smem:[#allocation6 + $0x47]] }
  0x6c   : > { %292 = vmax.xlane.f32.xlu1 %v291_v14  ;;  %s4384_s18 = sld [smem:[#allocation6 + $0x4a]]  ;;  %s4397_s30 = sld [smem:[#allocation6 + $0x4c]] }
  0x6d   : > { %289 = vmax.xlane.f32.xlu0 %v288_v15  ;;  %7137 = sst [smem:[#allocation76_spill]] %s4336_s0  ;;  %s7150_s5 = smov 126  }
  0x6e   : > { %7138 = sst [smem:[#allocation77_spill]] %s4338_s1  ;;  %s4408_s14 = sld [smem:[#allocation6 + $0x4d]] }
  0x6f   : > { %s4410_s22 = sld [smem:[#allocation6 + $0x4e]]  ;;  %s4452_s1 = sld [smem:[#allocation6 + $0x53]] }
  0x70   : > { %7142 = sst [smem:[#allocation80_spill]] %s4370_s2  ;;  %s4454_s0 = sld [smem:[#allocation6]] }
  0x71   : > { %7143 = sst [smem:[#allocation81_spill]] %s4372_s3  ;;  %s4481_s2 = sld [smem:[#allocation6 + $0x55]] }
  0x72   : > { %7149 = sst [smem:[#allocation85_spill]] %s4397_s30  ;;  %s7161_s3 = smov 115  }
  0x73   : > { %s4503_s30 = sld [smem:[#allocation6 + $0x1]] }
  0xed   : > { %v273_v27 = vpop.xlane.xlu1 %272 }
  0xee   : > { %v267_v31 = vpop.xlane.xlu0 %266  ;;  %v280_v38 = vmul.f32 0.00390625, %v273_v27 }
  0xef   : > { %v278_v33 = vmul.f32 0.00390625, %v267_v31 }
  0xf0   : > { %v320_v46 = vrot.slane %v280_v38, %v319_v37 }
  0xf1   : > { %v276_v35 = vpop.xlane.xlu1 %275  ;;  %v308_v42 = vrot.slane %v278_v33, %v307_v32 }
  0xf2   : > { %v281_v39 = vmul.f32 0.00390625, %v276_v35  ;;  %v270_v40 = vpop.xlane.xlu0 %269 }
  0xf3   : > { %v279_v41 = vmul.f32 0.00390625, %v270_v40 }
  0xf4   : > { %v327_v43 = vrot.slane %v281_v39, %v326_v34 }
  0xf5   : > { %v313_v44 = vrot.slane %v279_v41, %v312_v36  ;;  %v287_v45 = vpop.xlane.xlu1 %286 }
  0xf6   : > { %v284_v47 = vpop.xlane.xlu0 %283  ;;  %v415_v49 = vrot.slane %v287_v45, %v312_v36 }
  0xf7   : > { %v315_v48 = vsel %vm314_vm1, %v313_v44, %v308_v42  ;;  %v411_v50 = vrot.slane %v284_v47, %v307_v32 }
  0xf8   : > { %v322_v51 = vsel %vm321_vm2, %v320_v46, %v315_v48 }
  0xf9   : > { %v329_v52 = vsel %vm328_vm3, %v327_v43, %v322_v51  ;;  %v293_v53 = vpop.xlane.xlu1 %292  ;;  %v416_v57 = vsel %vm314_vm1, %v415_v49, %v411_v50  ;;  %vm921_vm1 = vcmp.lt.s32.totalorder %v3781_v25, 47 }
  0xfa   : > { %3232 = vmatmul.mubr.msk.f32.vlgmr.msra.gmra.mrb[0].mxu0 %vm330_vm4, %v329_v52  ;;  %v290_v54 = vpop.xlane.xlu0 %289  ;;  %v425_v55 = vrot.slane %v293_v53, %v326_v34 }
  0xfb   : > { %v420_v56 = vrot.slane %v290_v54, %v319_v37  ;;  %3252 = vmatprep.mubr.msk.f32.mxu0 %vm3511_vm0, %v3512_v23  ;;  %3251 = vmatpush3.msk.msra.mxu0 %vm504_vm5, %v298_v60 }
  0xfd   : > { %v421_v58 = vsel %vm321_vm2, %v420_v56, %v416_v57 }
  0xfe   : > { %v426_v59 = vsel %vm328_vm3, %v425_v55, %v421_v58  ;;  %vm968_vm3 = vcmp.lt.s32.totalorder %v3781_v25, 46 }
  0xff   : > { %3243 = vmatmul.mubr.msk.f32.vlgmr.msra.gmra.mrb[0].mxu1 %vm330_vm4, %v426_v59  ;;  %vm7012_vm4 = vcmp.lt.s32.totalorder %v3781_v25, 45 }
 0x100   : > { %3247 = vmatprep.mubr.msk.f32.mxu1 %vm3511_vm0, %v3512_v23  ;;  %3246 = vmatpush3.msk.msra.mxu1 %vm504_vm5, %v298_v60  ;;  %vm7014_vm5 = vcmp.lt.s32.totalorder %v3781_v25, 35 }
 0x1cd   : > { %v399_v61 = vpop.f32.mrb[0].mxu0 }
 0x1ce   : > { %v403_v62 = vmax.f32 %v399_v61, 0.0  ;;  %v3233_v63 = vpop.f32.mrb[1].mxu0 }
 0x1d0   : > { %3253 = vmatmul.mubr.msk.f32.vlgmr.msra.gmra.mrb[2].mxu0 %vm500_vm6, %v403_v62 }
 0x1d2   : > { %v495_v3 = vpop.f32.mrb[0].mxu1 }
 0x1d3   : > { %v499_v7 = vmax.f32 %v495_v3, 0.0  ;;  %v3244_v10 = vpop.f32.mrb[1].mxu1 }
 0x1d5   : > { %3248 = vmatmul.mubr.msk.f32.vlgmr.msra.gmra.mrb[2].mxu1 %vm500_vm6, %v499_v7 }
 0x2a3   : > { %v647_v11 = vpop.f32.mrb[2].mxu0 }
 0x2a4   : > { %v3254_v12 = vpop.f32.mrb[3].mxu0 }
 0x2a8   : > { %v574_v13 = vpop.f32.mrb[2].mxu1 }
 0x2a9   : > { %v648_v14 = vadd.f32 %v647_v11, %v574_v13  ;;  %v3249_v15 = vpop.f32.mrb[3].mxu1 }
 0x2ab   : > { %v3102_v16 = vmul.f32 -1.442695, %v648_v14 }
 0x2ad   : > { %3380 = vpow2.f32 %v3102_v16 }
 0x2b7   : > { %v3381_v17 = vpop.eup %3380 }
 0x2b8   : > { %v654_v18 = vadd.f32 1.0, %v3381_v17 }
 0x2ba   : > { %3382 = vrcp.f32 %v654_v18 }
 0x2c4   : > { %v3383_v20 = vpop.eup %3382 }
 0x2c5   : > { %v660_v21 = vrot.slane %v3383_v20, %v6904_v19 }
 0x2c7   : > { %666 = vbcast.lane.b32.xlu1 %v660_v21, 264  ;;  %662 = vbcast.lane.b32.xlu0 %v660_v21, 256 }
 0x2cb   : > { %670 = vbcast.lane.b32.xlu1 %v660_v21, 272 }
 0x2cf   : > { %674 = vbcast.lane.b32.xlu1 %v660_v21, 280 }
 0x339   : > { %v667_v22 = vpop.permute.xlu1 %666  ;;  %v663_v24 = vpop.permute.xlu0 %662 }
 0x33a   : > { %v3812_v29 = vmul.f32 %v667_v22, %v3751_v8  ;;  %v3815_v30 = vmul.f32 %v667_v22, %v3753_v9  ;;  %v3818_v32 = vmul.f32 %v663_v24, %v3739_v2  ;;  %v3821_v33 = vmul.f32 %v663_v24, %v3743_v4 }
 0x33c   : > { %7071 = vst [vmem:[#allocation24_spill] sm:$0xff] %v3812_v29  ;;  %7072 = vst [vmem:[#allocation25_spill] sm:$0xff] %v3815_v30  ;;  %v684_v10 = vadd.f32 %v3812_v29, %v3818_v32  ;;  %v693_v11 = vadd.f32 %v3815_v30, %v3821_v33 }
 0x33d   : > { %v671_v23 = vpop.permute.xlu1 %670  ;;  %7073 = vst [vmem:[#allocation26_spill] sm:$0xff] %v3818_v32  ;;  %7074 = vst [vmem:[#allocation27_spill] sm:$0xff] %v3821_v33 }
 0x33e   : > { %v3806_v27 = vmul.f32 %v671_v23, %v3735_v0  ;;  %v3809_v28 = vmul.f32 %v671_v23, %v3737_v1 }
 0x340   : > { %7069 = vst [vmem:[#allocation22_spill] sm:$0xff] %v3806_v27  ;;  %7070 = vst [vmem:[#allocation23_spill] sm:$0xff] %v3809_v28  ;;  %v705_v1 = vmax.f32 %v3818_v32, %v3806_v27  ;;  %v714_v8 = vmax.f32 %v3821_v33, %v3809_v28  ;;  %v685_v14 = vadd.f32 %v684_v10, %v3806_v27 }
 0x341   : > { %v675_v31 = vpop.permute.xlu1 %674  ;;  %v694_v15 = vadd.f32 %v693_v11, %v3809_v28 }
 0x342   : > { %v3824_v34 = vmul.f32 %v675_v31, %v3745_v5  ;;  %v3827_v0 = vmul.f32 %v675_v31, %v3747_v6 }
 0x344   : > { %7075 = vst [vmem:[#allocation28_spill] sm:$0xff] %v3824_v34  ;;  %7076 = vst [vmem:[#allocation29_spill] sm:$0xff] %v3827_v0  ;;  %v706_v9 = vmax.f32 %v3812_v29, %v3824_v34  ;;  %v715_v2 = vmax.f32 %v3815_v30, %v3827_v0  ;;  %v686_v16 = vadd.f32 %v685_v14, %v3824_v34 }
 0x345   : > { %v695_v17 = vadd.f32 %v694_v15, %v3827_v0 }
 0x346   : > { %v707_v4 = vmax.f32 %v705_v1, %v706_v9  ;;  %v716_v35 = vmax.f32 %v714_v8, %v715_v2  ;;  %v687_v21 = vrot.slane %v686_v16, 4 }
 0x347   : > { %v696_v22 = vrot.slane %v695_v17, 4 }
 0x348   : > { %v708_v36 = vrot.slane %v707_v4, 4  ;;  %v717_v5 = vrot.slane %v716_v35, 4  ;;  %v688_v31 = vadd.f32 %v687_v21, %v686_v16 }
 0x349   : > { %v697_v1 = vadd.f32 %v696_v22, %v695_v17 }
 0x34a   : > { %v709_v37 = vmax.f32 %v707_v4, %v708_v36  ;;  %v718_v38 = vmax.f32 %v716_v35, %v717_v5  ;;  %v689_v2 = vrot.slane %v688_v31, 2 }
 0x34b   : > { %v698_v4 = vrot.slane %v697_v1, 2 }
 0x34c   : > { %v710_v6 = vrot.slane %v709_v37, 2  ;;  %v719_v39 = vrot.slane %v718_v38, 2  ;;  %v690_v5 = vadd.f32 %v689_v2, %v688_v31 }
 0x34e   : > { %v711_v40 = vmax.f32 %v709_v37, %v710_v6  ;;  %v720_v41 = vmax.f32 %v718_v38, %v719_v39  ;;  %v699_v37 = vadd.f32 %v698_v4, %v697_v1  ;;  %v691_v39 = vrot.slane %v690_v5, 1 }
 0x350   : > { %v712_v42 = vrot.slane %v711_v40, 1  ;;  %v721_v43 = vrot.slane %v720_v41, 1 }
 0x352   : > { %v3837_v44 = vmax.f32 %v711_v40, %v712_v42  ;;  %v3839_v45 = vmax.f32 %v720_v41, %v721_v43  ;;  %v700_v40 = vrot.slane %v699_v37, 1  ;;  %v692_v43 = vadd.f32 %v691_v39, %v690_v5 }
 0x354   : > { %7077 = vst [vmem:[#allocation30_spill] sm:$0xff] %v3837_v44  ;;  %7078 = vst [vmem:[#allocation31_spill] sm:$0xff] %v3839_v45  ;;  %735 = vrot.lane.b32.xlu1 %v3839_v45, %s3513_s11  ;;  %733 = vrot.lane.b32.xlu0 %v3837_v44, %s3513_s11  ;;  %v701_v10 = vadd.f32 %v700_v40, %v699_v37  ;;  %v4109_v15 = vmul.f32 0.03125, %v692_v43 }
 0x356   : > { %v4111_v16 = vmul.f32 0.03125, %v701_v10 }
 0x358   : > { %785 = vrot.lane.b32.xlu1 %v3839_v45, %s3514_s10  ;;  %783 = vrot.lane.b32.xlu0 %v3837_v44, %s3514_s10 }
 0x35c   : > { %832 = vrot.lane.b32.xlu1 %v3839_v45, %s3515_s16  ;;  %830 = vrot.lane.b32.xlu0 %v3837_v44, %s3515_s16 }
 0x360   : > { %879 = vrot.lane.b32.xlu1 %v3839_v45, %s3516_s17  ;;  %877 = vrot.lane.b32.xlu0 %v3837_v44, %s3516_s17 }
 0x364   : > { %926 = vrot.lane.b32.xlu1 %v3839_v45, %s3517_s29  ;;  %924 = vrot.lane.b32.xlu0 %v3837_v44, %s3517_s29 }
 0x368   : > { %973 = vrot.lane.b32.xlu1 %v3839_v45, %s3518_s7  ;;  %971 = vrot.lane.b32.xlu0 %v3837_v44, %s3518_s7 }
 0x36c   : > { %1020 = vrot.lane.b32.xlu1 %v3839_v45, %s3519_s13  ;;  %1018 = vrot.lane.b32.xlu0 %v3837_v44, %s3519_s13 }
 0x370   : > { %1067 = vrot.lane.b32.xlu1 %v3839_v45, %s3520_s25  ;;  %1065 = vrot.lane.b32.xlu0 %v3837_v44, %s3520_s25 }
 0x374   : > { %1115 = vrot.lane.b32.xlu1 %v3839_v45, %s3521_s8  ;;  %1113 = vrot.lane.b32.xlu0 %v3837_v44, %s3521_s8 }
 0x378   : > { %1160 = vrot.lane.b32.xlu1 %v3839_v45, %s3522_s9  ;;  %1158 = vrot.lane.b32.xlu0 %v3837_v44, %s3522_s9 }
 0x37c   : > { %1205 = vrot.lane.b32.xlu1 %v3839_v45, %s3523_s12  ;;  %1203 = vrot.lane.b32.xlu0 %v3837_v44, %s3523_s12 }
 0x380   : > { %1250 = vrot.lane.b32.xlu1 %v3839_v45, %s6840_s23  ;;  %1248 = vrot.lane.b32.xlu0 %v3837_v44, %s6840_s23  ;;  %s6848_s23 = smov 18  }
 0x384   : > { %1295 = vrot.lane.b32.xlu1 %v3839_v45, %s6842_s26  ;;  %1293 = vrot.lane.b32.xlu0 %v3837_v44, %s6842_s26  ;;  %s6850_s26 = smov 17  }
 0x388   : > { %1340 = vrot.lane.b32.xlu1 %v3839_v45, %s6844_s28  ;;  %1338 = vrot.lane.b32.xlu0 %v3837_v44, %s6844_s28  ;;  %s6852_s28 = smov 16  }
 0x38c   : > { %1385 = vrot.lane.b32.xlu1 %v3839_v45, %s6846_s15  ;;  %1383 = vrot.lane.b32.xlu0 %v3837_v44, %s6846_s15  ;;  %s6854_s15 = smov 15  }
 0x390   : > { %1433 = vrot.lane.b32.xlu1 %v3839_v45, %s6848_s23  ;;  %1431 = vrot.lane.b32.xlu0 %v3837_v44, %s6848_s23  ;;  %s6856_s23 = smov 14  }
 0x394   : > { %1478 = vrot.lane.b32.xlu1 %v3839_v45, %s6850_s26  ;;  %1476 = vrot.lane.b32.xlu0 %v3837_v44, %s6850_s26  ;;  %s6858_s26 = smov 13  }
 0x398   : > { %1523 = vrot.lane.b32.xlu1 %v3839_v45, %s6852_s28  ;;  %1521 = vrot.lane.b32.xlu0 %v3837_v44, %s6852_s28  ;;  %s6860_s28 = smov 3  }
 0x39c   : > { %1568 = vrot.lane.b32.xlu1 %v3839_v45, %s6854_s15  ;;  %1566 = vrot.lane.b32.xlu0 %v3837_v44, %s6854_s15  ;;  %s6862_s15 = smov 2  }
 0x3a0   : > { %1613 = vrot.lane.b32.xlu1 %v3839_v45, %s6856_s23  ;;  %1611 = vrot.lane.b32.xlu0 %v3837_v44, %s6856_s23  ;;  %s6864_s23 = smov 1  }
 0x3a4   : > { %1658 = vrot.lane.b32.xlu1 %v3839_v45, %s6858_s26  ;;  %1656 = vrot.lane.b32.xlu0 %v3837_v44, %s6858_s26  ;;  %s6866_s26 = smov 127  }
 0x3a8   : > { %1703 = vrot.lane.b32.xlu1 %v3839_v45, %s6860_s28  ;;  %1701 = vrot.lane.b32.xlu0 %v3837_v44, %s6860_s28  ;;  %s6868_s28 = smov 126  }
 0x3ac   : > { %1751 = vrot.lane.b32.xlu1 %v3839_v45, %s6862_s15  ;;  %1749 = vrot.lane.b32.xlu0 %v3837_v44, %s6862_s15  ;;  %s6952_s15 = smov 125  }
 0x3b0   : > { %1796 = vrot.lane.b32.xlu1 %v3839_v45, %s6864_s23  ;;  %1794 = vrot.lane.b32.xlu0 %v3837_v44, %s6864_s23  ;;  %s6870_s23 = smov 115  }
 0x3b4   : > { %1873 = vrot.lane.b32.xlu1 %v3839_v45, %s6866_s26  ;;  %1871 = vrot.lane.b32.xlu0 %v3837_v44, %s6866_s26  ;;  %s6872_s26 = smov 114  }
 0x3b8   : > { %1918 = vrot.lane.b32.xlu1 %v3839_v45, %s6868_s28  ;;  %1916 = vrot.lane.b32.xlu0 %v3837_v44, %s6868_s28  ;;  %s6874_s28 = smov 113  }
 0x3bc   : > { %1963 = vrot.lane.b32.xlu1 %v3839_v45, %s6952_s15  ;;  %1961 = vrot.lane.b32.xlu0 %v3837_v44, %s6952_s15  ;;  %s7136_s15 = smov 1  }
 0x3c0   : > { %2008 = vrot.lane.b32.xlu1 %v3839_v45, %s6870_s23  ;;  %2006 = vrot.lane.b32.xlu0 %v3837_v44, %s6870_s23  ;;  %s6876_s23 = smov 112  }
 0x3c4   : > { %2056 = vrot.lane.b32.xlu1 %v3839_v45, %s6872_s26  ;;  %2054 = vrot.lane.b32.xlu0 %v3837_v44, %s6872_s26  ;;  %s6878_s26 = smov 111  }
 0x3c6   : > { %v3957_v46 = vpop.permute.xlu1 %735  ;;  %v3959_v47 = vpop.permute.xlu0 %733 }
 0x3c8   : > { %2101 = vrot.lane.b32.xlu1 %v3839_v45, %s6874_s28  ;;  %2099 = vrot.lane.b32.xlu0 %v3837_v44, %s6874_s28  ;;  %s6880_s28 = smov 110  }
 0x3ca   : > { %v3965_v48 = vpop.permute.xlu1 %785  ;;  %v3967_v49 = vpop.permute.xlu0 %783 }
 0x3cc   : > { %2146 = vrot.lane.b32.xlu1 %v3839_v45, %s6876_s23  ;;  %2144 = vrot.lane.b32.xlu0 %v3837_v44, %s6876_s23  ;;  %s6882_s23 = smov 109  }
 0x3ce   : > { %v3973_v50 = vpop.permute.xlu1 %832  ;;  %v3975_v51 = vpop.permute.xlu0 %830 }
 0x3d0   : > { %2191 = vrot.lane.b32.xlu1 %v3839_v45, %s6878_s26  ;;  %2189 = vrot.lane.b32.xlu0 %v3837_v44, %s6878_s26  ;;  %s6884_s26 = smov 99  }
 0x3d2   : > { %v3981_v52 = vpop.permute.xlu1 %879  ;;  %v3983_v53 = vpop.permute.xlu0 %877 }
 0x3d4   : > { %2236 = vrot.lane.b32.xlu1 %v3839_v45, %s6880_s28  ;;  %2234 = vrot.lane.b32.xlu0 %v3837_v44, %s6880_s28  ;;  %s6886_s28 = smov 98  }
 0x3d6   : > { %v3989_v54 = vpop.permute.xlu1 %926  ;;  %v3991_v55 = vpop.permute.xlu0 %924 }
 0x3d8   : > { %2281 = vrot.lane.b32.xlu1 %v3839_v45, %s6882_s23  ;;  %2279 = vrot.lane.b32.xlu0 %v3837_v44, %s6882_s23  ;;  %s6950_s23 = smov 97  }
 0x3da   : > { %v3997_v56 = vpop.permute.xlu1 %973  ;;  %v3999_v57 = vpop.permute.xlu0 %971 }
 0x3dc   : > { %2326 = vrot.lane.b32.xlu1 %v3839_v45, %s6884_s26  ;;  %2324 = vrot.lane.b32.xlu0 %v3837_v44, %s6884_s26  ;;  %s6888_s26 = smov 96  }
 0x3de   : > { %v4005_v58 = vpop.permute.xlu1 %1020  ;;  %v4007_v59 = vpop.permute.xlu0 %1018 }
 0x3e0   : > { %2374 = vrot.lane.b32.xlu1 %v3839_v45, %s6886_s28  ;;  %2372 = vrot.lane.b32.xlu0 %v3837_v44, %s6886_s28  ;;  %s6890_s28 = smov 95  }
 0x3e2   : > { %v4013_v60 = vpop.permute.xlu1 %1067  ;;  %v4015_v61 = vpop.permute.xlu0 %1065 }
 0x3e4   : > { %2419 = vrot.lane.b32.xlu1 %v3839_v45, %s6950_s23  ;;  %2417 = vrot.lane.b32.xlu0 %v3837_v44, %s6950_s23  ;;  %s4330_s23 = sld [smem:[#allocation6 + $0x3b]] }
 0x3e6   : > { %v4021_v62 = vpop.permute.xlu1 %1115  ;;  %v4023_v63 = vpop.permute.xlu0 %1113 }
 0x3e8   : > { %2464 = vrot.lane.b32.xlu1 %v3839_v45, %s6888_s26  ;;  %2462 = vrot.lane.b32.xlu0 %v3837_v44, %s6888_s26  ;;  %s6892_s26 = smov 94  }
 0x3ea   : > { %v4029_v3 = vpop.permute.xlu1 %1160  ;;  %v4031_v7 = vpop.permute.xlu0 %1158 }
 0x3ec   : > { %2509 = vrot.lane.b32.xlu1 %v3839_v45, %s6890_s28  ;;  %2507 = vrot.lane.b32.xlu0 %v3837_v44, %s6890_s28  ;;  %s6894_s28 = smov 93  }
 0x3ee   : > { %v4041_v12 = vpop.permute.xlu1 %1205  ;;  %v4043_v13 = vpop.permute.xlu0 %1203 }
 0x3f0   : > { %2554 = vrot.lane.b32.xlu1 %v3839_v45, %s6892_s26  ;;  %2552 = vrot.lane.b32.xlu0 %v3837_v44, %s6892_s26  ;;  %s6896_s26 = smov 83  }
 0x3f2   : > { %v4053_v18 = vpop.permute.xlu1 %1250  ;;  %v4055_v20 = vpop.permute.xlu0 %1248 }
 0x3f4   : > { %2599 = vrot.lane.b32.xlu1 %v3839_v45, %s6894_s28  ;;  %2597 = vrot.lane.b32.xlu0 %v3837_v44, %s6894_s28  ;;  %s6898_s28 = smov 82  }
 0x3f6   : > { %v4061_v23 = vpop.permute.xlu1 %1295  ;;  %v4063_v24 = vpop.permute.xlu0 %1293 }
 0x3f8   : > { %2644 = vrot.lane.b32.xlu1 %v3839_v45, %s6896_s26  ;;  %2642 = vrot.lane.b32.xlu0 %v3837_v44, %s6896_s26  ;;  %s6900_s26 = smov 81  }
 0x3fa   : > { %v4069_v8 = vpop.permute.xlu1 %1340  ;;  %v4071_v9 = vpop.permute.xlu0 %1338 }
 0x3fc   : > { %2692 = vrot.lane.b32.xlu1 %v3839_v45, %s6898_s28  ;;  %2690 = vrot.lane.b32.xlu0 %v3837_v44, %s6898_s28  ;;  %s6902_s28 = smov 80  }
 0x3fe   : > { %v4077_v35 = vpop.permute.xlu1 %1385  ;;  %v4079_v36 = vpop.permute.xlu0 %1383 }
 0x400   : > { %2737 = vrot.lane.b32.xlu1 %v3839_v45, %s6900_s26  ;;  %2735 = vrot.lane.b32.xlu0 %v3837_v44, %s6900_s26  ;;  %s6948_s26 = smov 79  }
 0x402   : > { %v4085_v38 = vpop.permute.xlu1 %1433  ;;  %v4087_v6 = vpop.permute.xlu0 %1431 }
 0x404   : > { %2782 = vrot.lane.b32.xlu1 %v3839_v45, %s6902_s28  ;;  %2780 = vrot.lane.b32.xlu0 %v3837_v44, %s6902_s28  ;;  %s6946_s28 = smov 78  }
 0x406   : > { %v4093_v41 = vpop.permute.xlu1 %1478  ;;  %v4095_v42 = vpop.permute.xlu0 %1476 }
 0x408   : > { %2827 = vrot.lane.b32.xlu1 %v3839_v45, %s6948_s26  ;;  %2825 = vrot.lane.b32.xlu0 %v3837_v44, %s6948_s26  ;;  %s4328_s26 = sld [smem:[#allocation6 + $0x3a]] }
 0x40a   : > { %v4101_v11 = vpop.permute.xlu1 %1523  ;;  %v4103_v14 = vpop.permute.xlu0 %1521 }
 0x40c   : > { %2872 = vrot.lane.b32.xlu1 %v3839_v45, %s6946_s28  ;;  %2870 = vrot.lane.b32.xlu0 %v3837_v44, %s6946_s28  ;;  %s4340_s28 = sld [smem:[#allocation6 + $0x3e]] }
 0x40e   : > { %v4113_v17 = vpop.permute.xlu1 %1568  ;;  %v4115_v21 = vpop.permute.xlu0 %1566 }
 0x410   : > { %728 = vrot.lane.b32.xlu1 %v4111_v16, %s3513_s11  ;;  %726 = vrot.lane.b32.xlu0 %v4109_v15, %s3513_s11  ;;  %s7096_s11 = smov 31  }
 0x412   : > { %v4121_v22 = vpop.permute.xlu1 %1613  ;;  %v4123_v31 = vpop.permute.xlu0 %1611 }
 0x414   : > { %778 = vrot.lane.b32.xlu1 %v4111_v16, %s3514_s10  ;;  %776 = vrot.lane.b32.xlu0 %v4109_v15, %s3514_s10  ;;  %s7099_s10 = smov 30  }
 0x416   : > { %v4129_v1 = vpop.permute.xlu1 %1658  ;;  %v4131_v2 = vpop.permute.xlu0 %1656 }
 0x418   : > { %825 = vrot.lane.b32.xlu1 %v4111_v16, %s3515_s16  ;;  %823 = vrot.lane.b32.xlu0 %v4109_v15, %s3515_s16  ;;  %s7102_s16 = smov 29  }
 0x41a   : > { %v4137_v4 = vpop.permute.xlu1 %1703  ;;  %v4139_v5 = vpop.permute.xlu0 %1701 }
 0x41b   : > { %7079 = vst [vmem:[#allocation32_spill] sm:$0xff] %v4139_v5 }
 0x41c   : > { %872 = vrot.lane.b32.xlu1 %v4111_v16, %s3516_s17  ;;  %870 = vrot.lane.b32.xlu0 %v4109_v15, %s3516_s17  ;;  %s7105_s17 = smov 19  }
 0x41e   : > { %v4145_v37 = vpop.permute.xlu1 %1751  ;;  %v4147_v39 = vpop.permute.xlu0 %1749 }
 0x41f   : > { %7080 = vst [vmem:[#allocation33_spill] sm:$0xff] %v4145_v37  ;;  %7081 = vst [vmem:[#allocation34_spill] sm:$0xff] %v4147_v39 }
 0x420   : > { %919 = vrot.lane.b32.xlu1 %v4111_v16, %s3517_s29  ;;  %917 = vrot.lane.b32.xlu0 %v4109_v15, %s3517_s29  ;;  %s7108_s29 = smov 18  }
 0x422   : > { %v4153_v40 = vpop.permute.xlu1 %1796  ;;  %v4155_v43 = vpop.permute.xlu0 %1794 }
 0x423   : > { %7082 = vst [vmem:[#allocation35_spill] sm:$0xff] %v4153_v40  ;;  %7083 = vst [vmem:[#allocation36_spill] sm:$0xff] %v4155_v43  ;;  %v834_v43 = vsel %vm827_vm14, %v3975_v51, %v3973_v50 }
 0x424   : > { %966 = vrot.lane.b32.xlu1 %v4111_v16, %s3518_s7  ;;  %964 = vrot.lane.b32.xlu0 %v4109_v15, %s3518_s7  ;;  %s7111_s7 = smov 17  }
 0x426   : > { %v4161_v10 = vpop.permute.xlu1 %1873  ;;  %v4163_v19 = vpop.permute.xlu0 %1871 }
 0x427   : > { %7084 = vst [vmem:[#allocation37_spill] sm:$0xff] %v4161_v10  ;;  %7085 = vst [vmem:[#allocation38_spill] sm:$0xff] %v4163_v19 }
 0x428   : > { %1013 = vrot.lane.b32.xlu1 %v4111_v16, %s3519_s13  ;;  %1011 = vrot.lane.b32.xlu0 %v4109_v15, %s3519_s13  ;;  %s7114_s13 = smov 16  }
 0x42a   : > { %v4169_v0 = vpop.permute.xlu1 %1918  ;;  %v4171_v34 = vpop.permute.xlu0 %1916 }
 0x42b   : > { %7086 = vst [vmem:[#allocation39_spill] sm:$0xff] %v4169_v0  ;;  %7087 = vst [vmem:[#allocation40_spill] sm:$0xff] %v4171_v34  ;;  %v3560_v0 = vmov 1966171168  }
 0x42c   : > { %1060 = vrot.lane.b32.xlu1 %v4111_v16, %s3520_s25  ;;  %1058 = vrot.lane.b32.xlu0 %v4109_v15, %s3520_s25  ;;  %s7117_s25 = smov 15  }
 0x42e   : > { %v4177_v28 = vpop.permute.xlu1 %1963  ;;  %v4179_v27 = vpop.permute.xlu0 %1961 }
 0x42f   : > { %7088 = vst [vmem:[#allocation41_spill] sm:$0xff] %v4177_v28  ;;  %7089 = vst [vmem:[#allocation42_spill] sm:$0xff] %v4179_v27 }
 0x430   : > { %1108 = vrot.lane.b32.xlu1 %v4111_v16, %s3521_s8  ;;  %1106 = vrot.lane.b32.xlu0 %v4109_v15, %s3521_s8  ;;  %s7120_s8 = smov 14  }
 0x432   : > { %v4185_v30 = vpop.permute.xlu1 %2008  ;;  %v4187_v29 = vpop.permute.xlu0 %2006 }
 0x433   : > { %7090 = vst [vmem:[#allocation43_spill] sm:$0xff] %v4185_v30  ;;  %7091 = vst [vmem:[#allocation44_spill] sm:$0xff] %v4187_v29 }
 0x434   : > { %1153 = vrot.lane.b32.xlu1 %v4111_v16, %s3522_s9  ;;  %1151 = vrot.lane.b32.xlu0 %v4109_v15, %s3522_s9  ;;  %s3151_s9 = sld [smem:[#allocation6 + $0x18]] }
 0x436   : > { %v4193_v33 = vpop.permute.xlu1 %2056  ;;  %v4195_v32 = vpop.permute.xlu0 %2054 }
 0x437   : > { %7092 = vst [vmem:[#allocation45_spill] sm:$0xff] %v4193_v33  ;;  %7093 = vst [vmem:[#allocation46_spill] sm:$0xff] %v4195_v32 }
 0x438   : > { %1198 = vrot.lane.b32.xlu1 %v4111_v16, %s3523_s12  ;;  %1196 = vrot.lane.b32.xlu0 %v4109_v15, %s3523_s12  ;;  %s3152_s12 = sld [smem:[#allocation6 + $0x49]] }
 0x43a   : > { %v4201_v27 = vpop.permute.xlu1 %2101  ;;  %v4203_v30 = vpop.permute.xlu0 %2099 }
 0x43b   : > { %7094 = vst [vmem:[#allocation47_spill] sm:$0xff] %v4201_v27  ;;  %7095 = vst [vmem:[#allocation48_spill] sm:$0xff] %v4203_v30 }
 0x43c   : > { %1243 = vrot.lane.b32.xlu1 %v4111_v16, %s7096_s11  ;;  %1241 = vrot.lane.b32.xlu0 %v4109_v15, %s7096_s11  ;;  %s7123_s11 = smov 13  }
 0x43e   : > { %v4209_v29 = vpop.permute.xlu1 %2146  ;;  %v4211_v33 = vpop.permute.xlu0 %2144 }
 0x43f   : > { %7097 = vst [vmem:[#allocation49_spill] sm:$0xff] %v4209_v29  ;;  %7098 = vst [vmem:[#allocation50_spill] sm:$0xff] %v4211_v33 }
 0x440   : > { %1288 = vrot.lane.b32.xlu1 %v4111_v16, %s7099_s10  ;;  %1286 = vrot.lane.b32.xlu0 %v4109_v15, %s7099_s10  ;;  %s7126_s10 = smov 3  }
 0x442   : > { %v4217_v32 = vpop.permute.xlu1 %2191  ;;  %v4219_v27 = vpop.permute.xlu0 %2189 }
 0x443   : > { %7100 = vst [vmem:[#allocation51_spill] sm:$0xff] %v4217_v32  ;;  %7101 = vst [vmem:[#allocation52_spill] sm:$0xff] %v4219_v27 }
 0x444   : > { %1333 = vrot.lane.b32.xlu1 %v4111_v16, %s7102_s16  ;;  %1331 = vrot.lane.b32.xlu0 %v4109_v15, %s7102_s16  ;;  %s4293_s16 = sld [smem:[#allocation6 + $0x31]] }
 0x446   : > { %v4225_v30 = vpop.permute.xlu1 %2236  ;;  %v4227_v29 = vpop.permute.xlu0 %2234 }
 0x447   : > { %7103 = vst [vmem:[#allocation53_spill] sm:$0xff] %v4225_v30  ;;  %7104 = vst [vmem:[#allocation54_spill] sm:$0xff] %v4227_v29 }
 0x448   : > { %1378 = vrot.lane.b32.xlu1 %v4111_v16, %s7105_s17  ;;  %1376 = vrot.lane.b32.xlu0 %v4109_v15, %s7105_s17  ;;  %s4296_s17 = sld [smem:[#allocation6 + $0x32]] }
 0x44a   : > { %v4233_v33 = vpop.permute.xlu1 %2281  ;;  %v4235_v32 = vpop.permute.xlu0 %2279 }
 0x44b   : > { %7106 = vst [vmem:[#allocation55_spill] sm:$0xff] %v4233_v33  ;;  %7107 = vst [vmem:[#allocation56_spill] sm:$0xff] %v4235_v32 }
 0x44c   : > { %1426 = vrot.lane.b32.xlu1 %v4111_v16, %s7108_s29  ;;  %1424 = vrot.lane.b32.xlu0 %v4109_v15, %s7108_s29  ;;  %s4298_s29 = sld [smem:[#allocation6 + $0x33]] }
 0x44e   : > { %v4241_v27 = vpop.permute.xlu1 %2326  ;;  %v4243_v30 = vpop.permute.xlu0 %2324 }
 0x44f   : > { %7109 = vst [vmem:[#allocation57_spill] sm:$0xff] %v4241_v27  ;;  %7110 = vst [vmem:[#allocation58_spill] sm:$0xff] %v4243_v30 }
 0x450   : > { %1471 = vrot.lane.b32.xlu1 %v4111_v16, %s7111_s7  ;;  %1469 = vrot.lane.b32.xlu0 %v4109_v15, %s7111_s7  ;;  %s7129_s7 = smov 2  }
 0x452   : > { %v4249_v29 = vpop.permute.xlu1 %2374  ;;  %v4251_v33 = vpop.permute.xlu0 %2372 }
 0x453   : > { %7112 = vst [vmem:[#allocation59_spill] sm:$0xff] %v4249_v29  ;;  %7113 = vst [vmem:[#allocation60_spill] sm:$0xff] %v4251_v33  ;;  %v1836_v33 = vstv %s3151_s9  ;;  %s4311_s9 = sld [smem:[#allocation6 + $0x36]] }
 0x454   : > { %1516 = vrot.lane.b32.xlu1 %v4111_v16, %s7114_s13  ;;  %1514 = vrot.lane.b32.xlu0 %v4109_v15, %s7114_s13  ;;  %v1838_v34 = vmul.f32 %v1836_v33, %v4111_v16  ;;  %s4395_s13 = sld [smem:[#allocation6 + $0x4b]] }
 0x456   : > { %v4257_v32 = vpop.permute.xlu1 %2419  ;;  %v4259_v27 = vpop.permute.xlu0 %2417 }
 0x457   : > { %7115 = vst [vmem:[#allocation61_spill] sm:$0xff] %v4257_v32  ;;  %7116 = vst [vmem:[#allocation62_spill] sm:$0xff] %v4259_v27 }
 0x458   : > { %1561 = vrot.lane.b32.xlu1 %v4111_v16, %s7117_s25  ;;  %1559 = vrot.lane.b32.xlu0 %v4109_v15, %s7117_s25  ;;  %s4307_s25 = sld [smem:[#allocation6 + $0x34]] }
 0x459   : > { %7131 = sst [smem:[#allocation72_spill]] %s4311_s9  ;;  %s4441_s9 = sld [smem:[#allocation6 + $0x52]] }
 0x45a   : > { %v4265_v30 = vpop.permute.xlu1 %2464  ;;  %v4267_v29 = vpop.permute.xlu0 %2462 }
 0x45b   : > { %7118 = vst [vmem:[#allocation63_spill] sm:$0xff] %v4265_v30  ;;  %7119 = vst [vmem:[#allocation64_spill] sm:$0xff] %v4267_v29 }
 0x45c   : > { %1606 = vrot.lane.b32.xlu1 %v4111_v16, %s7120_s8  ;;  %1604 = vrot.lane.b32.xlu0 %v4109_v15, %s7120_s8  ;;  %s4309_s8 = sld [smem:[#allocation6 + $0x35]] }
 0x45e   : > { %v4273_v32 = vpop.permute.xlu1 %2509  ;;  %v4275_v27 = vpop.permute.xlu0 %2507 }
 0x45f   : > { %7121 = vst [vmem:[#allocation65_spill] sm:$0xff] %v4273_v32  ;;  %7122 = vst [vmem:[#allocation66_spill] sm:$0xff] %v4275_v27  ;;  %v1839_v32 = vstv %s3152_s12  ;;  %s4313_s12 = sld [smem:[#allocation6 + $0x37]] }
 0x460   : > { %1651 = vrot.lane.b32.xlu1 %v4111_v16, %s7123_s11  ;;  %1649 = vrot.lane.b32.xlu0 %v4109_v15, %s7123_s11  ;;  %s4319_s11 = sld [smem:[#allocation6 + $0x38]] }
 0x462   : > { %v4281_v30 = vpop.permute.xlu1 %2554  ;;  %v4283_v29 = vpop.permute.xlu0 %2552  ;;  %7130 = sst [smem:[#allocation71_spill]] %s4309_s8  ;;  %s7156_s8 = smov 125  }
 0x463   : > { %7124 = vst [vmem:[#allocation67_spill] sm:$0xff] %v4281_v30  ;;  %7125 = vst [vmem:[#allocation68_spill] sm:$0xff] %v4283_v29  ;;  %v760_v30 = vunpack.c.l.s4 %v3560_v0  ;;  %v1837_v29 = vmul.f32 %v1836_v33, %v4109_v15 }
 0x464   : > { %1696 = vrot.lane.b32.xlu1 %v4111_v16, %s7126_s10  ;;  %1694 = vrot.lane.b32.xlu0 %v4109_v15, %s7126_s10  ;;  %s4321_s10 = sld [smem:[#allocation6 + $0x39]] }
 0x465   : > { %7132 = sst [smem:[#allocation73_spill]] %s4313_s12  ;;  %v761_v33 = vunpack.c.0.s8 %v760_v30  ;;  %s4436_s12 = sld [smem:[#allocation6 + $0x51]] }
 0x466   : > { %v4289_v28 = vpop.permute.xlu1 %2599  ;;  %v4291_v27 = vpop.permute.xlu0 %2597 }
 0x467   : > { %7127 = vst [vmem:[#allocation69_spill] sm:$0xff] %v4289_v28  ;;  %7128 = vst [vmem:[#allocation70_spill] sm:$0xff] %v4291_v27  ;;  %v1840_v28 = vmul.f32 %v1839_v32, %v3837_v44  ;;  %v1841_v27 = vmul.f32 %v1839_v32, %v3839_v45  ;;  %v4326_v32 = vld [vmem:[%s7135_s4] ss:$2 sm:$0x3] }
 0x468   : > { %1744 = vrot.lane.b32.xlu1 %v4111_v16, %s7129_s7  ;;  %1742 = vrot.lane.b32.xlu0 %v4109_v15, %s7129_s7  ;;  %s4342_s7 = sld [smem:[#allocation6 + $0x3f]]  ;;  %v4351_v45 = vld [vmem:[%s7135_s4 + $0x1] ss:$2 sm:$0x3]  ;;  %vm1707_vm7 = vcmp.ge.s32.totalorder %v4326_v32, 0  ;;  %vm1708_vm8 = vcmp.lt.s32.totalorder %v4326_v32, 16 }
 0x469   : > { %vm7017_vm9 = vcmp.ge.s32.totalorder %v4351_v45, 0  ;;  %vm7016_vm10 = vcmp.lt.s32.totalorder %v4351_v45, 16  ;;  %vm4388_vm11 = vmand %vm1707_vm7, %vm1708_vm8  ;;  %s4418_s4 = sld [smem:[#allocation6 + $0x50]]  ;;  %vm739_vm6 = vcmp.ge.s32.totalorder %v4326_v32, 3  ;;  %vm740_vm7 = vcmp.lt.s32.totalorder %v4326_v32, 19 }
 0x46a   : > { %v4315_v0 = vpop.permute.xlu1 %2644  ;;  %v4317_v19 = vpop.permute.xlu0 %2642  ;;  %vm4428_vm0 = vmand %vm4388_vm11, %vm7017_vm9 }
 0x46b   : > { %7133 = vst [vmem:[#allocation74_spill] sm:$0xff] %v4315_v0  ;;  %7134 = vst [vmem:[#allocation75_spill] sm:$0xff] %v4317_v19  ;;  %v1843_v19 = vadd.f32 %v1841_v27, %v1838_v34  ;;  %v1842_v0 = vadd.f32 %v1840_v28, %v1837_v29  ;;  %v4358_v27 = vsub.s32 %v761_v33, %v3783_v26 }
 0x46c   : > { %1789 = vrot.lane.b32.xlu1 %v4111_v16, %s7136_s15  ;;  %1787 = vrot.lane.b32.xlu0 %v4109_v15, %s7136_s15  ;;  %s4353_s15 = sld [smem:[#allocation6 + $0x40]]  ;;  %vm4460_vm2 = vmand %vm4428_vm0, %vm7016_vm10  ;;  %vm1110_vm0 = vcmp.lt.s32.totalorder %v3781_v25, 34 }
 0x46d   : > { %v1846_v28 = vcombine.low %v1842_v0, %v1843_v19  ;;  %v7146_v19 = vmov 0  ;;  %vm4615_vm8 = vmand %vm739_vm6, %vm740_vm7  ;;  %vm7013_vm6 = vcmp.lt.s32.totalorder %v4351_v45, 19 }
 0x46e   : > { %v4344_v30 = vpop.permute.xlu1 %2692  ;;  %v4346_v44 = vpop.permute.xlu0 %2690  ;;  %v7147_v19 = vsel %vm4388_vm11, 4294967295, %v7146_v19 }
 0x46f   : > { %7139 = vst [vmem:[#allocation78_spill] sm:$0xff] %v4344_v30  ;;  %7140 = vst [vmem:[#allocation79_spill] sm:$0xff] %v4346_v44  ;;  %v1853_v33 = vrot.slane %v1846_v28, %v4358_v27  ;;  %7151 = sst [smem:[#allocation86_spill]] %s4418_s4  ;;  %s7167_s4 = smov 114  }
 0x470   : > { %1866 = vrot.lane.b32.xlu1 %v4111_v16, %s7141_s24  ;;  %1864 = vrot.lane.b32.xlu0 %v4109_v15, %s7141_s24  ;;  %s4382_s24 = sld [smem:[#allocation6 + $0x48]]  ;;  %7148 = vst [vmem:[#allocation84_spill] sm:$0xff] %v7147_v19 }
 0x471   : > { %v1860_v30 = vrot.slane %v1853_v33, %v4358_v27 }
 0x472   : > { %v4378_v29 = vpop.permute.xlu1 %2737  ;;  %v4380_v34 = vpop.permute.xlu0 %2735 }
 0x473   : > { %7144 = vst [vmem:[#allocation82_spill] sm:$0xff] %v4378_v29  ;;  %7145 = vst [vmem:[#allocation83_spill] sm:$0xff] %v4380_v34  ;;  %v4489_v10 = vsel %vm4460_vm2, %v1860_v30, 0.0  ;;  %v737_v34 = vsel %vm730_vm12, %v3959_v47, %v3957_v46  ;;  %v738_v29 = vsel %vm730_vm12, %v3957_v46, %v3959_v47  ;;  %v788_v30 = vsel %vm780_vm13, %v3965_v48, %v3967_v49 }
 0x474   : > { %1911 = vrot.lane.b32.xlu1 %v4111_v16, %s7150_s5  ;;  %1909 = vrot.lane.b32.xlu0 %v4109_v15, %s7150_s5  ;;  %s4416_s5 = sld [smem:[#allocation6 + $0x4f]]  ;;  %7162 = vst [vmem:[#allocation91_spill] sm:$0xff] %v4489_v10  ;;  %v7165_v46 = vstv %s4293_s16  ;;  %s4552_s16 = sld [smem:[#allocation6 + $0x2]] }
 0x475   : > { %v752_v19 = vmul.f32 %v7165_v46, %v738_v29  ;;  %v7166_v44 = vmov %v7165_v46 }
 0x476   : > { %v4420_v26 = vpop.permute.xlu1 %2782  ;;  %v4422_v0 = vpop.permute.xlu0 %2780 }
 0x477   : > { %7152 = vst [vmem:[#allocation87_spill] sm:$0xff] %v4420_v26  ;;  %7153 = vst [vmem:[#allocation88_spill] sm:$0xff] %v4422_v0  ;;  %v787_v26 = vsel %vm780_vm13, %v3967_v49, %v3965_v48  ;;  %v835_v48 = vsel %vm827_vm14, %v3973_v50, %v3975_v51  ;;  %v882_v49 = vsel %vm874_vm15, %v3981_v52, %v3983_v53  ;;  %v7172_v51 = vstv %s4307_s25  ;;  %s4634_s25 = sld [smem:[#allocation6 + $0x4]] }
 0x478   : > { %1956 = vrot.lane.b32.xlu1 %v4111_v16, %s7156_s8  ;;  %1954 = vrot.lane.b32.xlu0 %v4109_v15, %s7156_s8  ;;  %s4468_s8 = sld [smem:[#allocation6 + $0x54]]  ;;  %v881_v50 = vsel %vm874_vm15, %v3983_v53, %v3981_v52  ;;  %v4564_v10 = vmul.f32 %v7172_v51, %v882_v49  ;;  %v929_v49 = vsel %vm921_vm1, %v3989_v54, %v3991_v55 }
 0x47a   : > { %v4470_v0 = vpop.permute.xlu1 %2827  ;;  %v4472_v28 = vpop.permute.xlu0 %2825 }
 0x47b   : > { %7159 = vst [vmem:[#allocation89_spill] sm:$0xff] %v4470_v0  ;;  %7160 = vst [vmem:[#allocation90_spill] sm:$0xff] %v4472_v28 }
 0x47c   : > { %2001 = vrot.lane.b32.xlu1 %v4111_v16, %s7161_s3  ;;  %1999 = vrot.lane.b32.xlu0 %v4109_v15, %s7161_s3  ;;  %s4501_s3 = sld [smem:[#allocation6 + $0x56]] }
 0x47e   : > { %v4515_v40 = vpop.permute.xlu1 %2872  ;;  %v4517_v33 = vpop.permute.xlu0 %2870 }
 0x47f   : > { %7163 = vst [vmem:[#allocation92_spill] sm:$0xff] %v4515_v40  ;;  %7164 = vst [vmem:[#allocation93_spill] sm:$0xff] %v4517_v33  ;;  %v753_v33 = vmul.f32 %v7166_v44, %v737_v34  ;;  %v7168_v40 = vstv %s4296_s17  ;;  %v748_v44 = vstv %s4454_s0  ;;  %v7170_v34 = vstv %s4298_s29  ;;  %s7174_s0 = sld [smem:[#allocation71_spill]]  ;;  %s4593_s17 = sld [smem:[#allocation6 + $0x3]] }
 0x480   : > { %2049 = vrot.lane.b32.xlu1 %v4111_v16, %s7167_s4  ;;  %2047 = vrot.lane.b32.xlu0 %v4109_v15, %s7167_s4  ;;  %v799_v28 = vmul.f32 %v7168_v40, %v788_v30  ;;  %v7169_v47 = vmov %v7168_v40  ;;  %v4556_v46 = vmul.f32 %v7170_v34, %v835_v48  ;;  %v7171_v52 = vmov %v7170_v34  ;;  %s7175_s4 = smov 113   ;;  %s7176_s29 = sld [smem:[#allocation72_spill]] }
 0x481   : > { %v800_v0 = vmul.f32 %v7169_v47, %v787_v26  ;;  %v4560_v53 = vmul.f32 %v7171_v52, %v834_v43  ;;  %v7173_v26 = vmov %v7172_v51  ;;  %v928_v47 = vsel %vm921_vm1, %v3991_v55, %v3989_v54 }
 0x482   : > { %v729_v37 = vpop.permute.xlu1 %728  ;;  %v727_v40 = vpop.permute.xlu0 %726  ;;  %v4569_v30 = vmul.f32 %v7173_v26, %v881_v50  ;;  %v975_v54 = vsel %vm968_vm3, %v3999_v57, %v3997_v56  ;;  %v976_v55 = vsel %vm968_vm3, %v3997_v56, %v3999_v57 }
 0x483   : > { %v731_v43 = vsel %vm730_vm12, %v727_v40, %v729_v37  ;;  %v732_v48 = vsel %vm730_vm12, %v729_v37, %v727_v40  ;;  %v795_v37 = vstv %s4503_s30  ;;  %vm7010_vm12 = vcmp.ge.s32.totalorder %v4351_v45, 3  ;;  %s7181_s30 = smov 112  }
 0x484   : > { %v749_v51 = vmul.f32 %v748_v44, %v732_v48  ;;  %v750_v34 = vmul.f32 %v748_v44, %v731_v43  ;;  %2094 = vrot.lane.b32.xlu1 %v4111_v16, %s7175_s4  ;;  %2092 = vrot.lane.b32.xlu0 %v4109_v15, %s7175_s4  ;;  %vm4650_vm2 = vmand %vm4615_vm8, %vm7010_vm12  ;;  %vm7022_vm12 = vcmp.lt.s32.totalorder %v4351_v45, 18  ;;  %s4679_s4 = sld [smem:[#allocation6 + $0x5]] }
 0x485   : > { %v7177_v48 = vstv %s7174_s0  ;;  %s7184_s0 = sld [smem:[#allocation73_spill]] }
 0x486   : > { %v754_v44 = vadd.f32 %v752_v19, %v749_v51  ;;  %v755_v40 = vadd.f32 %v753_v33, %v750_v34  ;;  %v779_v26 = vpop.permute.xlu1 %778  ;;  %v777_v43 = vpop.permute.xlu0 %776  ;;  %v4605_v52 = vmul.f32 %v7177_v48, %v929_v49  ;;  %v7178_v50 = vmov %v7177_v48 }
 0x487   : > { %v4609_v39 = vmul.f32 %v7178_v50, %v928_v47  ;;  %v781_v29 = vsel %vm780_vm13, %v777_v43, %v779_v26  ;;  %v782_v5 = vsel %vm780_vm13, %v779_v26, %v777_v43  ;;  %v7182_v47 = vstv %s7176_s29  ;;  %s4738_s29 = sld [smem:[#allocation6 + $0x6]] }
 0x488   : > { %v758_v57 = vcombine.low %v754_v44, %v755_v40  ;;  %v796_v19 = vmul.f32 %v795_v37, %v782_v5  ;;  %v797_v33 = vmul.f32 %v795_v37, %v781_v29  ;;  %2139 = vrot.lane.b32.xlu1 %v4111_v16, %s7181_s30  ;;  %2137 = vrot.lane.b32.xlu0 %v4109_v15, %s7181_s30  ;;  %vm7011_vm13 = vcmp.ge.s32.totalorder %v4351_v45, 2  ;;  %s4786_s30 = sld [smem:[#allocation6 + $0x7]] }
 0x489   : > { %v4626_v49 = vmul.f32 %v7182_v47, %v976_v55  ;;  %v7183_v50 = vmov %v7182_v47  ;;  %v842_v34 = vstv %s4552_s16  ;;  %v1023_v5 = vsel %vm7012_vm4, %v4005_v58, %v4007_v59  ;;  %vm4663_vm7 = vmand %vm4615_vm8, %vm7011_vm13  ;;  %s7189_s16 = smov 111  }
 0x48a   : > { %v4630_v51 = vmul.f32 %v7183_v50, %v975_v54  ;;  %v765_v29 = vrot.slane %v758_v57, %v4358_v27  ;;  %v801_v37 = vadd.f32 %v799_v28, %v796_v19  ;;  %v802_v55 = vadd.f32 %v800_v0, %v797_v33  ;;  %v826_v44 = vpop.permute.xlu1 %825  ;;  %v824_v54 = vpop.permute.xlu0 %823 }
 0x48b   : > { %v1022_v40 = vsel %vm7012_vm4, %v4007_v59, %v4005_v58  ;;  %v828_v0 = vsel %vm827_vm14, %v824_v54, %v826_v44  ;;  %v829_v28 = vsel %vm827_vm14, %v826_v44, %v824_v54  ;;  %v7190_v57 = vstv %s7184_s0  ;;  %vm4690_vm4 = vmand %vm4650_vm2, %vm7013_vm6  ;;  %s4830_s0 = sld [smem:[#allocation6 + $0x8]] }
 0x48c   : > { %v805_v59 = vcombine.low %v801_v37, %v802_v55  ;;  %v843_v43 = vmul.f32 %v842_v34, %v829_v28  ;;  %v844_v48 = vmul.f32 %v842_v34, %v828_v0  ;;  %2184 = vrot.lane.b32.xlu1 %v4111_v16, %s7189_s16  ;;  %v4672_v19 = vmul.f32 %v7190_v57, %v1023_v5  ;;  %vm4705_vm2 = vmand %vm4663_vm7, %vm7022_vm12 }
 0x48d   : > { %v772_v33 = vrot.slane %v765_v29, %v4358_v27  ;;  %vm7021_vm14 = vcmp.ge.s32.totalorder %v4351_v45, 1  ;;  %2182 = vrot.lane.b32.xlu0 %v4109_v15, %s7189_s16  ;;  %v889_v47 = vstv %s4593_s17  ;;  %v1070_v50 = vsel %vm7014_vm5, %v4013_v60, %v4015_v61  ;;  %s7197_s17 = smov 110   ;;  %s7218_s16 = smov 98  }
 0x48e   : > { %vm1155_vm13 = vcmp.lt.s32.totalorder %v3781_v25, 33  ;;  %v812_v5 = vrot.slane %v805_v59, %v4358_v27  ;;  %v848_v29 = vadd.f32 %v4556_v46, %v843_v43  ;;  %v849_v37 = vadd.f32 %v4560_v53, %v844_v48  ;;  %v873_v55 = vpop.permute.xlu1 %872  ;;  %v871_v44 = vpop.permute.xlu0 %870 }
 0x48f   : > { %v1069_v54 = vsel %vm7014_vm5, %v4015_v61, %v4013_v60  ;;  %vm7020_vm6 = vcmp.lt.s32.totalorder %v4351_v45, 17  ;;  %v875_v46 = vsel %vm874_vm15, %v871_v44, %v873_v55  ;;  %v876_v53 = vsel %vm874_vm15, %v873_v55, %v871_v44  ;;  %vm4719_vm5 = vmand %vm4615_vm8, %vm7021_vm14 }
 0x490   : > { %v819_v0 = vrot.slane %v812_v5, %v4358_v27  ;;  %v852_v61 = vcombine.low %v848_v29, %v849_v37  ;;  %v890_v28 = vmul.f32 %v889_v47, %v876_v53  ;;  %v891_v58 = vmul.f32 %v889_v47, %v875_v46  ;;  %2229 = vrot.lane.b32.xlu1 %v4111_v16, %s7197_s17  ;;  %vm4753_vm15 = vmand %vm4719_vm5, %vm7020_vm6 }
 0x491   : > { %v7198_v59 = vmov %v7190_v57  ;;  %v7199_v48 = vstv %s4319_s11  ;;  %v774_v5 = vsel %vm4690_vm4, %v772_v33, 0.0  ;;  %2227 = vrot.lane.b32.xlu0 %v4109_v15, %s7197_s17  ;;  %v936_v55 = vstv %s4634_s25  ;;  %vm4766_vm4 = vmand %vm4615_vm8, %vm7017_vm9  ;;  %s7205_s11 = smov 109   ;;  %s7210_s25 = smov 99  }
 0x492   : > { %v4727_v43 = vmul.f32 %v7198_v59, %v1022_v40  ;;  %v4731_v57 = vmul.f32 %v7199_v48, %v1070_v50  ;;  %v821_v47 = vsel %vm4705_vm2, %v819_v0, 0.0  ;;  %v859_v29 = vrot.slane %v852_v61, %v4358_v27  ;;  %v920_v50 = vpop.permute.xlu1 %919  ;;  %v918_v44 = vpop.permute.xlu0 %917  ;;  %vm4798_vm7 = vmand %vm4766_vm4, %vm7016_vm10  ;;  %s7225_s17 = smov 97  }
 0x493   : > { %v895_v40 = vadd.f32 %v4564_v10, %v890_v28  ;;  %v896_v37 = vadd.f32 %v4569_v30, %v891_v58  ;;  %v7200_v46 = vmov %v7199_v48  ;;  %v822_v34 = vadd.f32 %v821_v47, %v774_v5 }
 0x494   : > { %v4747_v33 = vmul.f32 %v7200_v46, %v1069_v54  ;;  %v922_v10 = vsel %vm921_vm1, %v918_v44, %v920_v50  ;;  %v923_v30 = vsel %vm921_vm1, %v920_v50, %v918_v44  ;;  %v866_v53 = vrot.slane %v859_v29, %v4358_v27  ;;  %2274 = vrot.lane.b32.xlu1 %v4111_v16, %s7205_s11 }
 0x495   : > { %v899_v0 = vcombine.low %v895_v40, %v896_v37  ;;  %v937_v60 = vmul.f32 %v936_v55, %v923_v30  ;;  %v938_v61 = vmul.f32 %v936_v55, %v922_v10  ;;  %v4776_v28 = vsel %vm1110_vm0, %v4023_v63, %v4021_v62  ;;  %2272 = vrot.lane.b32.xlu0 %v4109_v15, %s7205_s11  ;;  %s4966_s11 = sld [smem:[#allocation6 + $0xb]] }
 0x496   : > { %v1118_v58 = vsel %vm1110_vm0, %v4021_v62, %v4023_v63  ;;  %vm7015_vm1 = vcmp.ge.s32.totalorder %v4351_v45, 4294967295  ;;  %v983_v59 = vstv %s4679_s4  ;;  %vm1200_vm5 = vcmp.lt.s32.totalorder %v3781_v25, 32  ;;  %v967_v63 = vpop.permute.xlu1 %966  ;;  %v965_v47 = vpop.permute.xlu0 %964  ;;  %s4868_s4 = sld [smem:[#allocation6 + $0x9]] }
 0x497   : > { %v868_v48 = vsel %vm4753_vm15, %v866_v53, 0.0  ;;  %v906_v5 = vrot.slane %v899_v0, %v4358_v27  ;;  %v942_v55 = vadd.f32 %v4605_v52, %v937_v60  ;;  %v943_v62 = vadd.f32 %v4609_v39, %v938_v61  ;;  %vm4812_vm15 = vmand %vm4615_vm8, %vm7015_vm1 }
 0x498   : > { %v869_v29 = vadd.f32 %v868_v48, %v822_v34  ;;  %vm7018_vm2 = vcmp.lt.s32.totalorder %v4351_v45, 15  ;;  %v969_v37 = vsel %vm968_vm3, %v965_v47, %v967_v63  ;;  %v970_v39 = vsel %vm968_vm3, %v967_v63, %v965_v47  ;;  %2319 = vrot.lane.b32.xlu1 %v4111_v16, %s7210_s25 }
 0x499   : > { %v913_v52 = vrot.slane %v906_v5, %v4358_v27  ;;  %v946_v44 = vcombine.low %v942_v55, %v943_v62  ;;  %v984_v46 = vmul.f32 %v983_v59, %v970_v39  ;;  %v985_v34 = vmul.f32 %v983_v59, %v969_v37  ;;  %2317 = vrot.lane.b32.xlu0 %v4109_v15, %s7210_s25  ;;  %vm4841_vm4 = vmand %vm4812_vm15, %vm7018_vm2  ;;  %s5009_s25 = sld [smem:[#allocation6 + $0xc]] }
 0x49a   : > { %v7211_v26 = vstv %s4321_s10  ;;  %v1163_v30 = vsel %vm1155_vm13, %v4029_v3, %v4031_v7  ;;  %vm7019_vm3 = vcmp.ge.s32.totalorder %v4351_v45, 4294967294  ;;  %v1030_v53 = vstv %s4738_s29  ;;  %v1012_v59 = vpop.permute.xlu0 %1011  ;;  %s7235_s29 = smov 96  }
 0x49b   : > { %v4820_v10 = vmul.f32 %v7211_v26, %v1118_v58  ;;  %v915_v54 = vsel %vm4798_vm7, %v913_v52, 0.0  ;;  %v953_v0 = vrot.slane %v946_v44, %v4358_v27  ;;  %v989_v60 = vadd.f32 %v4626_v49, %v984_v46  ;;  %v1014_v58 = vpop.permute.xlu1 %1013  ;;  %vm4856_vm15 = vmand %vm4615_vm8, %vm7019_vm3 }
 0x49c   : > { %v990_v61 = vadd.f32 %v4630_v51, %v985_v34  ;;  %v916_v48 = vadd.f32 %v915_v54, %v869_v29  ;;  %vm7025_vm7 = vcmp.lt.s32.totalorder %v4351_v45, 14  ;;  %vm7214_vm1 = vcmp.lt.s32.totalorder %v3781_v25, 45  ;;  %2367 = vrot.lane.b32.xlu1 %v4111_v16, %s7218_s16 }
 0x49d   : > { %v1016_v55 = vsel %vm7214_vm1, %v1012_v59, %v1014_v58  ;;  %vm7215_vm10 = vmmov %vm7214_vm1  ;;  %vm1245_vm9 = vcmp.lt.s32.totalorder %v3781_v25, 31  ;;  %v960_v51 = vrot.slane %v953_v0, %v4358_v27  ;;  %2365 = vrot.lane.b32.xlu0 %v4109_v15, %s7218_s16  ;;  %vm1071_vm1 = vcmp.ge.s32.totalorder %v4326_v32, 2  ;;  %s5049_s16 = sld [smem:[#allocation6 + $0xd]] }
 0x49e   : > { %v1017_v49 = vsel %vm7215_vm10, %v1014_v58, %v1012_v59  ;;  %v993_v63 = vcombine.low %v989_v60, %v990_v61  ;;  %v1032_v29 = vmul.f32 %v1030_v53, %v1016_v55  ;;  %vm7024_vm10 = vcmp.ge.s32.totalorder %v4351_v45, 4294967293  ;;  %v1059_v46 = vpop.permute.xlu0 %1058  ;;  %vm4880_vm6 = vmand %vm4856_vm15, %vm7025_vm7 }
 0x49f   : > { %v1031_v47 = vmul.f32 %v1030_v53, %v1017_v49  ;;  %vm1072_vm2 = vcmp.lt.s32.totalorder %v4326_v32, 18  ;;  %v1078_v40 = vstv %s4786_s30  ;;  %v962_v37 = vsel %vm4841_vm4, %v960_v51, 0.0  ;;  %v1061_v44 = vpop.permute.xlu1 %1060  ;;  %vm4894_vm3 = vmand %vm4615_vm8, %vm7024_vm10  ;;  %s7243_s30 = smov 95  }
 0x4a0   : > { %v1000_v39 = vrot.slane %v993_v63, %v4358_v27  ;;  %v1037_v50 = vadd.f32 %v4727_v43, %v1032_v29  ;;  %v963_v34 = vadd.f32 %v962_v37, %v916_v48  ;;  %vm7023_vm4 = vcmp.lt.s32.totalorder %v4351_v45, 13  ;;  %2412 = vrot.lane.b32.xlu1 %v4111_v16, %s7225_s17  ;;  %vm4915_vm8 = vmand %vm1071_vm1, %vm1072_vm2 }
 0x4a1   : > { %v1036_v52 = vadd.f32 %v4672_v19, %v1031_v47  ;;  %vm7221_vm14 = vcmp.lt.s32.totalorder %v3781_v25, 35  ;;  %v7226_v58 = vstv %s4321_s10  ;;  %v1162_v48 = vsel %vm1155_vm13, %v4031_v7, %v4029_v3  ;;  %2410 = vrot.lane.b32.xlu0 %v4109_v15, %s7225_s17  ;;  %s4922_s10 = sld [smem:[#allocation6 + $0xa]]  ;;  %s5094_s17 = sld [smem:[#allocation6 + $0xe]] }
 0x4a2   : > { %v1063_v53 = vsel %vm7221_vm14, %v1059_v46, %v1061_v44  ;;  %vm7222_vm12 = vmmov %vm7221_vm14  ;;  %v1007_v43 = vrot.slane %v1000_v39, %v4358_v27  ;;  %v1128_v59 = vmul.f32 %v7226_v58, %v4776_v28  ;;  %v1208_v56 = vsel %vm1200_vm5, %v4041_v12, %v4043_v13  ;;  %v1107_v62 = vpop.permute.xlu0 %1106 }
 0x4a3   : > { %v1064_v19 = vsel %vm7222_vm12, %v1061_v44, %v1059_v46  ;;  %v1040_v0 = vcombine.low %v1036_v52, %v1037_v50  ;;  %v1080_v61 = vmul.f32 %v1078_v40, %v1063_v53  ;;  %v1123_v28 = vstv %s4830_s0  ;;  %v1109_v51 = vpop.permute.xlu1 %1108  ;;  %vm4935_vm12 = vmand %vm4894_vm3, %vm7023_vm4  ;;  %s7254_s0 = smov 94  }
 0x4a4   : > { %v1079_v60 = vmul.f32 %v1078_v40, %v1064_v19  ;;  %v1009_v3 = vsel %vm4880_vm6, %v1007_v43, 0.0  ;;  %v7229_v63 = vstv %s4328_s26  ;;  %vm1335_vm6 = vcmp.lt.s32.totalorder %v3781_v25, 29  ;;  %2457 = vrot.lane.b32.xlu1 %v4111_v16, %s7235_s29  ;;  %s7242_s26 = sld [smem:[#allocation76_spill]] }
 0x4a5   : > { %v1047_v7 = vrot.slane %v1040_v0, %v4358_v27  ;;  %v1085_v49 = vadd.f32 %v4747_v33, %v1080_v61  ;;  %v1172_v47 = vmul.f32 %v7229_v63, %v1163_v30  ;;  %v1010_v29 = vadd.f32 %v1009_v3, %v963_v34  ;;  %2455 = vrot.lane.b32.xlu0 %v4109_v15, %s7235_s29  ;;  %s5132_s29 = sld [smem:[#allocation6 + $0xf]] }
 0x4a6   : > { %v1084_v55 = vadd.f32 %v4731_v57, %v1079_v60  ;;  %v1111_v57 = vsel %vm1110_vm0, %v1107_v62, %v1109_v51  ;;  %v1112_v33 = vsel %vm1110_vm0, %v1109_v51, %v1107_v62  ;;  %vm7232_vm14 = vcmp.ge.s32.totalorder %v4351_v45, 3 }
 0x4a7   : > { %v1054_v30 = vrot.slane %v1047_v7, %v4358_v27  ;;  %vm4949_vm2 = vmand %vm4915_vm8, %vm7232_vm14  ;;  %v1124_v52 = vmul.f32 %v1123_v28, %v1112_v33  ;;  %v1125_v50 = vmul.f32 %v1123_v28, %v1111_v57  ;;  %v7236_v44 = vmov %v7229_v63 }
 0x4a8   : > { %v1088_v39 = vcombine.low %v1084_v55, %v1085_v49  ;;  %v1173_v46 = vmul.f32 %v7236_v44, %v1162_v48  ;;  %v1207_v34 = vsel %vm1200_vm5, %v4043_v13, %v4041_v12  ;;  %v7237_v26 = vstv %s4330_s23  ;;  %v1154_v12 = vpop.permute.xlu1 %1153  ;;  %v1152_v13 = vpop.permute.xlu0 %1151  ;;  %2502 = vrot.lane.b32.xlu1 %v4111_v16, %s7243_s30  ;;  %s7246_s23 = sld [smem:[#allocation77_spill]] }
 0x4a9   : > { %v1217_v53 = vmul.f32 %v7237_v26, %v1208_v56  ;;  %v1168_v19 = vstv %s4868_s4  ;;  %vm1380_vm0 = vcmp.lt.s32.totalorder %v3781_v25, 19  ;;  %v1056_v43 = vsel %vm4935_vm12, %v1054_v30, 0.0  ;;  %2500 = vrot.lane.b32.xlu0 %v4109_v15, %s7243_s30  ;;  %s7264_s4 = smov 93   ;;  %s5175_s30 = sld [smem:[#allocation6 + $0x10]] }
 0x4aa   : > { %v1095_v54 = vrot.slane %v1088_v39, %v4358_v27  ;;  %v1129_v0 = vadd.f32 %v4820_v10, %v1124_v52  ;;  %v1130_v60 = vadd.f32 %v1128_v59, %v1125_v50  ;;  %v1253_v61 = vsel %vm1245_vm9, %v4053_v18, %v4055_v20 }
 0x4ab   : > { %v1057_v58 = vadd.f32 %v1056_v43, %v1010_v29  ;;  %vm7238_vm3 = vcmp.lt.s32.totalorder %v4351_v45, 19  ;;  %v1156_v48 = vsel %vm1155_vm13, %v1152_v13, %v1154_v12  ;;  %v1157_v10 = vsel %vm1155_vm13, %v1154_v12, %v1152_v13 }
 0x4ac   : > { %vm1075_vm15 = vmand %vm4949_vm2, %vm7238_vm3  ;;  %v1102_v59 = vrot.slane %v1095_v54, %v4358_v27  ;;  %vm7239_vm1 = vcmp.ge.s32.totalorder %v4351_v45, 2  ;;  %v1133_v28 = vcombine.low %v1129_v0, %v1130_v60  ;;  %v1169_v3 = vmul.f32 %v1168_v19, %v1157_v10  ;;  %v1199_v30 = vpop.permute.xlu1 %1198  ;;  %2547 = vrot.lane.b32.xlu1 %v4111_v16, %s7254_s0 }
 0x4ad   : > { %vm4990_vm12 = vmand %vm4915_vm8, %vm7239_vm1  ;;  %v1170_v7 = vmul.f32 %v1168_v19, %v1156_v48  ;;  %v7244_v55 = vmov %v7237_v26  ;;  %v1252_v51 = vsel %vm1245_vm9, %v4055_v20, %v4053_v18  ;;  %vm7245_vm13 = vcmp.lt.s32.totalorder %v3781_v25, 30  ;;  %v1197_v18 = vpop.permute.xlu0 %1196  ;;  %2545 = vrot.lane.b32.xlu0 %v4109_v15, %s7254_s0  ;;  %s5219_s0 = sld [smem:[#allocation6 + $0x5b]] }
 0x4ae   : > { %v1218_v49 = vmul.f32 %v7244_v55, %v1207_v34  ;;  %v1298_v62 = vsel %vm7245_vm13, %v4061_v23, %v4063_v24  ;;  %v1213_v63 = vstv %s4922_s10  ;;  %v1104_v29 = vsel %vm1075_vm15, %v1102_v59, 0.0  ;;  %s7272_s10 = smov 83  }
 0x4af   : > { %v1140_v40 = vrot.slane %v1133_v28, %v4358_v27  ;;  %v1174_v57 = vadd.f32 %v1172_v47, %v1169_v3  ;;  %v1175_v33 = vadd.f32 %v1173_v46, %v1170_v7  ;;  %v7247_v20 = vstv %s7242_s26  ;;  %s5168_s26 = sld [smem:[#allocation6 + $0x58]] }
 0x4b0   : > { %v1262_v37 = vmul.f32 %v7247_v20, %v1253_v61  ;;  %v1105_v39 = vadd.f32 %v1104_v29, %v1057_v58  ;;  %vm7248_vm14 = vcmp.lt.s32.totalorder %v4351_v45, 18  ;;  %v1201_v47 = vsel %vm1200_vm5, %v1197_v18, %v1199_v30  ;;  %v1244_v59 = vpop.permute.xlu1 %1243  ;;  %2592 = vrot.lane.b32.xlu1 %v4111_v16, %s7264_s4 }
 0x4b1   : > { %vm5018_vm2 = vmand %vm4990_vm12, %vm7248_vm14  ;;  %v1202_v50 = vsel %vm1200_vm5, %v1199_v30, %v1197_v18  ;;  %vm1428_vm3 = vcmp.lt.s32.totalorder %v3781_v25, 18  ;;  %v1147_v44 = vrot.slane %v1140_v40, %v4358_v27  ;;  %vm7251_vm15 = vcmp.ge.s32.totalorder %v4351_v45, 1  ;;  %v1242_v56 = vpop.permute.xlu0 %1241  ;;  %2590 = vrot.lane.b32.xlu0 %v4109_v15, %s7264_s4  ;;  %s7297_s4 = smov 80  }
 0x4b2   : > { %vm5032_vm1 = vmand %vm4915_vm8, %vm7251_vm15  ;;  %v1178_v34 = vcombine.low %v1174_v57, %v1175_v33  ;;  %v1214_v26 = vmul.f32 %v1213_v63, %v1202_v50  ;;  %v1215_v19 = vmul.f32 %v1213_v63, %v1201_v47  ;;  %v7255_v43 = vmov %v7247_v20 }
 0x4b3   : > { %v1263_v54 = vmul.f32 %v7255_v43, %v1252_v51  ;;  %vm7256_vm5 = vmmov %vm7245_vm13  ;;  %v7257_v60 = vstv %s7246_s23  ;;  %v1258_v13 = vstv %s4966_s11  ;;  %v1149_v61 = vsel %vm5018_vm2, %v1147_v44, 0.0  ;;  %s7281_s11 = smov 82   ;;  %s5217_s23 = sld [smem:[#allocation6 + $0x5a]] }
 0x4b4   : > { %v1297_v0 = vsel %vm7256_vm5, %v4063_v24, %v4061_v23  ;;  %v1307_v12 = vmul.f32 %v7257_v60, %v1298_v62  ;;  %v1185_v58 = vrot.slane %v1178_v34, %v4358_v27  ;;  %v1219_v48 = vadd.f32 %v1217_v53, %v1214_v26  ;;  %v1289_v20 = vpop.permute.xlu1 %1288  ;;  %2637 = vrot.lane.b32.xlu1 %v4111_v16, %s7272_s10 }
 0x4b5   : > { %v1220_v10 = vadd.f32 %v1218_v49, %v1215_v19  ;;  %v1343_v23 = vsel %vm1335_vm6, %v4069_v8, %v4071_v9  ;;  %v1150_v24 = vadd.f32 %v1149_v61, %v1105_v39  ;;  %vm7258_vm12 = vcmp.lt.s32.totalorder %v4351_v45, 17  ;;  %v1287_v39 = vpop.permute.xlu0 %1286  ;;  %2635 = vrot.lane.b32.xlu0 %v4109_v15, %s7272_s10  ;;  %s5274_s10 = sld [smem:[#allocation6 + $0x5f]] }
 0x4b6   : > { %vm5062_vm13 = vmand %vm5032_vm1, %vm7258_vm12  ;;  %v1246_v53 = vsel %vm1245_vm9, %v1242_v56, %v1244_v59  ;;  %v1247_v3 = vsel %vm1245_vm9, %v1244_v59, %v1242_v56  ;;  %v1192_v7 = vrot.slane %v1185_v58, %v4358_v27  ;;  %vm7261_vm14 = vcmp.ge.s32.totalorder %v4351_v45, 0 }
 0x4b7   : > { %vm5075_vm2 = vmand %vm4915_vm8, %vm7261_vm14  ;;  %v1223_v49 = vcombine.low %v1219_v48, %v1220_v10  ;;  %v1259_v51 = vmul.f32 %v1258_v13, %v1247_v3  ;;  %v1260_v62 = vmul.f32 %v1258_v13, %v1246_v53  ;;  %v7265_v63 = vmov %v7257_v60 }
 0x4b8   : > { %v1308_v29 = vmul.f32 %v7265_v63, %v1297_v0  ;;  %v1342_v40 = vsel %vm1335_vm6, %v4071_v9, %v4069_v8  ;;  %v1388_v57 = vsel %vm1380_vm0, %v4077_v35, %v4079_v36  ;;  %v1303_v33 = vstv %s5009_s25  ;;  %vm7268_vm12 = vmmov %vm7256_vm5  ;;  %2685 = vrot.lane.b32.xlu1 %v4111_v16, %s7281_s11  ;;  %s7287_s25 = smov 81  }
 0x4b9   : > { %vm1473_vm9 = vcmp.lt.s32.totalorder %v3781_v25, 17  ;;  %v1194_v30 = vsel %vm5062_vm13, %v1192_v7, 0.0  ;;  %v1230_v18 = vrot.slane %v1223_v49, %v4358_v27  ;;  %v1264_v8 = vadd.f32 %v1262_v37, %v1259_v51  ;;  %2683 = vrot.lane.b32.xlu0 %v4109_v15, %s7281_s11  ;;  %s7309_s11 = smov 78  }
 0x4ba   : > { %v1265_v9 = vadd.f32 %v1263_v54, %v1260_v62  ;;  %v7266_v52 = vstv %s4340_s28  ;;  %v1195_v50 = vadd.f32 %v1194_v30, %v1150_v24  ;;  %vm7267_vm15 = vcmp.lt.s32.totalorder %v4351_v45, 16  ;;  %v1332_v24 = vpop.permute.xlu0 %1331  ;;  %s5151_s28 = sld [smem:[#allocation6 + $0x57]] }
 0x4bb   : > { %v1352_v47 = vmul.f32 %v7266_v52, %v1343_v23  ;;  %vm1210_vm1 = vmand %vm5075_vm2, %vm7267_vm15  ;;  %v1291_v44 = vsel %vm7256_vm5, %v1287_v39, %v1289_v20  ;;  %v1292_v46 = vsel %vm7268_vm12, %v1289_v20, %v1287_v39  ;;  %v1237_v37 = vrot.slane %v1230_v18, %v4358_v27  ;;  %v1334_v23 = vpop.permute.xlu1 %1333 }
 0x4bc   : > { %vm7269_vm13 = vcmp.ge.s32.totalorder %v4351_v45, 4294967295  ;;  %v1268_v26 = vcombine.low %v1264_v8, %v1265_v9  ;;  %v1304_v19 = vmul.f32 %v1303_v33, %v1292_v46  ;;  %v1305_v43 = vmul.f32 %v1303_v33, %v1291_v44  ;;  %2730 = vrot.lane.b32.xlu1 %v4111_v16, %s7287_s25 }
 0x4bd   : > { %vm5115_vm14 = vmand %vm4915_vm8, %vm7269_vm13  ;;  %v7273_v54 = vmov %v7266_v52  ;;  %v1387_v60 = vsel %vm1380_vm0, %v4079_v36, %v4077_v35  ;;  %v7274_v13 = vstv %s4342_s7  ;;  %v1348_v58 = vstv %s5049_s16  ;;  %s5195_s7 = sld [smem:[#allocation6 + $0x59]]  ;;  %2728 = vrot.lane.b32.xlu0 %v4109_v15, %s7287_s25  ;;  %s5253_s16 = sld [smem:[#allocation6 + $0x5d]] }
 0x4be   : > { %v1353_v0 = vmul.f32 %v7273_v54, %v1342_v40  ;;  %v1400_v61 = vmul.f32 %v7274_v13, %v1388_v57  ;;  %v1239_v48 = vsel %vm1210_vm1, %v1237_v37, 0.0  ;;  %v1275_v10 = vrot.slane %v1268_v26, %v4358_v27  ;;  %s7318_s25 = sld [smem:[#allocation81_spill]] }
 0x4bf   : > { %v1309_v59 = vadd.f32 %v1307_v12, %v1304_v19  ;;  %v1310_v56 = vadd.f32 %v1308_v29, %v1305_v43  ;;  %v1435_v35 = vsel %vm1428_vm3, %v4087_v6, %v4085_v38  ;;  %v1240_v36 = vadd.f32 %v1239_v48, %v1195_v50 }
 0x4c0   : > { %vm7275_vm2 = vcmp.lt.s32.totalorder %v4351_v45, 15  ;;  %v1336_v12 = vsel %vm1335_vm6, %v1332_v24, %v1334_v23  ;;  %v1337_v53 = vsel %vm1335_vm6, %v1334_v23, %v1332_v24  ;;  %v1282_v3 = vrot.slane %v1275_v10, %v4358_v27  ;;  %2775 = vrot.lane.b32.xlu1 %v4111_v16, %s7297_s4 }
 0x4c1   : > { %vm5143_vm15 = vmand %vm5115_vm14, %vm7275_vm2  ;;  %vm7278_vm1 = vcmp.ge.s32.totalorder %v4351_v45, 4294967294  ;;  %v1313_v55 = vcombine.low %v1309_v59, %v1310_v56  ;;  %v1349_v49 = vmul.f32 %v1348_v58, %v1337_v53  ;;  %v1350_v51 = vmul.f32 %v1348_v58, %v1336_v12  ;;  %2773 = vrot.lane.b32.xlu0 %v4109_v15, %s7297_s4  ;;  %s5470_s4 = sld [smem:[#allocation6 + $0x12]] }
 0x4c2   : > { %vm5158_vm5 = vmand %vm4915_vm8, %vm7278_vm1  ;;  %v1436_v62 = vsel %vm1428_vm3, %v4085_v38, %v4087_v6  ;;  %vm1389_vm6 = vcmp.ge.s32.totalorder %v4326_v32, 1  ;;  %vm1390_vm12 = vcmp.lt.s32.totalorder %v4326_v32, 17  ;;  %v1396_v63 = vstv %s5094_s17  ;;  %v1379_v38 = vpop.permute.xlu1 %1378  ;;  %v1377_v6 = vpop.permute.xlu0 %1376  ;;  %s5272_s17 = sld [smem:[#allocation6 + $0x5e]] }
 0x4c3   : > { %v1284_v29 = vsel %vm5143_vm15, %v1282_v3, 0.0  ;;  %v1320_v40 = vrot.slane %v1313_v55, %v4358_v27  ;;  %v1354_v57 = vadd.f32 %v1352_v47, %v1349_v49  ;;  %v1355_v33 = vadd.f32 %v1353_v0, %v1350_v51  ;;  %vm5186_vm13 = vmand %vm5158_vm5, %vm7025_vm7  ;;  %v7372_v3 = vld [vmem:[#allocation54_spill] sm:$0xff] }
 0x4c4   : > { %v7282_v30 = vmov %v7274_v13  ;;  %v1285_v8 = vadd.f32 %v1284_v29, %v1240_v36  ;;  %v1381_v20 = vsel %vm1380_vm0, %v1377_v6, %v1379_v38  ;;  %v1382_v39 = vsel %vm1380_vm0, %v1379_v38, %v1377_v6  ;;  %vm5202_vm2 = vmand %vm4915_vm8, %vm7024_vm10 }
 0x4c5   : > { %v1401_v18 = vmul.f32 %v7282_v30, %v1387_v60  ;;  %vm7026_vm14 = vcmp.lt.s32.totalorder %v3781_v25, 16  ;;  %v1327_v52 = vrot.slane %v1320_v40, %v4358_v27  ;;  %v1358_v50 = vcombine.low %v1354_v57, %v1355_v33  ;;  %vm5225_vm0 = vmand %vm1389_vm6, %vm1390_vm12 }
 0x4c6   : > { %v1397_v44 = vmul.f32 %v1396_v63, %v1382_v39  ;;  %v1398_v46 = vmul.f32 %v1396_v63, %v1381_v20  ;;  %v7288_v37 = vstv %s4353_s15  ;;  %v1481_v43 = vsel %vm1473_vm9, %v4093_v41, %v4095_v42  ;;  %v1427_v48 = vpop.permute.xlu1 %1426  ;;  %v1425_v10 = vpop.permute.xlu0 %1424  ;;  %s5239_s15 = sld [smem:[#allocation6 + $0x5c]]  ;;  %vm5245_vm15 = vmand %vm5202_vm2, %vm7023_vm4 }
 0x4c7   : > { %v1445_v34 = vmul.f32 %v7288_v37, %v1436_v62  ;;  %v7289_v26 = vmov %v7288_v37  ;;  %vm1563_vm8 = vcmp.lt.s32.totalorder %v3781_v25, 15  ;;  %v1441_v54 = vstv %s5132_s29  ;;  %s5281_s29 = sld [smem:[#allocation6 + $0x60]] }
 0x4c8   : > { %v1446_v19 = vmul.f32 %v7289_v26, %v1435_v35  ;;  %v1329_v0 = vsel %vm5186_vm13, %v1327_v52, 0.0  ;;  %v1365_v60 = vrot.slane %v1358_v50, %v4358_v27  ;;  %v1402_v13 = vadd.f32 %v1400_v61, %v1397_v44 }
 0x4c9   : > { %v1403_v58 = vadd.f32 %v1401_v18, %v1398_v46  ;;  %v1480_v32 = vsel %vm1473_vm9, %v4095_v42, %v4093_v41  ;;  %v1330_v59 = vadd.f32 %v1329_v0, %v1285_v8  ;;  %v1429_v56 = vsel %vm1428_vm3, %v1425_v10, %v1427_v48 }
 0x4ca   : > { %v1430_v23 = vsel %vm1428_vm3, %v1427_v48, %v1425_v10  ;;  %v1372_v41 = vrot.slane %v1365_v60, %v4358_v27  ;;  %vm7294_vm1 = vcmp.ge.s32.totalorder %v4351_v45, 3  ;;  %v1443_v36 = vmul.f32 %v1441_v54, %v1429_v56  ;;  %v1472_v63 = vpop.permute.xlu1 %1471  ;;  %v1470_v29 = vpop.permute.xlu0 %1469  ;;  %v7365_v48 = vld [vmem:[#allocation51_spill] sm:$0xff] }
 0x4cb   : > { %vm5260_vm5 = vmand %vm5225_vm0, %vm7294_vm1  ;;  %v1406_v24 = vcombine.low %v1402_v13, %v1403_v58  ;;  %v1442_v35 = vmul.f32 %v1441_v54, %v1430_v23  ;;  %v7298_v28 = vstv %s4355_s27  ;;  %vm1608_vm3 = vcmp.lt.s32.totalorder %v3781_v25, 14  ;;  %s7304_s27 = smov 79   ;;  %v7330_v13 = vld [vmem:[#allocation37_spill] sm:$0xff] }
 0x4cc   : > { %v1490_v12 = vmul.f32 %v7298_v28, %v1481_v43  ;;  %vm1653_vm6 = vcmp.lt.s32.totalorder %v3781_v25, 13  ;;  %v1486_v7 = vstv %s5175_s30  ;;  %vm1698_vm12 = vcmp.lt.s32.totalorder %v3781_v25, 3  ;;  %2820 = vrot.lane.b32.xlu1 %v4111_v16, %s7304_s27  ;;  %2818 = vrot.lane.b32.xlu0 %v4109_v15, %s7304_s27  ;;  %s3561_s30 = smov 77   ;;  %s5472_s27 = sld [smem:[#allocation6 + $0x13]] }
 0x4cd   : > { %vm1746_vm13 = vcmp.lt.s32.totalorder %v3781_v25, 2  ;;  %v1374_v55 = vsel %vm5245_vm15, %v1372_v41, 0.0  ;;  %v1413_v49 = vrot.slane %v1406_v24, %v4358_v27  ;;  %v1447_v51 = vadd.f32 %v1445_v34, %v1442_v35 }
 0x4ce   : > { %v1448_v62 = vadd.f32 %v1446_v19, %v1443_v36  ;;  %v7299_v40 = vmov %v7298_v28  ;;  %vm7027_vm2 = vcmp.lt.s32.totalorder %v3781_v25, 1  ;;  %v1375_v33 = vadd.f32 %v1374_v55, %v1330_v59  ;;  %v5315_v34 = vpop.permute.xlu1 %1516  ;;  %v5317_v26 = vpop.permute.xlu0 %1514 }
 0x4cf   : > { %v1491_v57 = vmul.f32 %v7299_v40, %v1480_v32  ;;  %vm7300_vm1 = vcmp.lt.s32.totalorder %v4351_v45, 19  ;;  %v1474_v38 = vsel %vm1473_vm9, %v1470_v29, %v1472_v63  ;;  %v1475_v6 = vsel %vm1473_vm9, %v1472_v63, %v1470_v29 }
 0x4d0   : > { %vm1393_vm4 = vmand %vm5260_vm5, %vm7300_vm1  ;;  %v1420_v30 = vrot.slane %v1413_v49, %v4358_v27  ;;  %vm7301_vm15 = vcmp.ge.s32.totalorder %v4351_v45, 2  ;;  %v1451_v8 = vcombine.low %v1447_v51, %v1448_v62  ;;  %v1487_v9 = vmul.f32 %v1486_v7, %v1475_v6  ;;  %2865 = vrot.lane.b32.xlu1 %v4111_v16, %s7309_s11  ;;  %2863 = vrot.lane.b32.xlu0 %v4109_v15, %s7309_s11  ;;  %s6128_s11 = sld [smem:[#allocation6 + $0x22]] }
 0x4d1   : > { %vm5302_vm10 = vmand %vm5225_vm0, %vm7301_vm15  ;;  %v1488_v20 = vmul.f32 %v1486_v7, %v1474_v38  ;;  %vm7030_vm5 = vcmp.lt.s32.totalorder %v3781_v25, 127  ;;  %v1525_v19 = vsel %vm7026_vm14, %v4103_v14, %v4101_v11  ;;  %v1526_v43 = vsel %vm7026_vm14, %v4101_v11, %v4103_v14  ;;  %v7323_v38 = vld [vmem:[#allocation36_spill] sm:$0xff] }
 0x4d2   : > { %v1422_v50 = vsel %vm1393_vm4, %v1420_v30, 0.0  ;;  %v1458_v44 = vrot.slane %v1451_v8, %v4358_v27  ;;  %v1492_v46 = vadd.f32 %v1490_v12, %v1487_v9  ;;  %vm7028_vm4 = vcmp.lt.s32.totalorder %v3781_v25, 126  ;;  %v5366_v23 = vpop.permute.xlu1 %1561  ;;  %v5368_v41 = vpop.permute.xlu0 %1559 }
 0x4d3   : > { %v1493_v37 = vadd.f32 %v1491_v57, %v1488_v20  ;;  %vm7029_vm9 = vcmp.lt.s32.totalorder %v3781_v25, 125  ;;  %v1423_v0 = vadd.f32 %v1422_v50, %v1375_v33  ;;  %vm7305_vm1 = vcmp.lt.s32.totalorder %v4351_v45, 18  ;;  %v7320_v57 = vld [vmem:[#allocation33_spill] sm:$0xff]  ;;  %v7321_v33 = vld [vmem:[#allocation34_spill] sm:$0xff] }
 0x4d4   : > { %vm1438_vm15 = vmand %vm5302_vm10, %vm7305_vm1  ;;  %v1570_v60 = vsel %vm1563_vm8, %v4115_v21, %v4113_v17  ;;  %v1571_v11 = vsel %vm1563_vm8, %v4113_v17, %v4115_v21  ;;  %vm7031_vm7 = vcmp.lt.s32.totalorder %v3781_v25, 115  ;;  %v1465_v14 = vrot.slane %v1458_v44, %v4358_v27  ;;  %2910 = vrot.lane.b32.xlu1 %v4111_v16, %s3561_s30  ;;  %2908 = vrot.lane.b32.xlu0 %v4109_v15, %s3561_s30 }
 0x4d5   : > { %vm7306_vm14 = vcmp.ge.s32.totalorder %v4351_v45, 1  ;;  %v1496_v58 = vcombine.low %v1492_v46, %v1493_v37  ;;  %vm2051_vm1 = vcmp.lt.s32.totalorder %v3781_v25, 114  ;;  %v7310_v10 = vstv %s4360_s20  ;;  %s5404_s20 = sld [smem:[#allocation6 + $0x11]] }
 0x4d6   : > { %vm5348_vm10 = vmand %vm5225_vm0, %vm7306_vm14  ;;  %v5362_v32 = vmul.f32 %v7310_v10, %v1526_v43  ;;  %v1467_v61 = vsel %vm1438_vm15, %v1465_v14, 0.0  ;;  %v7311_v42 = vmov %v7310_v10  ;;  %v7312_v35 = vstv %s4362_s19  ;;  %s7317_s19 = sld [smem:[#allocation80_spill]]  ;;  %v1607_v15 = vpop.permute.xlu1 %1606  ;;  %v1605_v18 = vpop.permute.xlu0 %1604 }
 0x4d7   : > { %v1503_v56 = vrot.slane %v1496_v58, %v4358_v27  ;;  %v5372_v24 = vmul.f32 %v7311_v42, %v1525_v19  ;;  %v5376_v36 = vmul.f32 %v7312_v35, %v1571_v11  ;;  %v7313_v28 = vmov %v7312_v35  ;;  %v7331_v58 = vld [vmem:[#allocation38_spill] sm:$0xff] }
 0x4d8   : > { %v5380_v12 = vmul.f32 %v7313_v28, %v1570_v60  ;;  %v1468_v7 = vadd.f32 %v1467_v61, %v1423_v0  ;;  %vm7314_vm14 = vcmp.lt.s32.totalorder %v4351_v45, 17  ;;  %v1615_v49 = vsel %vm1608_vm3, %v4123_v31, %v4121_v22  ;;  %v7332_v61 = vld [vmem:[#allocation31_spill] sm:$0xff] }
 0x4d9   : > { %vm5386_vm15 = vmand %vm5348_vm10, %vm7314_vm14  ;;  %v1616_v51 = vsel %vm1608_vm3, %v4121_v22, %v4123_v31  ;;  %v1661_v62 = vsel %vm1653_vm6, %v4129_v1, %v4131_v2  ;;  %vm2096_vm10 = vcmp.lt.s32.totalorder %v3781_v25, 113  ;;  %v1510_v63 = vrot.slane %v1503_v56, %v4358_v27  ;;  %v7319_v31 = vld [vmem:[#allocation32_spill] sm:$0xff]  ;;  %2917 = vrot.lane.b32.xlu1 %v7332_v61, %s3561_s30 }
 0x4da   : > { %v1660_v22 = vsel %vm1653_vm6, %v4131_v2, %v4129_v1  ;;  %v1705_v29 = vsel %vm1698_vm12, %v7319_v31, %v4137_v4  ;;  %v1706_v40 = vsel %vm1698_vm12, %v4137_v4, %v7319_v31  ;;  %v1753_v16 = vsel %vm1746_vm13, %v7321_v33, %v7320_v57  ;;  %v7322_v2 = vld [vmem:[#allocation35_spill] sm:$0xff]  ;;  %v7339_v31 = vld [vmem:[#allocation40_spill] sm:$0xff] }
 0x4db   : > { %vm2141_vm14 = vcmp.lt.s32.totalorder %v3781_v25, 112  ;;  %v1754_v1 = vsel %vm1746_vm13, %v7320_v57, %v7321_v33  ;;  %v1798_v4 = vsel %vm7027_vm2, %v7323_v38, %v7322_v2  ;;  %v1799_v6 = vsel %vm7027_vm2, %v7322_v2, %v7323_v38  ;;  %v7340_v57 = vld [vmem:[#allocation41_spill] sm:$0xff]  ;;  %v7341_v33 = vld [vmem:[#allocation42_spill] sm:$0xff]  ;;  %v1650_v2 = vpop.permute.xlu0 %1649 }
 0x4dc   : > { %v1512_v30 = vsel %vm5386_vm15, %v1510_v63, 0.0  ;;  %v7324_v8 = vstv %s7317_s19  ;;  %v7326_v44 = vstv %s7318_s25  ;;  %vm2186_vm2 = vcmp.lt.s32.totalorder %v3781_v25, 111  ;;  %s6130_s19 = sld [smem:[#allocation6 + $0x23]]  ;;  %s6326_s25 = sld [smem:[#allocation6 + $0x28]] }
 0x4dd   : > { %v5441_v9 = vmul.f32 %v7324_v8, %v1616_v51  ;;  %v7325_v20 = vmov %v7324_v8  ;;  %v5449_v46 = vmul.f32 %v7326_v44, %v1661_v62  ;;  %v5452_v37 = vadd.f32 %v1512_v30, %v1468_v7  ;;  %v7337_v62 = vld [vmem:[#allocation30_spill] sm:$0xff]  ;;  %v7344_v30 = vld [vmem:[#allocation43_spill] sm:$0xff]  ;;  %v7345_v8 = vld [vmem:[#allocation44_spill] sm:$0xff] }
 0x4de   : > { %v5445_v50 = vmul.f32 %v7325_v20, %v1615_v49  ;;  %v7327_v19 = vmov %v7326_v44  ;;  %v7328_v0 = vstv %s4374_s21  ;;  %v1875_v10 = vsel %vm7030_vm5, %v7331_v58, %v7330_v13  ;;  %2915 = vrot.lane.b32.xlu0 %v7337_v62, %s3561_s30  ;;  %s7342_s21 = sld [smem:[#allocation85_spill]]  ;;  %s6290_s30 = sld [smem:[#allocation6 + $0x27]] }
 0x4df   : > { %v5456_v43 = vmul.f32 %v7327_v19, %v1660_v22  ;;  %v5460_v60 = vmul.f32 %v7328_v0, %v1706_v40  ;;  %v7329_v11 = vmov %v7328_v0  ;;  %v7333_v56 = vstv %s4376_s6  ;;  %v7338_v22 = vld [vmem:[#allocation39_spill] sm:$0xff]  ;;  %v7346_v19 = vld [vmem:[#allocation45_spill] sm:$0xff]  ;;  %v7347_v0 = vld [vmem:[#allocation46_spill] sm:$0xff]  ;;  %s7362_s6 = sld [smem:[#allocation86_spill]] }
 0x4e0   : > { %v5464_v14 = vmul.f32 %v7329_v11, %v1705_v29  ;;  %v5477_v42 = vmul.f32 %v7333_v56, %v1754_v1  ;;  %v7334_v35 = vmov %v7333_v56  ;;  %v7335_v7 = vstv %s4382_s24  ;;  %v1652_v1 = vpop.permute.xlu1 %1651  ;;  %s5887_s24 = sld [smem:[#allocation6 + $0x1d]] }
 0x4e1   : > { %v5481_v28 = vmul.f32 %v7334_v35, %v1753_v16  ;;  %v5485_v55 = vmul.f32 %v7335_v7, %v1799_v6  ;;  %v7336_v49 = vmov %v7335_v7  ;;  %v1876_v63 = vsel %vm7030_vm5, %v7330_v13, %v7331_v58 }
 0x4e2   : > { %v5489_v51 = vmul.f32 %v7336_v49, %v1798_v4  ;;  %v1920_v29 = vsel %vm7028_vm4, %v7339_v31, %v7338_v22  ;;  %v1921_v40 = vsel %vm7028_vm4, %v7338_v22, %v7339_v31  ;;  %v1965_v16 = vsel %vm7029_vm9, %v7341_v33, %v7340_v57 }
 0x4e3   : > { %vm7037_vm15 = vcmp.lt.s32.totalorder %v3781_v25, 110  ;;  %v7343_v38 = vstv %s4384_s18  ;;  %v1966_v6 = vsel %vm7029_vm9, %v7340_v57, %v7341_v33  ;;  %v2010_v20 = vsel %vm7031_vm7, %v7345_v8, %v7344_v30  ;;  %s5572_s18 = sld [smem:[#allocation6 + $0x14]] }
 0x4e4   : > { %v5511_v4 = vmul.f32 %v7343_v38, %v1875_v10  ;;  %v2011_v44 = vsel %vm7031_vm7, %v7344_v30, %v7345_v8  ;;  %v2058_v11 = vsel %vm2051_vm1, %v7347_v0, %v7346_v19  ;;  %vm7035_vm4 = vcmp.lt.s32.totalorder %v3781_v25, 109  ;;  %v7358_v8 = vld [vmem:[#allocation47_spill] sm:$0xff] }
 0x4e5   : > { %vm7034_vm9 = vcmp.lt.s32.totalorder %v3781_v25, 99  ;;  %v1531_v13 = vstv %s5404_s20  ;;  %vm7348_vm5 = vcmp.lt.s32.totalorder %v3781_v25, 16  ;;  %v7350_v61 = vmov %v7343_v38  ;;  %s6194_s20 = sld [smem:[#allocation6 + $0x25]] }
 0x4e6   : > { %v1519_v58 = vsel %vm7348_vm5, %v5317_v26, %v5315_v34  ;;  %vm7349_vm7 = vmmov %vm7348_vm5  ;;  %v5542_v56 = vmul.f32 %v7350_v61, %v1876_v63  ;;  %v7351_v35 = vstv %s4395_s13  ;;  %v7353_v22 = vstv %s7342_s21  ;;  %s5665_s13 = sld [smem:[#allocation6 + $0x17]]  ;;  %s6500_s21 = sld [smem:[#allocation6 + $0x2d]] }
 0x4e7   : > { %v1520_v10 = vsel %vm7349_vm7, %v5315_v34, %v5317_v26  ;;  %v5546_v7 = vmul.f32 %v7351_v35, %v1920_v29  ;;  %v7352_v49 = vmov %v7351_v35  ;;  %v5554_v31 = vmul.f32 %v7353_v22, %v1965_v16  ;;  %v1697_v29 = vpop.permute.xlu1 %1696 }
 0x4e8   : > { %v5550_v62 = vmul.f32 %v7352_v49, %v1921_v40  ;;  %v7354_v57 = vmov %v7353_v22  ;;  %v7355_v38 = vstv %s4408_s14  ;;  %v2059_v63 = vsel %vm2051_vm1, %v7346_v19, %v7347_v0  ;;  %v1695_v40 = vpop.permute.xlu0 %1694  ;;  %v7360_v0 = vld [vmem:[#allocation49_spill] sm:$0xff]  ;;  %v7361_v49 = vld [vmem:[#allocation50_spill] sm:$0xff]  ;;  %s5620_s14 = sld [smem:[#allocation6 + $0x15]] }
 0x4e9   : > { %v5558_v33 = vmul.f32 %v7354_v57, %v1966_v6  ;;  %v5562_v30 = vmul.f32 %v7355_v38, %v2010_v20  ;;  %v7356_v34 = vmov %v7355_v38  ;;  %v7357_v16 = vstv %s4410_s22  ;;  %v7359_v20 = vld [vmem:[#allocation48_spill] sm:$0xff]  ;;  %s5663_s22 = sld [smem:[#allocation6 + $0x16]] }
 0x4ea   : > { %v5566_v26 = vmul.f32 %v7356_v34, %v2011_v44  ;;  %v5576_v6 = vmul.f32 %v7357_v16, %v2058_v11  ;;  %v2103_v44 = vsel %vm2096_vm10, %v7359_v20, %v7358_v8  ;;  %v1532_v61 = vmul.f32 %v1531_v13, %v1520_v10 }
 0x4eb   : > { %v1533_v35 = vmul.f32 %v1531_v13, %v1519_v58  ;;  %v2104_v19 = vsel %vm2096_vm10, %v7358_v8, %v7359_v20  ;;  %v2148_v11 = vsel %vm2141_vm14, %v7361_v49, %v7360_v0  ;;  %v1576_v22 = vstv %s5470_s4  ;;  %s6362_s4 = sld [smem:[#allocation6 + $0x29]] }
 0x4ec   : > { %v1621_v57 = vstv %s5472_s27  ;;  %v1564_v10 = vsel %vm1563_vm8, %v5368_v41, %v5366_v23  ;;  %v1565_v13 = vsel %vm1563_vm8, %v5366_v23, %v5368_v41  ;;  %v1609_v58 = vsel %vm1608_vm3, %v1605_v18, %v1607_v15  ;;  %v7366_v23 = vld [vmem:[#allocation52_spill] sm:$0xff]  ;;  %s6379_s27 = sld [smem:[#allocation6 + $0x2a]] }
 0x4ed   : > { %v1610_v38 = vsel %vm1608_vm3, %v1607_v15, %v1605_v18  ;;  %v7363_v34 = vmov %v7357_v16  ;;  %v7364_v8 = vstv %s4416_s5  ;;  %v2149_v59 = vsel %vm2141_vm14, %v7360_v0, %v7361_v49  ;;  %v5622_v15 = vpop.permute.xlu1 %1744  ;;  %v5624_v18 = vpop.permute.xlu0 %1742  ;;  %s5979_s5 = sld [smem:[#allocation6 + $0x1e]] }
 0x4ee   : > { %v5606_v16 = vmul.f32 %v7363_v34, %v2059_v63  ;;  %v5610_v20 = vmul.f32 %v7364_v8, %v2103_v44  ;;  %v2193_v41 = vsel %vm2186_vm2, %v7366_v23, %v7365_v48  ;;  %v7367_v63 = vmov %v7364_v8 }
 0x4ef   : > { %v5628_v44 = vmul.f32 %v7367_v63, %v2104_v19  ;;  %v7368_v34 = vstv %s7362_s6  ;;  %vm7032_vm7 = vcmp.lt.s32.totalorder %v3781_v25, 98  ;;  %v1537_v0 = vadd.f32 %v5362_v32, %v1532_v61  ;;  %s6569_s6 = sld [smem:[#allocation6 + $0x2f]] }
 0x4f0   : > { %v5632_v8 = vmul.f32 %v7368_v34, %v2148_v11  ;;  %v1538_v49 = vadd.f32 %v5372_v24, %v1533_v35  ;;  %v1577_v21 = vmul.f32 %v1576_v22, %v1565_v13  ;;  %v1578_v17 = vmul.f32 %v1576_v22, %v1564_v10  ;;  %v7373_v22 = vld [vmem:[#allocation55_spill] sm:$0xff]  ;;  %v7375_v13 = vld [vmem:[#allocation57_spill] sm:$0xff] }
 0x4f1   : > { %v1622_v54 = vmul.f32 %v1621_v57, %v1610_v38  ;;  %v1623_v47 = vmul.f32 %v1621_v57, %v1609_v58  ;;  %v7369_v52 = vmov %v7368_v34  ;;  %v2194_v19 = vsel %vm2186_vm2, %v7365_v48, %v7366_v23  ;;  %v7371_v34 = vld [vmem:[#allocation53_spill] sm:$0xff]  ;;  %v1790_v61 = vpop.permute.xlu1 %1789  ;;  %v1788_v35 = vpop.permute.xlu0 %1787  ;;  %v7374_v57 = vld [vmem:[#allocation56_spill] sm:$0xff] }
 0x4f2   : > { %v5639_v39 = vmul.f32 %v7369_v52, %v2149_v59  ;;  %v7370_v11 = vstv %s4436_s12  ;;  %v2238_v32 = vsel %vm7037_vm15, %v7372_v3, %v7371_v34  ;;  %vm7033_vm8 = vcmp.lt.s32.totalorder %v3781_v25, 97 }
 0x4f3   : > { %v5647_v63 = vmul.f32 %v7370_v11, %v2193_v41  ;;  %v2239_v52 = vsel %vm7037_vm15, %v7371_v34, %v7372_v3  ;;  %v1666_v59 = vstv %s5572_s18  ;;  %v1654_v48 = vsel %vm1653_vm6, %v1650_v2, %v1652_v1  ;;  %s6539_s18 = sld [smem:[#allocation6 + $0x2e]] }
 0x4f4   : > { %v1655_v24 = vsel %vm1653_vm6, %v1652_v1, %v1650_v2  ;;  %v2283_v3 = vsel %vm7035_vm4, %v7374_v57, %v7373_v22  ;;  %v2284_v10 = vsel %vm7035_vm4, %v7373_v22, %v7374_v57  ;;  %v7376_v1 = vld [vmem:[#allocation58_spill] sm:$0xff]  ;;  %v1541_v58 = vcombine.low %v1537_v0, %v1538_v49 }
 0x4f5   : > { %v2328_v2 = vsel %vm7034_vm9, %v7376_v1, %v7375_v13  ;;  %v1582_v38 = vadd.f32 %v5376_v36, %v1577_v21  ;;  %v1583_v23 = vadd.f32 %v5380_v12, %v1578_v17  ;;  %v1627_v41 = vadd.f32 %v5441_v9, %v1622_v54  ;;  %v5704_v49 = vpop.permute.xlu0 %1864 }
 0x4f6   : > { %v1628_v11 = vadd.f32 %v5445_v50, %v1623_v47  ;;  %v7377_v34 = vstv %s4436_s12  ;;  %v2329_v0 = vsel %vm7034_vm9, %v7375_v13, %v7376_v1  ;;  %vm7036_vm3 = vcmp.lt.s32.totalorder %v3781_v25, 96  ;;  %v5702_v50 = vpop.permute.xlu1 %1866  ;;  %s5811_s12 = sld [smem:[#allocation6 + $0x1b]] }
 0x4f7   : > { %v5685_v22 = vmul.f32 %v7377_v34, %v2194_v19  ;;  %vm2504_vm6 = vcmp.lt.s32.totalorder %v3781_v25, 95  ;;  %v1667_v17 = vmul.f32 %v1666_v59, %v1655_v24  ;;  %v1668_v21 = vmul.f32 %v1666_v59, %v1654_v48 }
 0x4f8   : > { %v7378_v54 = vstv %s4441_s9  ;;  %v1714_v47 = vstv %s5620_s14  ;;  %v1699_v12 = vsel %vm1698_vm12, %v1695_v40, %v1697_v29  ;;  %v1700_v9 = vsel %vm1698_vm12, %v1697_v29, %v1695_v40  ;;  %s5809_s9 = sld [smem:[#allocation6 + $0x1a]]  ;;  %s6667_s14 = sld [smem:[#allocation6 + $0x61]] }
 0x4f9   : > { %v5695_v36 = vmul.f32 %v7378_v54, %v2238_v32  ;;  %v7379_v19 = vmov %v7378_v54  ;;  %v7381_v24 = vstv %s4452_s1  ;;  %v7384_v13 = vstv %s4468_s8  ;;  %s5759_s1 = sld [smem:[#allocation6 + $0x19]]  ;;  %s5981_s8 = sld [smem:[#allocation6 + $0x1f]] }
 0x4fa   : > { %v5708_v57 = vmul.f32 %v7379_v19, %v2239_v52  ;;  %v5712_v59 = vmul.f32 %v7381_v24, %v2283_v3  ;;  %v7383_v32 = vmov %v7381_v24  ;;  %v5720_v1 = vmul.f32 %v7384_v13, %v2328_v2  ;;  %v7387_v24 = vld [vmem:[#allocation59_spill] sm:$0xff] }
 0x4fb   : > { %v5716_v48 = vmul.f32 %v7383_v32, %v2284_v10  ;;  %v7385_v34 = vmov %v7384_v13  ;;  %v1548_v40 = vrot.slane %v1541_v58, %v4358_v27  ;;  %v1586_v54 = vcombine.low %v1582_v38, %v1583_v23  ;;  %v5745_v38 = vpop.permute.xlu0 %1909 }
 0x4fc   : > { %7380 = vst [vmem:[#allocation32_spill] sm:$0xff] %v5708_v57  ;;  %7382 = vst [vmem:[#allocation33_spill] sm:$0xff] %v5712_v59  ;;  %v5724_v29 = vmul.f32 %v7385_v34, %v2329_v0  ;;  %v1631_v53 = vcombine.low %v1627_v41, %v1628_v11  ;;  %v1672_v52 = vadd.f32 %v5449_v46, %v1667_v17  ;;  %v7388_v59 = vld [vmem:[#allocation60_spill] sm:$0xff]  ;;  %vm7389_vm12 = vcmp.ge.s32.totalorder %v4351_v45, 0  ;;  %v7392_v17 = vld [vmem:[#allocation61_spill] sm:$0xff] }
 0x4fd   : > { %v1673_v19 = vadd.f32 %v5456_v43, %v1668_v21  ;;  %v1715_v57 = vmul.f32 %v1714_v47, %v1700_v9  ;;  %v1716_v3 = vmul.f32 %v1714_v47, %v1699_v12  ;;  %v2376_v10 = vsel %vm7032_vm7, %v7388_v59, %v7387_v24  ;;  %vm1527_vm5 = vmand %vm5225_vm0, %vm7389_vm12  ;;  %v5743_v43 = vpop.permute.xlu1 %1911  ;;  %v7393_v21 = vld [vmem:[#allocation62_spill] sm:$0xff] }
 0x4fe   : > { %7386 = vst [vmem:[#allocation34_spill] sm:$0xff] %v5724_v29  ;;  %v2377_v2 = vsel %vm7032_vm7, %v7387_v24, %v7388_v59  ;;  %v1759_v46 = vstv %s5663_s22  ;;  %v1804_v58 = vstv %s5665_s13  ;;  %v1747_v23 = vsel %vm1746_vm13, %v5624_v18, %v5622_v15  ;;  %s7628_s22 = sld [smem:[#allocation20_spill]] }
 0x4ff   : > { %v1748_v41 = vsel %vm1746_vm13, %v5622_v15, %v5624_v18  ;;  %vm7390_vm7 = vcmp.lt.s32.totalorder %v3781_v25, 1  ;;  %v2421_v47 = vsel %vm7033_vm8, %v7393_v21, %v7392_v17  ;;  %v2422_v12 = vsel %vm7033_vm8, %v7392_v17, %v7393_v21 }
 0x500   : > { %v1792_v11 = vsel %vm7390_vm7, %v1788_v35, %v1790_v61  ;;  %vm7391_vm12 = vmmov %vm7390_vm7  ;;  %v1555_v15 = vrot.slane %v1548_v40, %v4358_v27  ;;  %v1593_v18 = vrot.slane %v1586_v54, %v4358_v27  ;;  %vm7394_vm13 = vcmp.lt.s32.totalorder %v4351_v45, 16 }
 0x501   : > { %v1793_v0 = vsel %vm7391_vm12, %v1790_v61, %v1788_v35  ;;  %vm5773_vm7 = vmand %vm1527_vm5, %vm7394_vm13  ;;  %v1638_v35 = vrot.slane %v1631_v53, %v4358_v27  ;;  %v1676_v9 = vcombine.low %v1672_v52, %v1673_v19  ;;  %v1720_v59 = vadd.f32 %v5460_v60, %v1715_v57  ;;  %v1957_v53 = vpop.permute.xlu1 %1956  ;;  %v1955_v52 = vpop.permute.xlu0 %1954 }
 0x502   : > { %v1721_v32 = vadd.f32 %v5464_v14, %v1716_v3  ;;  %vm2549_vm12 = vcmp.lt.s32.totalorder %v3781_v25, 94  ;;  %vm7397_vm8 = vcmp.ge.s32.totalorder %v4351_v45, 4294967295  ;;  %v1760_v34 = vmul.f32 %v1759_v46, %v1748_v41  ;;  %v7408_v41 = vld [vmem:[#allocation66_spill] sm:$0xff] }
 0x503   : > { %vm5785_vm9 = vmand %vm5225_vm0, %vm7397_vm8  ;;  %v1761_v40 = vmul.f32 %v1759_v46, %v1747_v23  ;;  %v1805_v54 = vmul.f32 %v1804_v58, %v1793_v0  ;;  %v1806_v24 = vmul.f32 %v1804_v58, %v1792_v11  ;;  %v7400_v19 = vstv %s4481_s2  ;;  %v7406_v46 = vld [vmem:[#allocation64_spill] sm:$0xff]  ;;  %v7407_v23 = vld [vmem:[#allocation65_spill] sm:$0xff]  ;;  %s5880_s2 = sld [smem:[#allocation6 + $0x1c]] }
 0x504   : > { %v5791_v60 = vmul.f32 %v7400_v19, %v2376_v10  ;;  %v7401_v14 = vmov %v7400_v19  ;;  %v7402_v3 = vstv %s4501_s3  ;;  %vm7404_vm8 = vcmp.ge.s32.totalorder %v4351_v45, 4294967294  ;;  %v7405_v10 = vld [vmem:[#allocation63_spill] sm:$0xff]  ;;  %s6036_s3 = sld [smem:[#allocation6 + $0x20]] }
 0x505   : > { %v5795_v57 = vmul.f32 %v7401_v14, %v2377_v2  ;;  %v5799_v17 = vmul.f32 %v7402_v3, %v2421_v47  ;;  %v7403_v21 = vmov %v7402_v3  ;;  %vm1617_vm5 = vmand %vm5225_vm0, %vm7404_vm8  ;;  %v2466_v2 = vsel %vm7036_vm3, %v7406_v46, %v7405_v10 }
 0x506   : > { %v5803_v29 = vmul.f32 %v7403_v21, %v2422_v12  ;;  %v2467_v58 = vsel %vm7036_vm3, %v7405_v10, %v7406_v46  ;;  %v2511_v11 = vsel %vm2504_vm6, %v7408_v41, %v7407_v23  ;;  %v1600_v0 = vrot.slane %v1593_v18, %v4358_v27  ;;  %v2002_v10 = vpop.permute.xlu1 %2001 }
 0x507   : > { %vm2594_vm13 = vcmp.lt.s32.totalorder %v3781_v25, 93  ;;  %v1557_v47 = vsel %vm5773_vm7, %v1555_v15, 0.0  ;;  %vm7409_vm8 = vcmp.lt.s32.totalorder %v4351_v45, 15  ;;  %v1645_v19 = vrot.slane %v1638_v35, %v4358_v27  ;;  %v2000_v35 = vpop.permute.xlu0 %1999 }
 0x508   : > { %vm5833_vm4 = vmand %vm5785_vm9, %vm7409_vm8  ;;  %v1683_v14 = vrot.slane %v1676_v9, %v4358_v27  ;;  %v1724_v18 = vcombine.low %v1720_v59, %v1721_v32  ;;  %vm7412_vm3 = vcmp.lt.s32.totalorder %v4351_v45, 14  ;;  %v1765_v15 = vadd.f32 %v5477_v42, %v1760_v34 }
 0x509   : > { %vm5841_vm15 = vmand %vm1617_vm5, %vm7412_vm3  ;;  %v1766_v13 = vadd.f32 %v5481_v28, %v1761_v40  ;;  %v1810_v3 = vadd.f32 %v5485_v55, %v1805_v54  ;;  %v1811_v21 = vadd.f32 %v5489_v51, %v1806_v24  ;;  %v7415_v46 = vstv %s5151_s28  ;;  %s2987_s28 = scalar_lea.sflag [#allocation4], %s7628_s22 }
 0x50a   : > { %v5851_v9 = vmul.f32 %v7415_v46, %v2466_v2  ;;  %vm7416_vm9 = vcmp.ge.s32.totalorder %v4351_v45, 4294967293  ;;  %v1881_v59 = vstv %s5759_s1  ;;  %vm7417_vm7 = vcmp.lt.s32.totalorder %v3781_v25, 127  ;;  %s7631_s1 = sshll.u32 %s7628_s22, 6 }
 0x50b   : > { %vm1662_vm3 = vmand %vm5225_vm0, %vm7416_vm9  ;;  %v1869_v42 = vsel %vm7417_vm7, %v5704_v49, %v5702_v50  ;;  %v7419_v55 = vmov %v7415_v46  ;;  %v2512_v5 = vsel %vm2504_vm6, %v7407_v23, %v7408_v41  ;;  %v7420_v32 = vstv %s5168_s26 }
 0x50c   : > { %vm7418_vm5 = vmmov %vm7417_vm7  ;;  %v5868_v51 = vmul.f32 %v7419_v55, %v2467_v58  ;;  %v5876_v34 = vmul.f32 %v7420_v32, %v2511_v11  ;;  %v1602_v40 = vsel %vm5833_vm4, %v1600_v0, 0.0  ;;  %v1690_v54 = vrot.slane %v1683_v14, %v4358_v27  ;;  %v2050_v11 = vpop.permute.xlu1 %2049  ;;  %v2048_v0 = vpop.permute.xlu0 %2047 }
 0x50d   : > { %v1870_v28 = vsel %vm7418_vm5, %v5702_v50, %v5704_v49  ;;  %v1558_v50 = vadd.f32 %v1557_v47, %v5452_v37  ;;  %v1647_v49 = vsel %vm5841_vm15, %v1645_v19, 0.0  ;;  %v1731_v24 = vrot.slane %v1724_v18, %v4358_v27 }
 0x50e   : > { %vm7421_vm0 = vcmp.lt.s32.totalorder %v4351_v45, 13  ;;  %v1769_v58 = vcombine.low %v1765_v15, %v1766_v13  ;;  %v1814_v23 = vcombine.low %v1810_v3, %v1811_v21  ;;  %v1882_v41 = vmul.f32 %v1881_v59, %v1869_v42  ;;  %v7434_v42 = vld [vmem:[#allocation68_spill] sm:$0xff] }
 0x50f   : > { %vm5891_vm8 = vmand %vm1662_vm3, %vm7421_vm0  ;;  %v1883_v37 = vmul.f32 %v1881_v59, %v1870_v28  ;;  %v7424_v47 = vmov %v7420_v32  ;;  %vm2639_vm4 = vcmp.lt.s32.totalorder %v3781_v25, 83  ;;  %v1603_v19 = vadd.f32 %v1602_v40, %v1558_v50  ;;  %v7433_v59 = vld [vmem:[#allocation67_spill] sm:$0xff] }
 0x510   : > { %v5897_v12 = vmul.f32 %v7424_v47, %v2512_v5  ;;  %v1926_v14 = vstv %s5809_s9  ;;  %v1971_v18 = vstv %s5811_s12  ;;  %vm7425_vm15 = vcmp.ge.s32.totalorder %v4351_v45, 3  ;;  %v5935_v50 = vpop.permute.xlu0 %2092  ;;  %v7457_v47 = vld [vmem:[#allocation75_spill] sm:$0xff]  ;;  %s256_s9 = scalar_lea.vmem [#allocation7], %s7631_s1 }
 0x511   : > { %vm5906_vm9 = vmand %vm4388_vm11, %vm7425_vm15  ;;  %vm7429_vm3 = vcmp.lt.s32.totalorder %v3781_v25, 126  ;;  %vm7431_vm5 = vcmp.lt.s32.totalorder %v3781_v25, 125  ;;  %v2556_v28 = vsel %vm2549_vm12, %v7434_v42, %v7433_v59  ;;  %v1648_v55 = vadd.f32 %v1647_v49, %v1603_v19  ;;  %s3000_s12 = sshll.u32 %s256_s9, 4  ;;  %s6785_s12 = int_to_ptr.vmem [resolvable:$true] %s3000_s12 }
 0x512   : > { %v1914_v15 = vsel %vm7429_vm3, %v5745_v38, %v5743_v43  ;;  %vm7430_vm7 = vmmov %vm7429_vm3  ;;  %v1959_v3 = vsel %vm7431_vm5, %v1955_v52, %v1957_v53  ;;  %v1692_v5 = vsel %vm5891_vm8, %v1690_v54, 0.0  ;;  %v1738_v32 = vrot.slane %v1731_v24, %v4358_v27  ;;  %s3434_s26 = scalar_lea.vmem %s6785_s12, 1024 }
 0x513   : > { %v1915_v13 = vsel %vm7430_vm7, %v5743_v43, %v5745_v38  ;;  %vm7432_vm0 = vmmov %vm7431_vm5  ;;  %v1776_v43 = vrot.slane %v1769_v58, %v4358_v27  ;;  %v1821_v38 = vrot.slane %v1814_v23, %v4358_v27  ;;  %v1887_v40 = vadd.f32 %v5511_v4, %v1882_v41  ;;  %v7439_v23 = vld [vmem:[#allocation70_spill] sm:$0xff]  ;;  %p3435_p5 = scmp.ne.s32.totalorder %s6785_s12, %s3434_s26 }
 0x514   : > { %v1960_v21 = vsel %vm7432_vm0, %v1957_v53, %v1955_v52  ;;  %v1888_v53 = vadd.f32 %v5542_v56, %v1883_v37  ;;  %v5933_v52 = vpop.permute.xlu1 %2094  ;;  %vm7435_vm15 = vcmp.lt.s32.totalorder %v4351_v45, 19  ;;  %v1927_v54 = vmul.f32 %v1926_v14, %v1914_v15  ;;  %v7438_v56 = vld [vmem:[#allocation69_spill] sm:$0xff] }
 0x515   : > { %vm5941_vm8 = vmand %vm5906_vm9, %vm7435_vm15  ;;  %v1928_v24 = vmul.f32 %v1926_v14, %v1915_v13  ;;  %v1972_v2 = vmul.f32 %v1971_v18, %v1959_v3  ;;  %v1973_v58 = vmul.f32 %v1971_v18, %v1960_v21  ;;  %v2557_v4 = vsel %vm2549_vm12, %v7433_v59, %v7434_v42 }
 0x516   : > { %v2601_v41 = vsel %vm2594_vm13, %v7439_v23, %v7438_v56  ;;  %v2602_v37 = vsel %vm2594_vm13, %v7438_v56, %v7439_v23  ;;  %vm7440_vm9 = vcmp.ge.s32.totalorder %v4351_v45, 2  ;;  %v2019_v19 = vstv %s5880_s2  ;;  %v7456_v23 = vld [vmem:[#allocation74_spill] sm:$0xff] }
 0x517   : > { %vm5961_vm3 = vmand %vm4388_vm11, %vm7440_vm9  ;;  %v1693_v14 = vadd.f32 %v1692_v5, %v1648_v55  ;;  %vm7443_vm7 = vcmp.ge.s32.totalorder %v4351_v45, 1  ;;  %vm7446_vm0 = vcmp.lt.s32.totalorder %v3781_v25, 115  ;;  %v2064_v13 = vstv %s5887_s24  ;;  %v2138_v5 = vpop.permute.xlu0 %2137 }
 0x518   : > { %vm5970_vm5 = vmand %vm4388_vm11, %vm7443_vm7  ;;  %v2004_v46 = vsel %vm7446_vm0, %v2000_v35, %v2002_v10  ;;  %v1740_v3 = vsel %vm5941_vm8, %v1738_v32, 0.0  ;;  %v1783_v21 = vrot.slane %v1776_v43, %v4358_v27  ;;  %v1828_v59 = vrot.slane %v1821_v38, %v4358_v27  ;;  %v2140_v55 = vpop.permute.xlu1 %2139 }
 0x519   : > { %vm7447_vm15 = vmmov %vm7446_vm0  ;;  %v1891_v42 = vcombine.low %v1887_v40, %v1888_v53  ;;  %vm2687_vm9 = vcmp.lt.s32.totalorder %v3781_v25, 82  ;;  %vm7448_vm7 = vcmp.lt.s32.totalorder %v4351_v45, 18  ;;  %v1933_v32 = vadd.f32 %v5550_v62, %v1928_v24 }
 0x51a   : > { %v2005_v15 = vsel %vm7447_vm15, %v2002_v10, %v2000_v35  ;;  %vm5992_vm0 = vmand %vm5961_vm3, %vm7448_vm7  ;;  %v1932_v35 = vadd.f32 %v5546_v7, %v1927_v54  ;;  %v1977_v43 = vadd.f32 %v5554_v31, %v1972_v2  ;;  %v1978_v38 = vadd.f32 %v5558_v33, %v1973_v58 }
 0x51b   : > { %vm7451_vm8 = vcmp.lt.s32.totalorder %v4351_v45, 17  ;;  %v2020_v40 = vmul.f32 %v2019_v19, %v2004_v46  ;;  %v2021_v53 = vmul.f32 %v2019_v19, %v2005_v15  ;;  %v2052_v49 = vsel %vm2051_vm1, %v2048_v0, %v2050_v11  ;;  %v2183_v15 = vpop.permute.xlu0 %2182 }
 0x51c   : > { %vm1801_vm15 = vmand %vm5970_vm5, %vm7451_vm8  ;;  %v2053_v56 = vsel %vm2051_vm1, %v2050_v11, %v2048_v0  ;;  %v7452_v7 = vstv %s5195_s7  ;;  %v7454_v33 = vstv %s5217_s23  ;;  %v2646_v19 = vsel %vm2639_vm4, %v7457_v47, %v7456_v23  ;;  %s7461_s7 = sld [smem:[#allocation98_spill]]  ;;  %s6073_s23 = sld [smem:[#allocation6 + $0x21]] }
 0x51d   : > { %v6010_v54 = vmul.f32 %v7452_v7, %v2556_v28  ;;  %v7453_v62 = vmov %v7452_v7  ;;  %v6018_v24 = vmul.f32 %v7454_v33, %v2601_v41  ;;  %v7455_v2 = vmov %v7454_v33 }
 0x51e   : > { %v6014_v31 = vmul.f32 %v7453_v62, %v2557_v4  ;;  %v6022_v58 = vmul.f32 %v7455_v2, %v2602_v37  ;;  %v6032_v11 = vsel %vm2639_vm4, %v7456_v23, %v7457_v47  ;;  %v1741_v0 = vadd.f32 %v1740_v3, %v1693_v14  ;;  %v2185_v4 = vpop.permute.xlu1 %2184 }
 0x51f   : > { %v1785_v28 = vsel %vm5992_vm0, %v1783_v21, 0.0  ;;  %v1830_v41 = vsel %vm1801_vm15, %v1828_v59, 0.0  ;;  %v1898_v37 = vrot.slane %v1891_v42, %v4358_v27  ;;  %v2065_v18 = vmul.f32 %v2064_v13, %v2052_v49 }
 0x520   : > { %v2066_v46 = vmul.f32 %v2064_v13, %v2053_v56  ;;  %v1936_v7 = vcombine.low %v1932_v35, %v1933_v32  ;;  %v1981_v62 = vcombine.low %v1977_v43, %v1978_v38  ;;  %v2025_v33 = vadd.f32 %v5562_v30, %v2020_v40 }
 0x521   : > { %v2026_v14 = vadd.f32 %v5566_v26, %v2021_v53  ;;  %vm2732_vm1 = vcmp.lt.s32.totalorder %v3781_v25, 81  ;;  %v1786_v3 = vadd.f32 %v1785_v28, %v1741_v0  ;;  %vm7458_vm3 = vcmp.ge.s32.totalorder %v4351_v45, 4294967295  ;;  %v2228_v53 = vpop.permute.xlu0 %2227  ;;  %v7469_v28 = vld [vmem:[#allocation78_spill] sm:$0xff] }
 0x522   : > { %vm6046_vm5 = vmand %vm4388_vm11, %vm7458_vm3  ;;  %v6053_v13 = vld [vmem:[%s7461_s7] ss:$2 sm:$0x3]  ;;  %v2109_v30 = vstv %s5979_s5  ;;  %v2154_v26 = vstv %s5981_s8  ;;  %v2097_v59 = vsel %vm2096_vm10, %v5935_v50, %v5933_v52  ;;  %v2098_v42 = vsel %vm2096_vm10, %v5933_v52, %v5935_v50  ;;  %v2230_v32 = vpop.permute.xlu1 %2229  ;;  %s7636_s5 = sld [smem:[#allocation99_spill]]  ;;  %s3562_s7 = smov [#allocation7]  }
 0x523   : > { %vm2012_vm7 = vcmp.ge.s32.totalorder %v6053_v13, 4294967295  ;;  %v2142_v10 = vsel %vm2141_vm14, %v2138_v5, %v2140_v55  ;;  %v2143_v35 = vsel %vm2141_vm14, %v2140_v55, %v2138_v5  ;;  %v1831_v43 = vadd.f32 %v1830_v41, %v1786_v3  ;;  %v7470_v41 = vld [vmem:[#allocation79_spill] sm:$0xff] }
 0x524   : > { %vm2013_vm0 = vcmp.lt.s32.totalorder %v6053_v13, 15  ;;  %v2070_v38 = vadd.f32 %v5576_v6, %v2065_v18  ;;  %v2071_v40 = vadd.f32 %v5606_v16, %v2066_v46  ;;  %vm7462_vm10 = vcmp.lt.s32.totalorder %v4351_v45, 15 }
 0x525   : > { %vm6079_vm8 = vmand %vm6046_vm5, %vm7462_vm10  ;;  %v1905_v50 = vrot.slane %v1898_v37, %v4358_v27  ;;  %v1943_v55 = vrot.slane %v1936_v7, %v4358_v27  ;;  %v1988_v6 = vrot.slane %v1981_v62, %v4358_v27  ;;  %v2029_v5 = vcombine.low %v2025_v33, %v2026_v14  ;;  %v7474_v62 = vld [vmem:[#allocation91_spill] sm:$0xff]  ;;  %v7550_v14 = vld [vmem:[#allocation89_spill] sm:$0xff] }
 0x526   : > { %vm7465_vm14 = vcmp.ge.s32.totalorder %v4351_v45, 4294967294  ;;  %v2110_v49 = vmul.f32 %v2109_v30, %v2097_v59  ;;  %v2111_v56 = vmul.f32 %v2109_v30, %v2098_v42  ;;  %v2155_v2 = vmul.f32 %v2154_v26, %v2142_v10  ;;  %v2275_v7 = vpop.permute.xlu1 %2274  ;;  %vm6120_vm10 = vmand %vm2012_vm7, %vm2013_vm0  ;;  %v2273_v30 = vpop.permute.xlu0 %2272 }
 0x527   : > { %vm6090_vm15 = vmand %vm4388_vm11, %vm7465_vm14  ;;  %v2156_v23 = vmul.f32 %v2154_v26, %v2143_v35  ;;  %v7468_v47 = vstv %s5219_s0  ;;  %v2694_v37 = vsel %vm2687_vm9, %v7470_v41, %v7469_v28  ;;  %v2695_v18 = vsel %vm2687_vm9, %v7469_v28, %v7470_v41  ;;  %v7492_v28 = vld [vmem:[#allocation83_spill] sm:$0xff]  ;;  %s6192_s0 = sld [smem:[#allocation6 + $0x24]] }
 0x528   : > { %v6096_v0 = vmul.f32 %v7468_v47, %v2646_v19  ;;  %vm7471_vm3 = vcmp.ge.s32.totalorder %v4351_v45, 4294967293  ;;  %v2199_v19 = vstv %s6036_s3  ;;  %v1863_v33 = vadd.f32 %v7474_v62, %v1831_v43  ;;  %s7639_s3 = sld [smem:[#allocation18_spill]] }
 0x529   : > { %vm6110_vm5 = vmand %vm4388_vm11, %vm7471_vm3  ;;  %v2074_v3 = vcombine.low %v2070_v38, %v2071_v40  ;;  %v2187_v61 = vsel %vm2186_vm2, %v2183_v15, %v2185_v4  ;;  %v2188_v21 = vsel %vm2186_vm2, %v2185_v4, %v2183_v15  ;;  %v1907_v26 = vsel %vm6079_vm8, %v1905_v50, 0.0 }
 0x52a   : > { %vm7477_vm11 = vcmp.lt.s32.totalorder %v4351_v45, 14  ;;  %v1950_v42 = vrot.slane %v1943_v55, %v4358_v27  ;;  %v1995_v4 = vrot.slane %v1988_v6, %v4358_v27  ;;  %v2036_v15 = vrot.slane %v2029_v5, %v4358_v27 }
 0x52b   : > { %vm6138_vm7 = vmand %vm6090_vm15, %vm7477_vm11  ;;  %vm7480_vm2 = vcmp.lt.s32.totalorder %v4351_v45, 13  ;;  %v2115_v35 = vadd.f32 %v5610_v20, %v2110_v49  ;;  %v2116_v43 = vadd.f32 %v5628_v44, %v2111_v56  ;;  %v2160_v38 = vadd.f32 %v5632_v8, %v2155_v2  ;;  %v2320_v8 = vpop.permute.xlu1 %2319  ;;  %v2318_v56 = vpop.permute.xlu0 %2317 }
 0x52c   : > { %vm6149_vm0 = vmand %vm6110_vm5, %vm7480_vm2  ;;  %v2161_v40 = vadd.f32 %v5639_v39, %v2156_v23  ;;  %v7483_v52 = vmov %v7468_v47  ;;  %v7484_v55 = vstv %s5239_s15  ;;  %vm7485_vm8 = vcmp.ge.s32.totalorder %v4351_v45, 3  ;;  %v7491_v47 = vld [vmem:[#allocation82_spill] sm:$0xff]  ;;  %s6245_s15 = sld [smem:[#allocation6 + $0x26]] }
 0x52d   : > { %v6160_v50 = vmul.f32 %v7483_v52, %v6032_v11  ;;  %v6164_v6 = vmul.f32 %v7484_v55, %v2694_v37  ;;  %vm6170_vm14 = vmand %vm6120_vm10, %vm7485_vm8  ;;  %v2200_v20 = vmul.f32 %v2199_v19, %v2187_v61  ;;  %v2201_v44 = vmul.f32 %v2199_v19, %v2188_v21 }
 0x52e   : > { %v2081_v39 = vrot.slane %v2074_v3, %v4358_v27  ;;  %v2244_v16 = vstv %s6073_s23  ;;  %vm7488_vm15 = vcmp.lt.s32.totalorder %v3781_v25, 110  ;;  %v7490_v2 = vmov %v7484_v55  ;;  %p7642_p12 = scmp.ne.s32.totalorder %s7639_s3, 0  ;;  %s3438_s23 = sshll.u32 %s3562_s7, 4  ;;  %s3439_s23 = int_to_ptr.vmem [resolvable:$false] %s3438_s23 }
 0x52f   : > { %v2232_v11 = vsel %vm7488_vm15, %v2228_v53, %v2230_v32  ;;  %vm7489_vm3 = vmmov %vm7488_vm15  ;;  %v6182_v23 = vmul.f32 %v7490_v2, %v2695_v18  ;;  %v6188_v41 = vsel %vm2732_vm1, %v7492_v28, %v7491_v47  ;;  %v1908_v37 = vadd.f32 %v1907_v26, %v1863_v33  ;;  %v2368_v59 = vpop.permute.xlu1 %2367  ;;  %p3441_p10 = scmp.lt.s32.totalorder %s6785_s12, %s3439_s23 }
 0x530   : > { %v2233_v49 = vsel %vm7489_vm3, %v2230_v32, %v2228_v53  ;;  %v1952_v46 = vsel %vm6138_vm7, %v1950_v42, 0.0  ;;  %v1997_v32 = vsel %vm6149_vm0, %v1995_v4, 0.0  ;;  %vm7493_vm5 = vcmp.lt.s32.totalorder %v4351_v45, 19  ;;  %p3436_p8 = pnand %p3435_p5, %p7642_p12 }
 0x531   : > { %vm6202_vm11 = vmand %vm6170_vm14, %vm7493_vm5  ;;  %v2043_v18 = vrot.slane %v2036_v15, %v4358_v27  ;;  %v2119_v19 = vcombine.low %v2115_v35, %v2116_v43  ;;  %v2164_v62 = vcombine.low %v2160_v38, %v2161_v40  ;;  %vm7496_vm7 = vcmp.ge.s32.totalorder %v4351_v45, 2  ;;  %v2366_v35 = vpop.permute.xlu0 %2365 }
 0x532   : > { %vm6211_vm2 = vmand %vm6120_vm10, %vm7496_vm7  ;;  %v2205_v3 = vadd.f32 %v5647_v63, %v2200_v20  ;;  %v2206_v61 = vadd.f32 %v5685_v22, %v2201_v44  ;;  %v2245_v21 = vmul.f32 %v2244_v16, %v2232_v11  ;;  %v2246_v26 = vmul.f32 %v2244_v16, %v2233_v49  ;;  %p3437_p9 = pneg %p3436_p8 }
 0x533   : > { %v1953_v42 = vadd.f32 %v1952_v46, %v1908_v37  ;;  %v2088_v4 = vrot.slane %v2081_v39, %v4358_v27  ;;  %v2289_v15 = vstv %s6128_s11  ;;  %v2337_v10 = vstv %s6130_s19  ;;  %v2413_v16 = vpop.permute.xlu1 %2412  ;;  %s3440_s11 = scalar_lea.vmem %s3439_s23, 2048 }
 0x534   : > { %vm7499_vm0 = vcmp.lt.s32.totalorder %v3781_v25, 109  ;;  %vm7501_vm14 = vcmp.lt.s32.totalorder %v3781_v25, 99  ;;  %v6232_v40 = vsel %vm2732_vm1, %v7491_v47, %v7492_v28  ;;  %v2045_v55 = vsel %vm6202_vm11, %v2043_v18, 0.0  ;;  %p3442_p1 = scmp.lt.s32.totalorder %s3440_s11, %s3434_s26 }
 0x535   : > { %v2277_v43 = vsel %vm7499_vm0, %v2273_v30, %v2275_v7  ;;  %vm7500_vm8 = vmmov %vm7499_vm0  ;;  %v2322_v63 = vsel %vm7501_vm14, %v2318_v56, %v2320_v8  ;;  %v1998_v52 = vadd.f32 %v1997_v32, %v1953_v42  ;;  %vm7503_vm3 = vcmp.lt.s32.totalorder %v4351_v45, 18  ;;  %v2411_v28 = vpop.permute.xlu0 %2410 }
 0x536   : > { %v2278_v38 = vsel %vm7500_vm8, %v2275_v7, %v2273_v30  ;;  %vm7502_vm15 = vmmov %vm7501_vm14  ;;  %v2126_v30 = vrot.slane %v2119_v19, %v4358_v27  ;;  %v2171_v5 = vrot.slane %v2164_v62, %v4358_v27  ;;  %v2209_v20 = vcombine.low %v2205_v3, %v2206_v61  ;;  %v7538_v3 = vld [vmem:[#allocation88_spill] sm:$0xff]  ;;  %p3443_p4 = por %p3442_p1, %p3441_p10 }
 0x537   : > { %v2323_v22 = vsel %vm7502_vm15, %v2320_v8, %v2318_v56  ;;  %vm6240_vm5 = vmand %vm6211_vm2, %vm7503_vm3  ;;  %v2250_v44 = vadd.f32 %v5695_v36, %v2245_v21  ;;  %v7506_v8 = vld [vmem:[#allocation32_spill] sm:$0xff]  ;;  %vm2777_vm11 = vcmp.lt.s32.totalorder %v3781_v25, 80  ;;  %vm7507_vm7 = vcmp.ge.s32.totalorder %v4351_v45, 1  ;;  %v2458_v42 = vpop.permute.xlu1 %2457 }
 0x538   : > { %v2251_v39 = vadd.f32 %v7506_v8, %v2246_v26  ;;  %vm6255_vm2 = vmand %vm6120_vm10, %vm7507_vm7  ;;  %v2290_v49 = vmul.f32 %v2289_v15, %v2277_v43  ;;  %v2291_v56 = vmul.f32 %v2289_v15, %v2278_v38  ;;  %v2338_v2 = vmul.f32 %v2337_v10, %v2322_v63  ;;  %v7523_v15 = vld [vmem:[#allocation33_spill] sm:$0xff]  ;;  %v7524_v38 = vld [vmem:[#allocation34_spill] sm:$0xff]  ;;  %p3444_p11 = pnand %p3443_p4, %p3437_p9 }
 0x539   : > { %v2339_v47 = vmul.f32 %v2337_v10, %v2323_v22  ;;  %v2046_v37 = vadd.f32 %v2045_v55, %v1998_v52  ;;  %v2090_v36 = vsel %vm6240_vm5, %v2088_v4, 0.0  ;;  %vm7510_vm0 = vcmp.ge.s32.totalorder %v4351_v45, 0  ;;  %v2456_v22 = vpop.permute.xlu0 %2455 }
 0x53a   : > { %vm6265_vm8 = vmand %vm6120_vm10, %vm7510_vm0  ;;  %v2382_v32 = vstv %s6192_s0  ;;  %v2427_v53 = vstv %s6194_s20  ;;  %vm7513_vm14 = vcmp.lt.s32.totalorder %v3781_v25, 98  ;;  %vm7515_vm3 = vcmp.lt.s32.totalorder %v3781_v25, 97 }
 0x53b   : > { %v2370_v18 = vsel %vm7513_vm14, %v2366_v35, %v2368_v59  ;;  %vm7514_vm15 = vmmov %vm7513_vm14  ;;  %v2415_v62 = vsel %vm7515_vm3, %v2411_v28, %v2413_v16  ;;  %vm7517_vm7 = vcmp.lt.s32.totalorder %v4351_v45, 17  ;;  %v2133_v61 = vrot.slane %v2126_v30, %v4358_v27 }
 0x53c   : > { %v2371_v19 = vsel %vm7514_vm15, %v2368_v59, %v2366_v35  ;;  %vm7516_vm5 = vmmov %vm7515_vm3  ;;  %v2178_v21 = vrot.slane %v2171_v5, %v4358_v27  ;;  %v2216_v26 = vrot.slane %v2209_v20, %v4358_v27  ;;  %v2254_v59 = vcombine.low %v2250_v44, %v2251_v39 }
 0x53d   : > { %v2416_v33 = vsel %vm7516_vm5, %v2413_v16, %v2411_v28  ;;  %vm6283_vm0 = vmand %vm6255_vm2, %vm7517_vm7  ;;  %vm2822_vm14 = vcmp.lt.s32.totalorder %v3781_v25, 79  ;;  %vm7520_vm15 = vcmp.lt.s32.totalorder %v4351_v45, 16  ;;  %v2295_v10 = vadd.f32 %v7523_v15, %v2290_v49  ;;  %v2503_v16 = vpop.permute.xlu1 %2502 }
 0x53e   : > { %vm6297_vm2 = vmand %vm6265_vm8, %vm7520_vm15  ;;  %v2296_v35 = vadd.f32 %v5716_v48, %v2291_v56  ;;  %v2343_v43 = vadd.f32 %v5720_v1, %v2338_v2  ;;  %v2344_v63 = vadd.f32 %v7524_v38, %v2339_v47  ;;  %v2383_v52 = vmul.f32 %v2382_v32, %v2370_v18  ;;  %v2501_v47 = vpop.permute.xlu0 %2500 }
 0x53f   : > { %v2384_v55 = vmul.f32 %v2382_v32, %v2371_v19  ;;  %v2428_v7 = vmul.f32 %v2427_v53, %v2415_v62  ;;  %v2429_v30 = vmul.f32 %v2427_v53, %v2416_v33  ;;  %v2091_v5 = vadd.f32 %v2090_v36, %v2046_v37 }
 0x540   : > { %vm7525_vm3 = vcmp.ge.s32.totalorder %v4351_v45, 4294967295  ;;  %vm2330_vm5 = vcmp.ge.s32.totalorder %v6053_v13, 4294967294  ;;  %vm2331_vm7 = vcmp.lt.s32.totalorder %v6053_v13, 14  ;;  %v2472_v48 = vstv %s6245_s15 }
 0x541   : > { %vm6309_vm8 = vmand %vm6120_vm10, %vm7525_vm3  ;;  %v2135_v1 = vsel %vm6283_vm0, %v2133_v61, 0.0  ;;  %v2180_v44 = vsel %vm6297_vm2, %v2178_v21, 0.0  ;;  %vm7528_vm15 = vcmp.lt.s32.totalorder %v3781_v25, 96  ;;  %v2223_v11 = vrot.slane %v2216_v26, %v4358_v27  ;;  %v2548_v21 = vpop.permute.xlu1 %2547 }
 0x542   : > { %v2460_v8 = vsel %vm7528_vm15, %v2456_v22, %v2458_v42  ;;  %vm7529_vm3 = vmmov %vm7528_vm15  ;;  %v2261_v49 = vrot.slane %v2254_v59, %v4358_v27  ;;  %v2299_v56 = vcombine.low %v2295_v10, %v2296_v35  ;;  %v2347_v2 = vcombine.low %v2343_v43, %v2344_v63  ;;  %v2546_v10 = vpop.permute.xlu0 %2545 }
 0x543   : > { %v2461_v39 = vsel %vm7529_vm3, %v2458_v42, %v2456_v22  ;;  %vm7530_vm0 = vcmp.lt.s32.totalorder %v4351_v45, 15  ;;  %v2388_v37 = vadd.f32 %v5791_v60, %v2383_v52  ;;  %v2389_v36 = vadd.f32 %v5795_v57, %v2384_v55  ;;  %v7537_v57 = vld [vmem:[#allocation87_spill] sm:$0xff] }
 0x544   : > { %vm6332_vm2 = vmand %vm6309_vm8, %vm7530_vm0  ;;  %v2433_v46 = vadd.f32 %v5799_v17, %v2428_v7  ;;  %v2434_v32 = vadd.f32 %v5803_v29, %v2429_v30  ;;  %v7533_v53 = vstv %s5253_s16  ;;  %v2136_v19 = vadd.f32 %v2135_v1, %v2091_v5  ;;  %s6440_s16 = sld [smem:[#allocation6 + $0x2b]] }
 0x545   : > { %v6343_v18 = vmul.f32 %v7533_v53, %v6188_v41  ;;  %vm7534_vm15 = vcmp.ge.s32.totalorder %v4351_v45, 4294967294  ;;  %v2473_v60 = vmul.f32 %v2472_v48, %v2460_v8  ;;  %v2474_v33 = vmul.f32 %v2472_v48, %v2461_v39 }
 0x546   : > { %vm6349_vm8 = vmand %vm6120_vm10, %vm7534_vm15  ;;  %v2784_v29 = vsel %vm2777_vm11, %v7538_v3, %v7537_v57  ;;  %v2517_v17 = vstv %s6290_s30  ;;  %v2505_v41 = vsel %vm2504_vm6, %v2501_v47, %v2503_v16  ;;  %v2506_v61 = vsel %vm2504_vm6, %v2503_v16, %v2501_v47  ;;  %v7551_v16 = vld [vmem:[#allocation90_spill] sm:$0xff] }
 0x547   : > { %v2785_v26 = vsel %vm2777_vm11, %v7537_v57, %v7538_v3  ;;  %v2181_v59 = vadd.f32 %v2180_v44, %v2136_v19  ;;  %v2225_v42 = vsel %vm6332_vm2, %v2223_v11, 0.0  ;;  %v2268_v4 = vrot.slane %v2261_v49, %v4358_v27  ;;  %vm6375_vm6 = vmand %vm2330_vm5, %vm2331_vm7 }
 0x548   : > { %vm7541_vm3 = vcmp.lt.s32.totalorder %v4351_v45, 14  ;;  %v2306_v43 = vrot.slane %v2299_v56, %v4358_v27  ;;  %v2354_v38 = vrot.slane %v2347_v2, %v4358_v27  ;;  %v2392_v63 = vcombine.low %v2388_v37, %v2389_v36  ;;  %v2591_v2 = vpop.permute.xlu0 %2590 }
 0x549   : > { %vm6385_vm0 = vmand %vm6349_vm8, %vm7541_vm3  ;;  %v2437_v22 = vcombine.low %v2433_v46, %v2434_v32  ;;  %vm7544_vm5 = vcmp.ge.s32.totalorder %v4351_v45, 4294967293  ;;  %v2478_v55 = vadd.f32 %v5851_v9, %v2473_v60  ;;  %v2479_v7 = vadd.f32 %v5868_v51, %v2474_v33  ;;  %v2593_v9 = vpop.permute.xlu1 %2592 }
 0x54a   : > { %vm6395_vm7 = vmand %vm6120_vm10, %vm7544_vm5  ;;  %v2518_v30 = vmul.f32 %v2517_v17, %v2505_v41  ;;  %v2519_v5 = vmul.f32 %v2517_v17, %v2506_v61  ;;  %v7547_v20 = vmov %v7533_v53  ;;  %v7548_v1 = vstv %s5272_s17  ;;  %s6442_s17 = sld [smem:[#allocation6 + $0x2c]] }
 0x54b   : > { %v6404_v48 = vmul.f32 %v7547_v20, %v6232_v40  ;;  %v6408_v44 = vmul.f32 %v7548_v1, %v2784_v29  ;;  %v7549_v8 = vmov %v7548_v1  ;;  %v2829_v11 = vsel %vm2822_vm14, %v7551_v16, %v7550_v14 }
 0x54c   : > { %v6412_v39 = vmul.f32 %v7549_v8, %v2785_v26  ;;  %vm7552_vm10 = vcmp.ge.s32.totalorder %v4351_v45, 3  ;;  %v2226_v51 = vadd.f32 %v2225_v42, %v2181_v59  ;;  %v2562_v40 = vstv %s6326_s25  ;;  %v2636_v59 = vpop.permute.xlu0 %2635 }
 0x54d   : > { %vm2333_vm2 = vmand %vm6375_vm6, %vm7552_vm10  ;;  %v2550_v49 = vsel %vm2549_vm12, %v2546_v10, %v2548_v21  ;;  %v2551_v56 = vsel %vm2549_vm12, %v2548_v21, %v2546_v10  ;;  %v2270_v47 = vsel %vm6385_vm0, %v2268_v4, 0.0  ;;  %vm7553_vm15 = vcmp.lt.s32.totalorder %v4351_v45, 13 }
 0x54e   : > { %vm6433_vm8 = vmand %vm6395_vm7, %vm7553_vm15  ;;  %v2313_v37 = vrot.slane %v2306_v43, %v4358_v27  ;;  %v2361_v36 = vrot.slane %v2354_v38, %v4358_v27  ;;  %v2399_v46 = vrot.slane %v2392_v63, %v4358_v27  ;;  %vm7556_vm12 = vcmp.lt.s32.totalorder %v4351_v45, 19 }
 0x54f   : > { %vm6446_vm3 = vmand %vm2333_vm2, %vm7556_vm12  ;;  %v2444_v53 = vrot.slane %v2437_v22, %v4358_v27  ;;  %v2482_v19 = vcombine.low %v2478_v55, %v2479_v7  ;;  %v2523_v62 = vadd.f32 %v5876_v34, %v2518_v30  ;;  %v2524_v60 = vadd.f32 %v5897_v12, %v2519_v5  ;;  %v2638_v34 = vpop.permute.xlu1 %2637 }
 0x550   : > { %v6457_v33 = vsel %vm2822_vm14, %v7550_v14, %v7551_v16  ;;  %vm7559_vm0 = vcmp.ge.s32.totalorder %v4351_v45, 2  ;;  %v2563_v3 = vmul.f32 %v2562_v40, %v2550_v49  ;;  %v2564_v29 = vmul.f32 %v2562_v40, %v2551_v56  ;;  %v2684_v40 = vpop.permute.xlu0 %2683 }
 0x551   : > { %vm6463_vm5 = vmand %vm6375_vm6, %vm7559_vm0  ;;  %v2607_v17 = vstv %s6362_s4  ;;  %v2271_v41 = vadd.f32 %v2270_v47, %v2226_v51  ;;  %vm7562_vm7 = vcmp.ge.s32.totalorder %v4351_v45, 1  ;;  %v2595_v61 = vsel %vm2594_vm13, %v2591_v2, %v2593_v9 }
 0x552   : > { %vm6472_vm10 = vmand %vm6375_vm6, %vm7562_vm7  ;;  %v2596_v21 = vsel %vm2594_vm13, %v2593_v9, %v2591_v2  ;;  %v2655_v26 = vstv %s6379_s27  ;;  %v2315_v42 = vsel %vm6433_vm8, %v2313_v37, 0.0  ;;  %v2363_v4 = vsel %vm6446_vm3, %v2361_v36, 0.0 }
 0x553   : > { %v2640_v10 = vsel %vm2639_vm4, %v2636_v59, %v2638_v34  ;;  %v2641_v35 = vsel %vm2639_vm4, %v2638_v34, %v2636_v59  ;;  %vm7565_vm2 = vcmp.lt.s32.totalorder %v4351_v45, 18  ;;  %v2406_v38 = vrot.slane %v2399_v46, %v4358_v27  ;;  %v2686_v1 = vpop.permute.xlu1 %2685 }
 0x554   : > { %vm6493_vm13 = vmand %vm6463_vm5, %vm7565_vm2  ;;  %v2451_v63 = vrot.slane %v2444_v53, %v4358_v27  ;;  %v2489_v22 = vrot.slane %v2482_v19, %v4358_v27  ;;  %v2527_v52 = vcombine.low %v2523_v62, %v2524_v60  ;;  %vm2867_vm4 = vcmp.lt.s32.totalorder %v3781_v25, 78 }
 0x555   : > { %vm7568_vm15 = vcmp.lt.s32.totalorder %v4351_v45, 17  ;;  %v2568_v7 = vadd.f32 %v6010_v54, %v2563_v3  ;;  %v2569_v30 = vadd.f32 %v6014_v31, %v2564_v29  ;;  %v2608_v5 = vmul.f32 %v2607_v17, %v2595_v61  ;;  %v2729_v29 = vpop.permute.xlu0 %2728 }
 0x556   : > { %vm6507_vm8 = vmand %vm6472_vm10, %vm7568_vm15  ;;  %v2609_v20 = vmul.f32 %v2607_v17, %v2596_v21  ;;  %v7571_v8 = vstv %s5274_s10  ;;  %v2316_v16 = vadd.f32 %v2315_v42, %v2271_v41  ;;  %v2656_v9 = vmul.f32 %v2655_v26, %v2640_v10  ;;  %s6665_s10 = sld [smem:[#allocation6 + $0x30]] }
 0x557   : > { %v6515_v14 = vmul.f32 %v7571_v8, %v2829_v11  ;;  %v2657_v51 = vmul.f32 %v2655_v26, %v2641_v35  ;;  %vm7572_vm12 = vcmp.ge.s32.totalorder %v4351_v45, 0  ;;  %v2700_v54 = vstv %s6440_s16  ;;  %v2731_v19 = vpop.permute.xlu1 %2730 }
 0x558   : > { %vm6521_vm3 = vmand %vm6375_vm6, %vm7572_vm12  ;;  %v2688_v31 = vsel %vm2687_vm9, %v2684_v40, %v2686_v1  ;;  %v2689_v11 = vsel %vm2687_vm9, %v2686_v1, %v2684_v40  ;;  %v2745_v56 = vstv %s6442_s17  ;;  %v2364_v2 = vadd.f32 %v2363_v4, %v2316_v16 }
 0x559   : > { %v2408_v47 = vsel %vm6493_vm13, %v2406_v38, 0.0  ;;  %v2453_v28 = vsel %vm6507_vm8, %v2451_v63, 0.0  ;;  %v2496_v37 = vrot.slane %v2489_v22, %v4358_v27  ;;  %v2534_v36 = vrot.slane %v2527_v52, %v4358_v27  ;;  %v2774_v63 = vpop.permute.xlu0 %2773 }
 0x55a   : > { %v2572_v46 = vcombine.low %v2568_v7, %v2569_v30  ;;  %v2613_v32 = vadd.f32 %v6018_v24, %v2608_v5  ;;  %v2614_v53 = vadd.f32 %v6022_v58, %v2609_v20  ;;  %vm7575_vm9 = vcmp.lt.s32.totalorder %v4351_v45, 16  ;;  %v7588_v5 = vld [vmem:[#allocation92_spill] sm:$0xff]  ;;  %v7589_v20 = vld [vmem:[#allocation93_spill] sm:$0xff] }
 0x55b   : > { %vm6545_vm0 = vmand %vm6521_vm3, %vm7575_vm9  ;;  %v2661_v60 = vadd.f32 %v6096_v0, %v2656_v9  ;;  %v2662_v57 = vadd.f32 %v6160_v50, %v2657_v51  ;;  %v2701_v3 = vmul.f32 %v2700_v54, %v2688_v31  ;;  %v2702_v24 = vmul.f32 %v2700_v54, %v2689_v11  ;;  %v2776_v42 = vpop.permute.xlu1 %2775 }
 0x55c   : > { %v2409_v58 = vadd.f32 %v2408_v47, %v2364_v2  ;;  %vm2648_vm5 = vcmp.ge.s32.totalorder %v6053_v13, 4294967293  ;;  %v2733_v17 = vsel %vm2732_vm1, %v2729_v29, %v2731_v19  ;;  %v2734_v34 = vsel %vm2732_vm1, %v2731_v19, %v2729_v29 }
 0x55d   : > { %vm7578_vm7 = vcmp.ge.s32.totalorder %v4351_v45, 4294967295  ;;  %vm2649_vm2 = vcmp.lt.s32.totalorder %v6053_v13, 13  ;;  %v2746_v50 = vmul.f32 %v2745_v56, %v2733_v17  ;;  %v2747_v41 = vmul.f32 %v2745_v56, %v2734_v34  ;;  %v2819_v2 = vpop.permute.xlu0 %2818 }
 0x55e   : > { %vm6560_vm10 = vmand %vm6375_vm6, %vm7578_vm7  ;;  %v2790_v12 = vstv %s6500_s21  ;;  %v2454_v61 = vadd.f32 %v2453_v28, %v2409_v58  ;;  %v2498_v21 = vsel %vm6545_vm0, %v2496_v37, 0.0  ;;  %v2579_v26 = vrot.slane %v2572_v46, %v4358_v27 }
 0x55f   : > { %v2617_v59 = vcombine.low %v2613_v32, %v2614_v53  ;;  %v2541_v4 = vrot.slane %v2534_v36, %v4358_v27  ;;  %vm7581_vm1 = vcmp.ge.s32.totalorder %v4351_v45, 4294967294  ;;  %v2665_v35 = vcombine.low %v2661_v60, %v2662_v57  ;;  %vm6607_vm12 = vmand %vm2648_vm5, %vm2649_vm2  ;;  %v2821_v51 = vpop.permute.xlu1 %2820 }
 0x560   : > { %vm6576_vm13 = vmand %vm6375_vm6, %vm7581_vm1  ;;  %v2706_v43 = vadd.f32 %v6164_v6, %v2701_v3  ;;  %v2707_v38 = vadd.f32 %v6182_v23, %v2702_v24  ;;  %vm7584_vm15 = vcmp.lt.s32.totalorder %v4351_v45, 15  ;;  %v2751_v52 = vadd.f32 %v6343_v18, %v2746_v50 }
 0x561   : > { %vm6586_vm8 = vmand %vm6560_vm10, %vm7584_vm15  ;;  %v2752_v55 = vadd.f32 %v6404_v48, %v2747_v41  ;;  %v2778_v7 = vsel %vm2777_vm11, %v2774_v63, %v2776_v42  ;;  %v2779_v6 = vsel %vm2777_vm11, %v2776_v42, %v2774_v63  ;;  %v7587_v23 = vmov %v7571_v8  ;;  %v2864_v50 = vpop.permute.xlu0 %2863 }
 0x562   : > { %v2840_v30 = vmul.f32 %v7587_v23, %v6457_v33  ;;  %v2874_v1 = vsel %vm2867_vm4, %v7589_v20, %v7588_v5  ;;  %v2791_v48 = vmul.f32 %v2790_v12, %v2778_v7  ;;  %v2792_v8 = vmul.f32 %v2790_v12, %v2779_v6 }
 0x563   : > { %v2499_v16 = vadd.f32 %v2498_v21, %v2454_v61  ;;  %vm7592_vm11 = vcmp.lt.s32.totalorder %v4351_v45, 14  ;;  %v2586_v9 = vrot.slane %v2579_v26, %v4358_v27  ;;  %v2624_v13 = vrot.slane %v2617_v59, %v4358_v27  ;;  %v2866_v3 = vpop.permute.xlu1 %2865 }
 0x564   : > { %vm6615_vm3 = vmand %vm6576_vm13, %vm7592_vm11  ;;  %v2835_v40 = vstv %s6539_s18  ;;  %v2543_v49 = vsel %vm6586_vm8, %v2541_v4, 0.0  ;;  %vm7595_vm9 = vcmp.ge.s32.totalorder %v4351_v45, 4294967293  ;;  %v2710_v31 = vcombine.low %v2706_v43, %v2707_v38 }
 0x565   : > { %vm6628_vm0 = vmand %vm6375_vm6, %vm7595_vm9  ;;  %v2796_v11 = vadd.f32 %v6408_v44, %v2791_v48  ;;  %v2797_v56 = vadd.f32 %v6412_v39, %v2792_v8  ;;  %vm7598_vm5 = vcmp.ge.s32.totalorder %v4351_v45, 3  ;;  %v2672_v15 = vrot.slane %v2665_v35, %v4358_v27  ;;  %v2909_v6 = vpop.permute.xlu0 %2908 }
 0x566   : > { %vm6638_vm7 = vmand %vm6607_vm12, %vm7598_vm5  ;;  %v2755_v28 = vcombine.low %v2751_v52, %v2752_v55  ;;  %v2823_v37 = vsel %vm2822_vm14, %v2819_v2, %v2821_v51  ;;  %v2824_v44 = vsel %vm2822_vm14, %v2821_v51, %v2819_v2  ;;  %v2875_v39 = vsel %vm2867_vm4, %v7588_v5, %v7589_v20 }
 0x567   : > { %v7601_v36 = vstv %s5281_s29  ;;  %v2836_v32 = vmul.f32 %v2835_v40, %v2823_v37  ;;  %v2837_v53 = vmul.f32 %v2835_v40, %v2824_v44  ;;  %v2544_v19 = vadd.f32 %v2543_v49, %v2499_v16  ;;  %v2911_v38 = vpop.permute.xlu1 %2910  ;;  %s7626_s29 = sld [smem:[#allocation15_spill]] }
 0x568   : > { %v2884_v46 = vmul.f32 %v7601_v36, %v2874_v1  ;;  %v2588_v62 = vsel %vm6615_vm3, %v2586_v9, 0.0  ;;  %vm7602_vm6 = vcmp.lt.s32.totalorder %v4351_v45, 13  ;;  %v2631_v57 = vrot.slane %v2624_v13, %v4358_v27 }
 0x569   : > { %vm6659_vm10 = vmand %vm6628_vm0, %vm7602_vm6  ;;  %v2880_v24 = vstv %s6569_s6  ;;  %vm7605_vm14 = vcmp.lt.s32.totalorder %v4351_v45, 19  ;;  %v2717_v58 = vrot.slane %v2710_v31, %v4358_v27  ;;  %v2800_v17 = vcombine.low %v2796_v11, %v2797_v56  ;;  %v2916_v31 = vpop.permute.xlu0 %2915 }
 0x56a   : > { %vm6673_vm2 = vmand %vm6638_vm7, %vm7605_vm14  ;;  %v2841_v34 = vadd.f32 %v6515_v14, %v2836_v32  ;;  %v2842_v0 = vadd.f32 %v2840_v30, %v2837_v53  ;;  %v2679_v41 = vrot.slane %v2672_v15, %v4358_v27  ;;  %vm7608_vm1 = vcmp.ge.s32.totalorder %v4351_v45, 2  ;;  %v7633_v14 = vld [vmem:[#allocation27_spill] sm:$0xff] }
 0x56b   : > { %vm2696_vm13 = vmand %vm6607_vm12, %vm7608_vm1  ;;  %v2762_v12 = vrot.slane %v2755_v28, %v4358_v27  ;;  %v2868_v61 = vsel %vm2867_vm4, %v2864_v50, %v2866_v3  ;;  %v2869_v21 = vsel %vm2867_vm4, %v2866_v3, %v2864_v50  ;;  %v7609_v26 = vmov %v7601_v36  ;;  %v2918_v9 = vpop.permute.xlu1 %2917 }
 0x56c   : > { %v2885_v59 = vmul.f32 %v7609_v26, %v2875_v39  ;;  %vm7610_vm15 = vcmp.ge.s32.totalorder %v4351_v45, 1  ;;  %v2845_v42 = vcombine.low %v2841_v34, %v2842_v0  ;;  %v2881_v4 = vmul.f32 %v2880_v24, %v2868_v61 }
 0x56d   : > { %vm6695_vm8 = vmand %vm6607_vm12, %vm7610_vm15  ;;  %v2882_v10 = vmul.f32 %v2880_v24, %v2869_v21  ;;  %v2589_v35 = vadd.f32 %v2588_v62, %v2544_v19  ;;  %v2633_v43 = vsel %vm6659_vm10, %v2631_v57, 0.0  ;;  %vm2912_vm4 = vcmp.lt.s32.totalorder %v3781_v25, 77  ;;  %s3208_s13 = sshll.u32 %s7626_s29, 10 }
 0x56e   : > { %vm7613_vm11 = vcmp.lt.s32.totalorder %v4351_v45, 18  ;;  %v2724_v22 = vrot.slane %v2717_v58, %v4358_v27  ;;  %v2807_v52 = vrot.slane %v2800_v17, %v4358_v27  ;;  %v2886_v55 = vadd.f32 %v2884_v46, %v2881_v4  ;;  %v7634_v4 = vld [vmem:[#allocation24_spill] sm:$0xff]  ;;  %s6779_s8 = scalar_lea.hbm %s7636_s5, %s3208_s13 }
 0x56f   : > { %vm6704_vm3 = vmand %vm2696_vm13, %vm7613_vm11  ;;  %v2887_v7 = vadd.f32 %v2885_v59, %v2882_v10  ;;  %v2681_v23 = vsel %vm6673_vm2, %v2679_v41, 0.0  ;;  %vm7616_vm9 = vcmp.lt.s32.totalorder %v4351_v45, 17  ;;  %v2769_v5 = vrot.slane %v2762_v12, %v4358_v27  ;;  %v7629_v41 = vld [vmem:[#allocation21_spill] sm:$0xff] }
 0x570   : > { %vm6716_vm0 = vmand %vm6695_vm8, %vm7616_vm9  ;;  %v2852_v20 = vrot.slane %v2845_v42, %v4358_v27  ;;  %v2634_v1 = vadd.f32 %v2633_v43, %v2589_v35  ;;  %vm7619_vm5 = vcmp.ge.s32.totalorder %v4351_v45, 0  ;;  %v2925_v8 = vstv %s6665_s10  ;;  %v7635_v35 = vld [vmem:[#allocation25_spill] sm:$0xff] }
 0x571   : > { %vm2786_vm7 = vmand %vm6607_vm12, %vm7619_vm5  ;;  %v2890_v48 = vcombine.low %v2886_v55, %v2887_v7  ;;  %v2913_v16 = vsel %vm2912_vm4, %v2909_v6, %v2911_v38  ;;  %v2914_v33 = vsel %vm2912_vm4, %v2911_v38, %v2909_v6  ;;  %v2928_v13 = vstv %s6667_s14  ;;  %v7637_v38 = vld [vmem:[#allocation22_spill] sm:$0xff]  ;;  %v7640_v55 = vld [vmem:[#allocation28_spill] sm:$0xff] }
 0x572   : > { %v2682_v51 = vadd.f32 %v2681_v23, %v2634_v1  ;;  %v2726_v40 = vsel %vm6704_vm3, %v2724_v22, 0.0  ;;  %v2814_v49 = vrot.slane %v2807_v52, %v4358_v27  ;;  %vm7620_vm6 = vcmp.ge.s32.totalorder %v4351_v45, 4294967295  ;;  %v7638_v22 = vld [vmem:[#allocation23_spill] sm:$0xff]  ;;  %v7641_v6 = vld [vmem:[#allocation29_spill] sm:$0xff] }
 0x573   : > { %vm2831_vm10 = vmand %vm6607_vm12, %vm7620_vm6  ;;  %v2897_v54 = vrot.slane %v2890_v48, %v4358_v27  ;;  %v2771_v11 = vsel %vm6716_vm0, %v2769_v5, 0.0  ;;  %vm7621_vm14 = vcmp.lt.s32.totalorder %v4351_v45, 16  ;;  %v2859_v56 = vrot.slane %v2852_v20, %v4358_v27 }
 0x574   : > { %vm2787_vm2 = vmand %vm2786_vm7, %vm7621_vm14  ;;  %v2919_v2 = vsel %vm2912_vm4, %v2916_v31, %v2918_v9  ;;  %v2920_v47 = vsel %vm2912_vm4, %v2918_v9, %v2916_v31  ;;  %vm7622_vm1 = vcmp.ge.s32.totalorder %v4351_v45, 4294967294  ;;  %v2926_v15 = vmul.f32 %v2925_v8, %v2913_v16 }
 0x575   : > { %vm2876_vm13 = vmand %vm6607_vm12, %vm7622_vm1  ;;  %v2927_v28 = vmul.f32 %v2925_v8, %v2914_v33  ;;  %v2929_v37 = vmul.f32 %v2928_v13, %v2919_v2  ;;  %v2930_v44 = vmul.f32 %v2928_v13, %v2920_v47  ;;  %v2727_v39 = vadd.f32 %v2726_v40, %v2682_v51 }
 0x576   : > { %vm7623_vm15 = vcmp.lt.s32.totalorder %v4351_v45, 15  ;;  %v2816_v36 = vsel %vm2787_vm2, %v2814_v49, 0.0  ;;  %v2904_v46 = vrot.slane %v2897_v54, %v4358_v27  ;;  %vm7624_vm4 = vcmp.lt.s32.totalorder %v4351_v45, 14 }
 0x577   : > { %vm2832_vm8 = vmand %vm2831_vm10, %vm7623_vm15  ;;  %v2931_v32 = vadd.f32 %v2929_v37, %v2926_v15  ;;  %v2932_v53 = vadd.f32 %v2930_v44, %v2927_v28  ;;  %v2772_v25 = vadd.f32 %v2771_v11, %v2727_v39  ;;  %vm7625_vm3 = vcmp.ge.s32.totalorder %v4351_v45, 4294967293 }
 0x578   : > { %vm2877_vm11 = vmand %vm2876_vm13, %vm7624_vm4  ;;  %v2861_v19 = vsel %vm2832_vm8, %v2859_v56, 0.0  ;;  %vm7627_vm0 = vcmp.lt.s32.totalorder %v4351_v45, 13  ;;  %v2966_v12 = vsub.s32 1, %v7629_v41  ;;  %v7630_v21 = vsub.s32 0, %v7629_v41 }
 0x579   : > { %vm2921_vm9 = vmand %vm6607_vm12, %vm7625_vm3  ;;  %v2935_v62 = vcombine.low %v2931_v32, %v2932_v53  ;;  %v2817_v60 = vadd.f32 %v2816_v36, %v2772_v25  ;;  %v2906_v57 = vsel %vm2877_vm11, %v2904_v46, 0.0 }
 0x57a   : > { %vm2922_vm5 = vmand %vm2921_vm9, %vm7627_vm0 }
 0x57b   : > { %v2942_v3 = vrot.slane %v2935_v62, %v4358_v27  ;;  %v2862_v24 = vadd.f32 %v2861_v19, %v2817_v60 }
 0x57d   : > { %v2949_v29 = vrot.slane %v2942_v3, %v4358_v27  ;;  %v2907_v58 = vadd.f32 %v2906_v57, %v2862_v24  ;;  %v7632_v27 = vld [vmem:[#allocation26_spill] sm:$0xff] }
 0x57f   : > { %v2951_v17 = vsel %vm2922_vm5, %v2949_v29, 0.0 }
 0x580   : > { %v2952_v34 = vadd.f32 %v2951_v17, %v2907_v58 }
 0x582   : > { %v3201_v0 = vmul.f32 -1.442695, %v2952_v34 }
 0x584   : > { %3384 = vpow2.f32 %v3201_v0 }
 0x58e   : > { %v3385_v18 = vpop.eup %3384 }
 0x58f   : > { %v2956_v50 = vadd.f32 1.0, %v3385_v18 }
 0x591   : > { %3386 = vrcp.f32 %v2956_v50 }
 0x59b   : > { %v3387_v61 = vpop.eup %3386 }
 0x59c   : > { %v2963_v26 = vrot.slane %v3387_v61, %v7630_v21  ;;  %v2967_v45 = vrot.slane %v3387_v61, %v2966_v12 }
 0x59e   : > { %v2970_v59 = vmul.f32 %v2963_v26, %v7632_v27  ;;  %v2971_v42 = vmul.f32 %v2967_v45, %v7633_v14  ;;  %v2972_v10 = vmul.f32 %v2963_v26, %v7634_v4  ;;  %v2973_v43 = vmul.f32 %v2967_v45, %v7635_v35 }
 0x59f   : > { %v2974_v63 = vmul.f32 %v2963_v26, %v7637_v38  ;;  %v2975_v52 = vmul.f32 %v2967_v45, %v7638_v22  ;;  %v2976_v7 = vmul.f32 %v2963_v26, %v7640_v55  ;;  %v2977_v23 = vmul.f32 %v2967_v45, %v7641_v6 }
 0x5a0   : > { %2978 = vst [vmem:[%s256_s9] sm:$0xff] %v2970_v59  ;;  %2979 = vst [vmem:[%s256_s9 + $0x8] sm:$0xff] %v2971_v42 }
 0x5a1   : > { %2980 = vst [vmem:[%s256_s9 + $0x10] sm:$0xff] %v2972_v10  ;;  %2981 = vst [vmem:[%s256_s9 + $0x18] sm:$0xff] %v2973_v43 }
 0x5a2   : > { %2982 = vst [vmem:[%s256_s9 + $0x20] sm:$0xff] %v2974_v63  ;;  %2983 = vst [vmem:[%s256_s9 + $0x28] sm:$0xff] %v2975_v52 }
 0x5a3   : > { %2984 = vst [vmem:[%s256_s9 + $0x30] sm:$0xff] %v2976_v7  ;;  %2985 = vst [vmem:[%s256_s9 + $0x38] sm:$0xff] %v2977_v23 }
 0x5a4   : > { %3447 = shalt.err (!%p3444_p11)
}
 0x5a5   : > { %s3448_s19 = scalar_lea.hbm %s6779_s8, 1024  ;;  %s3452_s15 = scalar_lea.hbm %s7636_s5, 2048 }
 0x5a6   : > { %p3449_p0 = scmp.ne.s32.totalorder %s6779_s8, %s3448_s19  ;;  %p3453_p6 = scmp.lt.u32.totalorder %s6779_s8, %s7636_s5 }
 0x5a7   : > { %p3454_p3 = scmp.lt.u32.totalorder %s3452_s15, %s3448_s19  ;;  %p3456_p5 = scmp.lt.u32.totalorder %s3448_s19, %s6779_s8 }
 0x5a8   : > { %p3450_p2 = pnand %p3449_p0, %p7642_p12 }
 0x5a9   : > { %p3455_p13 = por %p3454_p3, %p3453_p6 }
 0x5aa   : > { %p3451_p7 = pneg %p3450_p2 }
 0x5ab   : > { %p3457_p8 = por %p3456_p5, %p3455_p13 }
 0x5ad   : > { %p3458_p9 = pnand %p3457_p8, %p3451_p7 }
 0x5af   : > { %3461 = shalt.err (!%p3458_p9)
}
 0x5b0   : > { %s3563_s4 = smov 256   ;;  %s7643_s27 = smov 16  }
 0x5b1   : > { %3274 = dma.vmem_to_hbm [thread:$0]  (%p7642_p12), %s6785_s12, 1024, %s6779_s8, %s2987_s28, %s3563_s4, %s3563_s4, %s7643_s27  }
 0x5b2 PF: > { %s7644_s16 = sld [smem:[#allocation11_spill]]  ;;  %s7645_s17 = sld [smem:[#allocation19_spill]] }
 0x5b3   : > { %s7646_s21 = sld [smem:[#allocation14_spill]] }
 0x5b8   : > { %s3015_s18 = sand.u32 1, %s7644_s16   ;;  %p7647_p10 = scmp.ne.s32.totalorder %s7645_s17, 0 }
 0x5b9   : > { %p7648_p1 = scmp.ge.s32.totalorder %s7646_s21, 2  ;;  %s3016_s6 = scalar_lea.sflag [#allocation4], %s3015_s18 }
 0x5bb   : > { %p3285_p4 = pnand %p7648_p1, %p7647_p10 }
 0x5bd   : > { %3487 = dma.done.wait (!%p3285_p4), %s3016_s6, 1024  }
 0x5be   : > { %3489 = vsyncadd (!%p3285_p4), %s3016_s6, 4294966272  ;;  %s7649_s21 = sld [smem:[#allocation16_spill]]  ;;  %s7650_s18 = sld [smem:[#allocation12_spill]] }
 0x5bf   : > { %s7651_s19 = sld [smem:[#allocation13_spill]]  ;;  %s7652_s20 = sld [smem:[#allocation17_spill]] }
 0x5c4   : > { %p19_p11 = scmp.ge.s32.totalorder %s7649_s21, 4  }
 0x5c6   :  { %21 = sbr.rel (!%p19_p11) target bundleno = 13 (0xd), region = 91 }
 0x5cd   :  { %3021 = vsyncpa [#allocation3], 1 }
 0x5ce   :  { %3023 = vsyncpa [#allocation3 + $0x1], 1 }
 0x5cf   :  { %3024 = vsyncpa [#allocation4], 1 }
 0x5d0   :  { %3026 = vsyncpa [#allocation4 + $0x1], 1 }
 0x5d1   :  { %3027 = vsyncpa [#allocation5], 1 }
 0x5d2   :  { %3029 = vsyncpa [#allocation5 + $0x1], 1 }

</bundles_post_ra>
